<compile_context>
chip_gen: v7x
topology: tpu7x:2x2x1
jax: 0.10.0
libtpu: 0.0.40
codegen_flags: <defaults>
</compile_context>

<pallas_src>
import jax
import jax.numpy as jnp
from jax.experimental import pallas as pl
from jax.experimental.pallas import tpu as pltpu


def _round_up(x, m):
    return (x + m - 1) // m * m


def _chip_traits():
    """Return (multi_tensorcore, is_v7x); conservative on unknown chips."""
    try:
        kind = jax.devices()[0].device_kind.lower()
    except Exception:
        return False, False
    is_v7x = "v7" in kind
    multi_tc = is_v7x or ("v4" in kind) or ("v5p" in kind)
    return multi_tc, is_v7x


def _pick_block_b(B, per_sample_bytes, *, multi_tc, budget_bytes):
    # Candidate batch tiles: divisors of B whose output-block sublane dim is
    # either the full batch or a multiple of 8 (the (8,128) rule).
    cands = [b for b in range(1, B + 1)
             if B % b == 0 and (b == B or b % 8 == 0)]
    # Double-buffered input tiles must stay inside the per-tile VMEM budget.
    cap = max(1, budget_bytes // (2 * max(per_sample_bytes, 1)))
    fits = [b for b in cands if b <= cap] or [min(cands)]
    if multi_tc:
        # Force >= 2 grid steps so the "parallel" axis shards across both TCs.
        sub = [b for b in fits if b < B]
        if sub:
            return max(sub)
    return max(fits)


# ----------------------------------------------------------------------------
# Fused kernel: SummaryAttn(data1) + SummaryAttn(data2) + predict MLP head
# ----------------------------------------------------------------------------
def _fused_kernel(d1_ref, mb1_ref, d2_ref, mb2_ref,
                  w11_ref, b11_ref, w12_ref, b12_ref,
                  w21_ref, b21_ref, w22_ref, b22_ref,
                  wa1_ref, wa2_ref, ba_ref, wb_ref, bb_ref,
                  out_ref):
    mm_dtype = w11_ref.dtype          # MXU operand dtype (bf16 by default)

    def summary(x_ref, bias_ref, w1_ref, b1_ref, w2_ref, b2_ref):
        x = x_ref[...]                                   # (Bt, S, D), bf16
        bt, s, d = x.shape
        a = w2_ref.shape[-1]

        # Linear(dim, dim) + ReLU as one flattened (Bt*S, D) MXU matmul.
        x2 = x.reshape(bt * s, d).astype(mm_dtype)
        h = jnp.dot(x2, w1_ref[...],
                    preferred_element_type=jnp.float32) + b1_ref[...]
        h = jnp.maximum(h, 0.0)

        # Linear(dim, num_attn), flattened; additive mask bias instead of
        # masked_fill (0.0 valid / -1e9 padded).
        logits = jnp.dot(h.astype(mm_dtype), w2_ref[...],
                         preferred_element_type=jnp.float32) + b2_ref[...]
        logits = logits.reshape(bt, s, a) + bias_ref[...].astype(jnp.float32)

        # Softmax over the sequence axis (dim=1 in PyTorch).
        m = jnp.max(logits, axis=1, keepdims=True)
        e = jnp.exp(logits - m)
        denom = jnp.sum(e, axis=1, keepdims=True)
        p = e * pl.reciprocal(denom, approx=True)        # (Bt, S, A)

        # mean over heads folded into the contraction:
        #   mean_a sum_s p[b,s,a]*x[b,s,d] == (sum_a p) . x / A
        # keepdims keeps S on sublanes -> lane splat, no XLU relayout.
        wsum = jnp.sum(p, axis=-1, keepdims=True)        # (Bt, S, 1)
        if s >= 256:
            # Long sequences: contract S on the MXU (it has slack here).
            summ = jax.lax.dot_general(
                wsum.astype(mm_dtype), x.astype(mm_dtype),
                dimension_numbers=(((1,), (1,)), ((0,), (0,))),
                preferred_element_type=jnp.float32).reshape(bt, d)
        else:
            summ = jnp.sum(wsum * x.astype(jnp.float32), axis=1)
        return summ * (1.0 / a)                          # (Bt, D)

    s1 = summary(d1_ref, mb1_ref, w11_ref, b11_ref, w12_ref, b12_ref)
    s2 = summary(d2_ref, mb2_ref, w21_ref, b21_ref, w22_ref, b22_ref)

    # Head: concat(s1, s2) @ W1 == s1 @ Wa1 + s2 @ Wa2 (no in-kernel concat).
    h = (jnp.dot(s1.astype(mm_dtype), wa1_ref[...],
                 preferred_element_type=jnp.float32)
         + jnp.dot(s2.astype(mm_dtype), wa2_ref[...],
                   preferred_element_type=jnp.float32)
         + ba_ref[...])
    h = jnp.maximum(h, 0.0)
    # TODO(synk): nn.Dropout is identity in eval mode; training-mode dropout
    # (pltpu.prng_*) intentionally not emitted.
    out = jnp.dot(h.astype(mm_dtype), wb_ref[...],
                  preferred_element_type=jnp.float32) + bb_ref[...]
    out_ref[...] = out.astype(out_ref.dtype)


# ----------------------------------------------------------------------------
# One-time parameter preparation (hoisted out of the per-call forward path)
# ----------------------------------------------------------------------------
def prepare_params(params, dim1, *, mm_dtype=jnp.bfloat16):
    """Split the concat weight, zero-pad the answer head to 128 lanes and
    pre-cast all matmul operands to the MXU dtype. Call ONCE per model."""
    p = params
    hidden = p['p_w1'].shape[1]
    num_ans = p['p_w2'].shape[1]
    n_pad = _round_up(num_ans, 128)     # lane-dense output store

    wb = jnp.zeros((hidden, n_pad), jnp.float32).at[:, :num_ans].set(p['p_w2'])
    bb = jnp.zeros((1, n_pad), jnp.float32).at[:, :num_ans].set(p['p_b2'])

    w = lambda x: x.astype(mm_dtype)          # matmul operands -> bf16
    b = lambda x: x.astype(jnp.float32)       # biases stay f32 (added to acc)

    prep = {
        's1_w1': w(p['s1_w1']), 's1_b1': b(p['s1_b1']),
        's1_w2': w(p['s1_w2']), 's1_b2': b(p['s1_b2']),
        's2_w1': w(p['s2_w1']), 's2_b1': b(p['s2_b1']),
        's2_w2': w(p['s2_w2']), 's2_b2': b(p['s2_b2']),
        'wa1': w(p['p_w1'][:dim1]), 'wa2': w(p['p_w1'][dim1:]),
        'p_b1': b(p['p_b1']),
        'wb': w(wb), 'bb': b(bb),
    }
    prep = jax.tree_util.tree_map(jax.block_until_ready, prep)
    return prep, num_ans, n_pad


# ----------------------------------------------------------------------------
# Full PredictLayer forward (single pallas_call)
# ----------------------------------------------------------------------------
def predict_layer_forward(prep, num_ans, n_pad, data1, data2, mask1, mask2, *,
                          block_b=None, vmem_limit_bytes=32 * 1024 * 1024):
    B, S1, D1 = data1.shape
    B2, S2, D2 = data2.shape
    assert B == B2
    hidden = prep['p_b1'].shape[-1]
    A = prep['s1_w2'].shape[-1]

    # Additive softmax bias (0 valid / -1e9 padded) at the activation dtype.
    mb1 = ((mask1.astype(jnp.float32) - 1.0) * 1e9).astype(data1.dtype)[:, :, None]
    mb2 = ((mask2.astype(jnp.float32) - 1.0) * 1e9).astype(data2.dtype)[:, :, None]

    multi_tc, is_v7x = _chip_traits()
    if block_b is None:
        per_sample = (S1 * D1 + S2 * D2) * data1.dtype.itemsize
        # v7x has half the VMEM (64 MiB physical) -> halve the tile budget.
        budget = (2 << 20) if is_v7x else (4 << 20)
        block_b = _pick_block_b(B, per_sample, multi_tc=multi_tc,
                                budget_bytes=budget)
    assert B % block_b == 0, "batch must be divisible by block_b"

    grid = (B // block_b,)

    def batch_spec3(s, d):              # batch-tiled 3-D operands
        return pl.BlockSpec((block_b, s, d), lambda i: (i, 0, 0))

    def resident2(arr):                 # weights/biases stay VMEM-resident
        return pl.BlockSpec(arr.shape, lambda i: (0, 0))

    # Advisory cost estimate so XLA overlaps the wrapper ops with the kernel.
    flops = 2 * B * (S1 * D1 * D1 + S1 * D1 * A + S1 * D1
                     + S2 * D2 * D2 + S2 * D2 * A + S2 * D2
                     + (D1 + D2) * hidden + hidden * n_pad)
    transcendentals = B * A * (S1 + S2)
    weight_bytes = sum(int(v.size) * v.dtype.itemsize for v in prep.values())
    bytes_accessed = (data1.nbytes + data2.nbytes + mb1.nbytes + mb2.nbytes
                      + weight_bytes + B * n_pad * 4)

    out = pl.pallas_call(
        _fused_kernel,
        out_shape=jax.ShapeDtypeStruct((B, n_pad), jnp.float32),
        grid=grid,
        in_specs=[
            batch_spec3(S1, D1),                 # data1
            batch_spec3(S1, 1),                  # mask bias 1
            batch_spec3(S2, D2),                 # data2
            batch_spec3(S2, 1),                  # mask bias 2
            resident2(prep['s1_w1']), resident2(prep['s1_b1']),
            resident2(prep['s1_w2']), resident2(prep['s1_b2']),
            resident2(prep['s2_w1']), resident2(prep['s2_b1']),
            resident2(prep['s2_w2']), resident2(prep['s2_b2']),
            resident2(prep['wa1']), resident2(prep['wa2']),
            resident2(prep['p_b1']),
            resident2(prep['wb']), resident2(prep['bb']),
        ],
        out_specs=pl.BlockSpec((block_b, n_pad), lambda i: (i, 0)),
        compiler_params=pltpu.CompilerParams(
            dimension_semantics=("parallel",),
            vmem_limit_bytes=vmem_limit_bytes),
        cost_estimate=pl.CostEstimate(flops=flops,
                                      transcendentals=transcendentals,
                                      bytes_accessed=bytes_accessed),
    )(data1, mb1, data2, mb2,
      prep['s1_w1'], prep['s1_b1'], prep['s1_w2'], prep['s1_b2'],
      prep['s2_w1'], prep['s2_b1'], prep['s2_w2'], prep['s2_b2'],
      prep['wa1'], prep['wa2'], prep['p_b1'], prep['wb'], prep['bb'])

    return out[:, :num_ans]


# ----------------------------------------------------------------------------
# Pure-JAX reference (mirrors the PyTorch math) and parameter init
# ----------------------------------------------------------------------------
def _summary_ref(data, mask, w1, b1, w2, b2):
    h = jnp.maximum(data @ w1 + b1, 0.0)
    w = h @ w2 + b2
    w = jnp.where(mask[:, :, None] == 0.0, -1e9, w)
    w = jax.nn.softmax(w, axis=1)
    weighted = jnp.einsum('bsa,bsd->bad', w, data)
    return weighted.mean(axis=1)


def _forward_ref(params, data1, data2, mask1, mask2):
    p = params
    s1 = _summary_ref(data1, mask1, p['s1_w1'], p['s1_b1'], p['s1_w2'], p['s1_b2'])
    s2 = _summary_ref(data2, mask2, p['s2_w1'], p['s2_b1'], p['s2_w2'], p['s2_b2'])
    x = jnp.concatenate([s1, s2], axis=-1)
    h = jnp.maximum(x @ p['p_w1'] + p['p_b1'], 0.0)
    return h @ p['p_w2'] + p['p_b2']


def init_params(key, dim1, dim2, num_attn, num_ans):
    hidden = (dim1 + dim2) // 2
    ks = jax.random.split(key, 12)

    def lin(kw, kb, fan_in, fan_out):
        lim = 1.0 / jnp.sqrt(fan_in)
        w = jax.random.uniform(kw, (fan_in, fan_out), jnp.float32, -lim, lim)
        b = jax.random.uniform(kb, (1, fan_out), jnp.float32, -lim, lim)
        return w, b

    p = {}
    p['s1_w1'], p['s1_b1'] = lin(ks[0], ks[1], dim1, dim1)
    p['s1_w2'], p['s1_b2'] = lin(ks[2], ks[3], dim1, num_attn)
    p['s2_w1'], p['s2_b1'] = lin(ks[4], ks[5], dim2, dim2)
    p['s2_w2'], p['s2_b2'] = lin(ks[6], ks[7], dim2, num_attn)
    p['p_w1'], p['p_b1'] = lin(ks[8], ks[9], dim1 + dim2, hidden)
    p['p_w2'], p['p_b2'] = lin(ks[10], ks[11], hidden, num_ans)
    return p


if __name__ == "__main__":
    batch, seq1, seq2 = 16, 8, 16
    dim1, dim2, num_attn, num_ans = 32, 32, 4, 10

    key = jax.random.PRNGKey(0)
    k_d1, k_d2, k_p = jax.random.split(key, 3)

    data1_f32 = jax.random.normal(k_d1, (batch, seq1, dim1), jnp.float32)
    data2_f32 = jax.random.normal(k_d2, (batch, seq2, dim2), jnp.float32)

    # masks: 1.0 = valid, 0.0 = padded (exercise the masking path)
    mask1 = jnp.ones((batch, seq1), jnp.float32).at[1, seq1 - 2:].set(0.0)
    mask2 = jnp.ones((batch, seq2), jnp.float32).at[0, seq2 - 5:].set(0.0)

    params = init_params(k_p, dim1, dim2, num_attn, num_ans)

    # One-time weight prep (split / pad / bf16-cast) — hoisted out of forward.
    prep, n_ans, n_pad = prepare_params(params, dim1)

    # Activations live in HBM as bf16 (halves the batch*seq DMA traffic).
    data1 = data1_f32.astype(jnp.bfloat16)
    data2 = data2_f32.astype(jnp.bfloat16)

    out = predict_layer_forward(prep, n_ans, n_pad, data1, data2, mask1, mask2)
    out = jax.block_until_ready(out)

    # f32 reference on the same (bf16-quantized) activations.
    ref = _forward_ref(params, data1.astype(jnp.float32),
                       data2.astype(jnp.float32), mask1, mask2)
    assert out.shape == (batch, num_ans)
    # bf16 MXU operands + approx softmax reciprocal -> looser tolerance than
    # the pure-f32 variant.
    assert jnp.allclose(out, ref, rtol=3e-2, atol=3e-2), "mismatch vs reference"

    print("KERNEL_OK")
</pallas_src>

<mosaic_0001>
module attributes {stable_mosaic.version = 11 : i64} {
  func.func @_fused_kernel(%arg0: i32, %arg1: memref<16x8x32xbf16, #tpu.memory_space<vmem>>, %arg2: memref<16x8x1xbf16, #tpu.memory_space<vmem>>, %arg3: memref<16x16x32xbf16, #tpu.memory_space<vmem>>, %arg4: memref<16x16x1xbf16, #tpu.memory_space<vmem>>, %arg5: memref<32x32xbf16, #tpu.memory_space<vmem>>, %arg6: memref<1x32xf32, #tpu.memory_space<vmem>>, %arg7: memref<32x4xbf16, #tpu.memory_space<vmem>>, %arg8: memref<1x4xf32, #tpu.memory_space<vmem>>, %arg9: memref<32x32xbf16, #tpu.memory_space<vmem>>, %arg10: memref<1x32xf32, #tpu.memory_space<vmem>>, %arg11: memref<32x4xbf16, #tpu.memory_space<vmem>>, %arg12: memref<1x4xf32, #tpu.memory_space<vmem>>, %arg13: memref<32x32xbf16, #tpu.memory_space<vmem>>, %arg14: memref<32x32xbf16, #tpu.memory_space<vmem>>, %arg15: memref<1x32xf32, #tpu.memory_space<vmem>>, %arg16: memref<32x128xbf16, #tpu.memory_space<vmem>>, %arg17: memref<1x128xf32, #tpu.memory_space<vmem>>, %arg18: memref<16x128xf32, #tpu.memory_space<vmem>>) attributes {dimension_semantics = [#tpu.dimension_semantics<parallel>], iteration_bounds = array<i64: 1>, scalar_prefetch = 0 : i64, scratch_operands = 0 : i64, tpu.core_type = #tpu.core_type<tc>, window_params = [{transform_indices = @transform_0, window_bounds = array<i64: 16, 8, 32>}, {transform_indices = @transform_1, window_bounds = array<i64: 16, 8, 1>}, {transform_indices = @transform_2, window_bounds = array<i64: 16, 16, 32>}, {transform_indices = @transform_3, window_bounds = array<i64: 16, 16, 1>}, {pipeline_mode = #tpu.pipeline_mode<synchronous>, transform_indices = @transform_4, window_bounds = array<i64: 32, 32>}, {pipeline_mode = #tpu.pipeline_mode<synchronous>, transform_indices = @transform_5, window_bounds = array<i64: 1, 32>}, {pipeline_mode = #tpu.pipeline_mode<synchronous>, transform_indices = @transform_6, window_bounds = array<i64: 32, 4>}, {pipeline_mode = #tpu.pipeline_mode<synchronous>, transform_indices = @transform_7, window_bounds = array<i64: 1, 4>}, {pipeline_mode = #tpu.pipeline_mode<synchronous>, transform_indices = @transform_8, window_bounds = array<i64: 32, 32>}, {pipeline_mode = #tpu.pipeline_mode<synchronous>, transform_indices = @transform_9, window_bounds = array<i64: 1, 32>}, {pipeline_mode = #tpu.pipeline_mode<synchronous>, transform_indices = @transform_10, window_bounds = array<i64: 32, 4>}, {pipeline_mode = #tpu.pipeline_mode<synchronous>, transform_indices = @transform_11, window_bounds = array<i64: 1, 4>}, {pipeline_mode = #tpu.pipeline_mode<synchronous>, transform_indices = @transform_12, window_bounds = array<i64: 32, 32>}, {pipeline_mode = #tpu.pipeline_mode<synchronous>, transform_indices = @transform_13, window_bounds = array<i64: 32, 32>}, {pipeline_mode = #tpu.pipeline_mode<synchronous>, transform_indices = @transform_14, window_bounds = array<i64: 1, 32>}, {pipeline_mode = #tpu.pipeline_mode<synchronous>, transform_indices = @transform_15, window_bounds = array<i64: 32, 128>}, {pipeline_mode = #tpu.pipeline_mode<synchronous>, transform_indices = @transform_16, window_bounds = array<i64: 1, 128>}, {transform_indices = @transform_17, window_bounds = array<i64: 16, 128>}]} {
    %c0 = arith.constant 0 : index
    %c0_0 = arith.constant 0 : index
    %c0_1 = arith.constant 0 : index
    %0 = vector.load %arg1[%c0, %c0_0, %c0_1] : memref<16x8x32xbf16, #tpu.memory_space<vmem>>, vector<16x8x32xbf16>
    %1 = vector.shape_cast %0 : vector<16x8x32xbf16> to vector<128x32xbf16>
    %c0_2 = arith.constant 0 : index
    %c0_3 = arith.constant 0 : index
    %2 = vector.load %arg5[%c0_2, %c0_3] : memref<32x32xbf16, #tpu.memory_space<vmem>>, vector<32x32xbf16>
    %cst = arith.constant dense<0.000000e+00> : vector<128x32xf32>
    %3 = tpu.matmul %1, %2, %cst {dimension_numbers = #tpu.dot_dimension_numbers<[1], [0], [0], [1], [0, 0, 1, 1], [], []>} : vector<128x32xbf16>, vector<32x32xbf16>, vector<128x32xf32> -> vector<128x32xf32>
    %c0_4 = arith.constant 0 : index
    %c0_5 = arith.constant 0 : index
    %4 = vector.load %arg6[%c0_4, %c0_5] : memref<1x32xf32, #tpu.memory_space<vmem>>, vector<1x32xf32>
    %5 = vector.broadcast %4 : vector<1x32xf32> to vector<128x32xf32>
    %6 = arith.addf %3, %5 : vector<128x32xf32>
    %cst_6 = arith.constant 0.000000e+00 : f32
    %7 = vector.broadcast %cst_6 : f32 to vector<128x32xf32>
    %8 = arith.maximumf %6, %7 : vector<128x32xf32>
    %9 = arith.truncf %8 : vector<128x32xf32> to vector<128x32xbf16>
    %c0_7 = arith.constant 0 : index
    %c0_8 = arith.constant 0 : index
    %10 = vector.load %arg7[%c0_7, %c0_8] : memref<32x4xbf16, #tpu.memory_space<vmem>>, vector<32x4xbf16>
    %cst_9 = arith.constant dense<0.000000e+00> : vector<128x4xf32>
    %11 = tpu.matmul %9, %10, %cst_9 {dimension_numbers = #tpu.dot_dimension_numbers<[1], [0], [0], [1], [0, 0, 1, 1], [], []>} : vector<128x32xbf16>, vector<32x4xbf16>, vector<128x4xf32> -> vector<128x4xf32>
    %c0_10 = arith.constant 0 : index
    %c0_11 = arith.constant 0 : index
    %12 = vector.load %arg8[%c0_10, %c0_11] : memref<1x4xf32, #tpu.memory_space<vmem>>, vector<1x4xf32>
    %13 = vector.broadcast %12 : vector<1x4xf32> to vector<128x4xf32>
    %14 = arith.addf %11, %13 : vector<128x4xf32>
    %15 = vector.shape_cast %14 : vector<128x4xf32> to vector<16x8x4xf32>
    %c0_12 = arith.constant 0 : index
    %c0_13 = arith.constant 0 : index
    %c0_14 = arith.constant 0 : index
    %16 = vector.load %arg2[%c0_12, %c0_13, %c0_14] : memref<16x8x1xbf16, #tpu.memory_space<vmem>>, vector<16x8x1xbf16>
    %17 = arith.extf %16 : vector<16x8x1xbf16> to vector<16x8x1xf32>
    %18 = vector.broadcast %17 : vector<16x8x1xf32> to vector<16x8x4xf32>
    %19 = arith.addf %15, %18 : vector<16x8x4xf32>
    %cst_15 = arith.constant dense<0xFF800000> : vector<16x4xf32>
    %20 = vector.multi_reduction <maximumf>, %19, %cst_15 [1] : vector<16x8x4xf32> to vector<16x4xf32>
    %21 = vector.shape_cast %20 : vector<16x4xf32> to vector<16x1x4xf32>
    %22 = vector.broadcast %21 : vector<16x1x4xf32> to vector<16x8x4xf32>
    %23 = arith.subf %19, %22 : vector<16x8x4xf32>
    %24 = math.exp %23 : vector<16x8x4xf32>
    %cst_16 = arith.constant dense<0.000000e+00> : vector<16x4xf32>
    %25 = vector.multi_reduction <add>, %24, %cst_16 [1] : vector<16x8x4xf32> to vector<16x4xf32>
    %26 = vector.shape_cast %25 : vector<16x4xf32> to vector<16x1x4xf32>
    %27 = tpu.reciprocal %26 {approx = true} : vector<16x1x4xf32> -> vector<16x1x4xf32>
    %28 = vector.broadcast %27 : vector<16x1x4xf32> to vector<16x8x4xf32>
    %29 = arith.mulf %24, %28 : vector<16x8x4xf32>
    %cst_17 = arith.constant dense<0.000000e+00> : vector<16x8xf32>
    %30 = vector.multi_reduction <add>, %29, %cst_17 [2] : vector<16x8x4xf32> to vector<16x8xf32>
    %31 = vector.shape_cast %30 : vector<16x8xf32> to vector<16x8x1xf32>
    %32 = arith.extf %0 : vector<16x8x32xbf16> to vector<16x8x32xf32>
    %33 = vector.broadcast %31 : vector<16x8x1xf32> to vector<16x8x32xf32>
    %34 = arith.mulf %33, %32 : vector<16x8x32xf32>
    %cst_18 = arith.constant dense<0.000000e+00> : vector<16x32xf32>
    %35 = vector.multi_reduction <add>, %34, %cst_18 [1] : vector<16x8x32xf32> to vector<16x32xf32>
    %cst_19 = arith.constant 2.500000e-01 : f32
    %36 = vector.broadcast %cst_19 : f32 to vector<16x32xf32>
    %37 = arith.mulf %35, %36 : vector<16x32xf32>
    %c0_20 = arith.constant 0 : index
    %c0_21 = arith.constant 0 : index
    %c0_22 = arith.constant 0 : index
    %38 = vector.load %arg3[%c0_20, %c0_21, %c0_22] : memref<16x16x32xbf16, #tpu.memory_space<vmem>>, vector<16x16x32xbf16>
    %39 = vector.shape_cast %38 : vector<16x16x32xbf16> to vector<256x32xbf16>
    %c0_23 = arith.constant 0 : index
    %c0_24 = arith.constant 0 : index
    %40 = vector.load %arg9[%c0_23, %c0_24] : memref<32x32xbf16, #tpu.memory_space<vmem>>, vector<32x32xbf16>
    %cst_25 = arith.constant dense<0.000000e+00> : vector<256x32xf32>
    %41 = tpu.matmul %39, %40, %cst_25 {dimension_numbers = #tpu.dot_dimension_numbers<[1], [0], [0], [1], [0, 0, 1, 1], [], []>} : vector<256x32xbf16>, vector<32x32xbf16>, vector<256x32xf32> -> vector<256x32xf32>
    %c0_26 = arith.constant 0 : index
    %c0_27 = arith.constant 0 : index
    %42 = vector.load %arg10[%c0_26, %c0_27] : memref<1x32xf32, #tpu.memory_space<vmem>>, vector<1x32xf32>
    %43 = vector.broadcast %42 : vector<1x32xf32> to vector<256x32xf32>
    %44 = arith.addf %41, %43 : vector<256x32xf32>
    %cst_28 = arith.constant 0.000000e+00 : f32
    %45 = vector.broadcast %cst_28 : f32 to vector<256x32xf32>
    %46 = arith.maximumf %44, %45 : vector<256x32xf32>
    %47 = arith.truncf %46 : vector<256x32xf32> to vector<256x32xbf16>
    %c0_29 = arith.constant 0 : index
    %c0_30 = arith.constant 0 : index
    %48 = vector.load %arg11[%c0_29, %c0_30] : memref<32x4xbf16, #tpu.memory_space<vmem>>, vector<32x4xbf16>
    %cst_31 = arith.constant dense<0.000000e+00> : vector<256x4xf32>
    %49 = tpu.matmul %47, %48, %cst_31 {dimension_numbers = #tpu.dot_dimension_numbers<[1], [0], [0], [1], [0, 0, 1, 1], [], []>} : vector<256x32xbf16>, vector<32x4xbf16>, vector<256x4xf32> -> vector<256x4xf32>
    %c0_32 = arith.constant 0 : index
    %c0_33 = arith.constant 0 : index
    %50 = vector.load %arg12[%c0_32, %c0_33] : memref<1x4xf32, #tpu.memory_space<vmem>>, vector<1x4xf32>
    %51 = vector.broadcast %50 : vector<1x4xf32> to vector<256x4xf32>
    %52 = arith.addf %49, %51 : vector<256x4xf32>
    %53 = vector.shape_cast %52 : vector<256x4xf32> to vector<16x16x4xf32>
    %c0_34 = arith.constant 0 : index
    %c0_35 = arith.constant 0 : index
    %c0_36 = arith.constant 0 : index
    %54 = vector.load %arg4[%c0_34, %c0_35, %c0_36] : memref<16x16x1xbf16, #tpu.memory_space<vmem>>, vector<16x16x1xbf16>
    %55 = arith.extf %54 : vector<16x16x1xbf16> to vector<16x16x1xf32>
    %56 = vector.broadcast %55 : vector<16x16x1xf32> to vector<16x16x4xf32>
    %57 = arith.addf %53, %56 : vector<16x16x4xf32>
    %cst_37 = arith.constant dense<0xFF800000> : vector<16x4xf32>
    %58 = vector.multi_reduction <maximumf>, %57, %cst_37 [1] : vector<16x16x4xf32> to vector<16x4xf32>
    %59 = vector.shape_cast %58 : vector<16x4xf32> to vector<16x1x4xf32>
    %60 = vector.broadcast %59 : vector<16x1x4xf32> to vector<16x16x4xf32>
    %61 = arith.subf %57, %60 : vector<16x16x4xf32>
    %62 = math.exp %61 : vector<16x16x4xf32>
    %cst_38 = arith.constant dense<0.000000e+00> : vector<16x4xf32>
    %63 = vector.multi_reduction <add>, %62, %cst_38 [1] : vector<16x16x4xf32> to vector<16x4xf32>
    %64 = vector.shape_cast %63 : vector<16x4xf32> to vector<16x1x4xf32>
    %65 = tpu.reciprocal %64 {approx = true} : vector<16x1x4xf32> -> vector<16x1x4xf32>
    %66 = vector.broadcast %65 : vector<16x1x4xf32> to vector<16x16x4xf32>
    %67 = arith.mulf %62, %66 : vector<16x16x4xf32>
    %cst_39 = arith.constant dense<0.000000e+00> : vector<16x16xf32>
    %68 = vector.multi_reduction <add>, %67, %cst_39 [2] : vector<16x16x4xf32> to vector<16x16xf32>
    %69 = vector.shape_cast %68 : vector<16x16xf32> to vector<16x16x1xf32>
    %70 = arith.extf %38 : vector<16x16x32xbf16> to vector<16x16x32xf32>
    %71 = vector.broadcast %69 : vector<16x16x1xf32> to vector<16x16x32xf32>
    %72 = arith.mulf %71, %70 : vector<16x16x32xf32>
    %cst_40 = arith.constant dense<0.000000e+00> : vector<16x32xf32>
    %73 = vector.multi_reduction <add>, %72, %cst_40 [1] : vector<16x16x32xf32> to vector<16x32xf32>
    %cst_41 = arith.constant 2.500000e-01 : f32
    %74 = vector.broadcast %cst_41 : f32 to vector<16x32xf32>
    %75 = arith.mulf %73, %74 : vector<16x32xf32>
    %76 = arith.truncf %37 : vector<16x32xf32> to vector<16x32xbf16>
    %c0_42 = arith.constant 0 : index
    %c0_43 = arith.constant 0 : index
    %77 = vector.load %arg13[%c0_42, %c0_43] : memref<32x32xbf16, #tpu.memory_space<vmem>>, vector<32x32xbf16>
    %cst_44 = arith.constant dense<0.000000e+00> : vector<16x32xf32>
    %78 = tpu.matmul %76, %77, %cst_44 {dimension_numbers = #tpu.dot_dimension_numbers<[1], [0], [0], [1], [0, 0, 1, 1], [], []>} : vector<16x32xbf16>, vector<32x32xbf16>, vector<16x32xf32> -> vector<16x32xf32>
    %79 = arith.truncf %75 : vector<16x32xf32> to vector<16x32xbf16>
    %c0_45 = arith.constant 0 : index
    %c0_46 = arith.constant 0 : index
    %80 = vector.load %arg14[%c0_45, %c0_46] : memref<32x32xbf16, #tpu.memory_space<vmem>>, vector<32x32xbf16>
    %cst_47 = arith.constant dense<0.000000e+00> : vector<16x32xf32>
    %81 = tpu.matmul %79, %80, %cst_47 {dimension_numbers = #tpu.dot_dimension_numbers<[1], [0], [0], [1], [0, 0, 1, 1], [], []>} : vector<16x32xbf16>, vector<32x32xbf16>, vector<16x32xf32> -> vector<16x32xf32>
    %82 = arith.addf %78, %81 : vector<16x32xf32>
    %c0_48 = arith.constant 0 : index
    %c0_49 = arith.constant 0 : index
    %83 = vector.load %arg15[%c0_48, %c0_49] : memref<1x32xf32, #tpu.memory_space<vmem>>, vector<1x32xf32>
    %84 = vector.broadcast %83 : vector<1x32xf32> to vector<16x32xf32>
    %85 = arith.addf %82, %84 : vector<16x32xf32>
    %cst_50 = arith.constant 0.000000e+00 : f32
    %86 = vector.broadcast %cst_50 : f32 to vector<16x32xf32>
    %87 = arith.maximumf %85, %86 : vector<16x32xf32>
    %88 = arith.truncf %87 : vector<16x32xf32> to vector<16x32xbf16>
    %c0_51 = arith.constant 0 : index
    %c0_52 = arith.constant 0 : index
    %89 = vector.load %arg16[%c0_51, %c0_52] : memref<32x128xbf16, #tpu.memory_space<vmem>>, vector<32x128xbf16>
    %cst_53 = arith.constant dense<0.000000e+00> : vector<16x128xf32>
    %90 = tpu.matmul %88, %89, %cst_53 {dimension_numbers = #tpu.dot_dimension_numbers<[1], [0], [0], [1], [0, 0, 1, 1], [], []>} : vector<16x32xbf16>, vector<32x128xbf16>, vector<16x128xf32> -> vector<16x128xf32>
    %c0_54 = arith.constant 0 : index
    %c0_55 = arith.constant 0 : index
    %91 = vector.load %arg17[%c0_54, %c0_55] : memref<1x128xf32, #tpu.memory_space<vmem>>, vector<1x128xf32>
    %92 = vector.broadcast %91 : vector<1x128xf32> to vector<16x128xf32>
    %93 = arith.addf %90, %92 : vector<16x128xf32>
    %c0_56 = arith.constant 0 : index
    %c0_57 = arith.constant 0 : index
    %94 = vector.load %arg18[%c0_56, %c0_57] : memref<16x128xf32, #tpu.memory_space<vmem>>, vector<16x128xf32>
    tpu.vector_store %arg18[%c0_56, %c0_57], %93 {strides = array<i32>} : memref<16x128xf32, #tpu.memory_space<vmem>>, vector<16x128xf32>,
    return
  }
  func.func @transform_0(%arg0: i32) -> (i32, i32, i32) {
    %c0_i32 = arith.constant 0 : i32
    %c0_i32_0 = arith.constant 0 : i32
    %c0_i32_1 = arith.constant 0 : i32
    return %arg0, %c0_i32, %c0_i32_0 : i32, i32, i32
  }
  func.func @transform_1(%arg0: i32) -> (i32, i32, i32) {
    %c0_i32 = arith.constant 0 : i32
    %c0_i32_0 = arith.constant 0 : i32
    %c0_i32_1 = arith.constant 0 : i32
    return %arg0, %c0_i32, %c0_i32_0 : i32, i32, i32
  }
  func.func @transform_2(%arg0: i32) -> (i32, i32, i32) {
    %c0_i32 = arith.constant 0 : i32
    %c0_i32_0 = arith.constant 0 : i32
    %c0_i32_1 = arith.constant 0 : i32
    return %arg0, %c0_i32, %c0_i32_0 : i32, i32, i32
  }
  func.func @transform_3(%arg0: i32) -> (i32, i32, i32) {
    %c0_i32 = arith.constant 0 : i32
    %c0_i32_0 = arith.constant 0 : i32
    %c0_i32_1 = arith.constant 0 : i32
    return %arg0, %c0_i32, %c0_i32_0 : i32, i32, i32
  }
  func.func @transform_4(%arg0: i32) -> (i32, i32) {
    %c0_i32 = arith.constant 0 : i32
    %c0_i32_0 = arith.constant 0 : i32
    %c0_i32_1 = arith.constant 0 : i32
    return %c0_i32, %c0_i32_0 : i32, i32
  }
  func.func @transform_5(%arg0: i32) -> (i32, i32) {
    %c0_i32 = arith.constant 0 : i32
    %c0_i32_0 = arith.constant 0 : i32
    %c0_i32_1 = arith.constant 0 : i32
    return %c0_i32, %c0_i32_0 : i32, i32
  }
  func.func @transform_6(%arg0: i32) -> (i32, i32) {
    %c0_i32 = arith.constant 0 : i32
    %c0_i32_0 = arith.constant 0 : i32
    %c0_i32_1 = arith.constant 0 : i32
    return %c0_i32, %c0_i32_0 : i32, i32
  }
  func.func @transform_7(%arg0: i32) -> (i32, i32) {
    %c0_i32 = arith.constant 0 : i32
    %c0_i32_0 = arith.constant 0 : i32
    %c0_i32_1 = arith.constant 0 : i32
    return %c0_i32, %c0_i32_0 : i32, i32
  }
  func.func @transform_8(%arg0: i32) -> (i32, i32) {
    %c0_i32 = arith.constant 0 : i32
    %c0_i32_0 = arith.constant 0 : i32
    %c0_i32_1 = arith.constant 0 : i32
    return %c0_i32, %c0_i32_0 : i32, i32
  }
  func.func @transform_9(%arg0: i32) -> (i32, i32) {
    %c0_i32 = arith.constant 0 : i32
    %c0_i32_0 = arith.constant 0 : i32
    %c0_i32_1 = arith.constant 0 : i32
    return %c0_i32, %c0_i32_0 : i32, i32
  }
  func.func @transform_10(%arg0: i32) -> (i32, i32) {
    %c0_i32 = arith.constant 0 : i32
    %c0_i32_0 = arith.constant 0 : i32
    %c0_i32_1 = arith.constant 0 : i32
    return %c0_i32, %c0_i32_0 : i32, i32
  }
  func.func @transform_11(%arg0: i32) -> (i32, i32) {
    %c0_i32 = arith.constant 0 : i32
    %c0_i32_0 = arith.constant 0 : i32
    %c0_i32_1 = arith.constant 0 : i32
    return %c0_i32, %c0_i32_0 : i32, i32
  }
  func.func @transform_12(%arg0: i32) -> (i32, i32) {
    %c0_i32 = arith.constant 0 : i32
    %c0_i32_0 = arith.constant 0 : i32
    %c0_i32_1 = arith.constant 0 : i32
    return %c0_i32, %c0_i32_0 : i32, i32
  }
  func.func @transform_13(%arg0: i32) -> (i32, i32) {
    %c0_i32 = arith.constant 0 : i32
    %c0_i32_0 = arith.constant 0 : i32
    %c0_i32_1 = arith.constant 0 : i32
    return %c0_i32, %c0_i32_0 : i32, i32
  }
  func.func @transform_14(%arg0: i32) -> (i32, i32) {
    %c0_i32 = arith.constant 0 : i32
    %c0_i32_0 = arith.constant 0 : i32
    %c0_i32_1 = arith.constant 0 : i32
    return %c0_i32, %c0_i32_0 : i32, i32
  }
  func.func @transform_15(%arg0: i32) -> (i32, i32) {
    %c0_i32 = arith.constant 0 : i32
    %c0_i32_0 = arith.constant 0 : i32
    %c0_i32_1 = arith.constant 0 : i32
    return %c0_i32, %c0_i32_0 : i32, i32
  }
  func.func @transform_16(%arg0: i32) -> (i32, i32) {
    %c0_i32 = arith.constant 0 : i32
    %c0_i32_0 = arith.constant 0 : i32
    %c0_i32_1 = arith.constant 0 : i32
    return %c0_i32, %c0_i32_0 : i32, i32
  }
  func.func @transform_17(%arg0: i32) -> (i32, i32) {
    %c0_i32 = arith.constant 0 : i32
    %c0_i32_0 = arith.constant 0 : i32
    return %arg0, %c0_i32 : i32, i32
  }
}

</mosaic_0001>

<bundles_post_ra>
// kernel: tpu_custom_call.1
= control target key start
LH: loop header
LB: loop body
LE: loop exit
PB: predicated region body
PF: predicated region fallthrough
CT: control target
= control target key end

     0   :  { %s5609_s0 = inlined_call_operand.vmem [shape: bf16[16,8,32], index: 0, kind: input, shape index: {}]   ;;  %s5610_s1 = inlined_call_operand.vmem [shape: bf16[16,8,1], index: 1, kind: input, shape index: {}]   ;;  %s5611_s2 = inlined_call_operand.vmem [shape: bf16[16,16,32], index: 2, kind: input, shape index: {}]   ;;  %s5612_s3 = inlined_call_operand.vmem [shape: bf16[16,16,1], index: 3, kind: input, shape index: {}]   ;;  %s5613_s4 = inlined_call_operand.vmem [shape: bf16[32,32], index: 4, kind: input, shape index: {}]   ;;  %s5614_s5 = inlined_call_operand.hbm [shape: f32[1,32], index: 5, kind: input, shape index: {}]   ;;  %s5615_s6 = inlined_call_operand.vmem [shape: bf16[32,4], index: 6, kind: input, shape index: {}]   ;;  %s5616_s7 = inlined_call_operand.hbm [shape: f32[1,4], index: 7, kind: input, shape index: {}]   ;;  %s5617_s8 = inlined_call_operand.vmem [shape: bf16[32,32], index: 8, kind: input, shape index: {}]   ;;  %s5618_s9 = inlined_call_operand.hbm [shape: f32[1,32], index: 9, kind: input, shape index: {}]   ;;  %s5619_s10 = inlined_call_operand.vmem [shape: bf16[32,4], index: 10, kind: input, shape index: {}]   ;;  %s5620_s11 = inlined_call_operand.vmem [shape: f32[1,4], index: 11, kind: input, shape index: {}]   ;;  %s5621_s12 = inlined_call_operand.vmem [shape: bf16[32,32], index: 12, kind: input, shape index: {}]   ;;  %s5622_s13 = inlined_call_operand.vmem [shape: bf16[32,32], index: 13, kind: input, shape index: {}]   ;;  %s5623_s14 = inlined_call_operand.vmem [shape: f32[1,32], index: 14, kind: input, shape index: {}]   ;;  %s5624_s15 = inlined_call_operand.vmem [shape: bf16[32,128], index: 15, kind: input, shape index: {}]   ;;  %s5625_s16 = inlined_call_operand.vmem [shape: f32[1,128], index: 16, kind: input, shape index: {}]   ;;  %s5626_s17 = inlined_call_operand.hbm [shape: f32[16,128], index: 17, kind: output, shape index: {}]  }
   0x1   :  { %5654 = sst [smem:[#allocation38_spill]] %s5609_s0 }
   0x2   :  { %5655 = sst [smem:[#allocation39_spill]] %s5610_s1 }
   0x3   :  { %22 = vsyncpa [#allocation3], 0 }
   0x4   :  { %23 = vsyncpa [#allocation6], 0 }
   0x5   :  { %24 = vsyncpa [#allocation4], 0  ;;  %s4021_s24 = smov [#allocation5]   ;;  %s4022_s26 = smov [#allocation2]  }
   0x6   :  { %s53_s25 = sshll.u32 %s4021_s24, 4  ;;  %s41_s27 = sshll.u32 %s4022_s26, 4  ;;  %s54_s25 = int_to_ptr.vmem [resolvable:$true] %s53_s25  ;;  %s42_s27 = int_to_ptr.vmem [resolvable:$true] %s41_s27 }
   0x7   :  { %s3927_s0 = scalar_lea.hbm %s5616_s7, 16 }
   0x8   :  { %p3928_p0 = scmp.ne.s32.totalorder %s5616_s7, %s3927_s0  ;;  %p3931_p1 = scmp.lt.u32.totalorder %s3927_s0, %s5616_s7 }
   0xa   :  { %p3933_p2 = pnand %p3931_p1, %p3928_p0 }
   0xc   :  { %3936 = shalt.err (!%p3933_p2)
}
   0xd   :  { %s3937_s20 = scalar_lea.vmem %s54_s25, 16  ;;  %s3941_s21 = scalar_lea.vmem %s54_s25, 32 }
   0xe   :  { %p3938_p3 = scmp.ne.s32.totalorder %s54_s25, %s3937_s20  ;;  %p3942_p4 = scmp.lt.s32.totalorder %s54_s25, %s54_s25 }
   0xf   :  { %p3943_p5 = scmp.lt.s32.totalorder %s3941_s21, %s3937_s20 }
  0x11   :  { %p3944_p6 = por %p3943_p5, %p3942_p4 }
  0x13   :  { %p3945_p7 = pnand %p3944_p6, %p3938_p3 }
  0x15   :  { %3948 = shalt.err (!%p3945_p7)
}
  0x16   :  { %56 = dma.hbm_to_vmem [thread:$0]  %s5616_s7, 16, %s54_s25, [#allocation6]  }
  0x17   :  { %s3949_s28 = scalar_lea.hbm %s5614_s5, 16 }
  0x18   :  { %p3950_p8 = scmp.ne.s32.totalorder %s5614_s5, %s3949_s28  ;;  %p3953_p9 = scmp.lt.u32.totalorder %s3949_s28, %s5614_s5 }
  0x1a   :  { %p3955_p10 = pnand %p3953_p9, %p3950_p8 }
  0x1c   :  { %3958 = shalt.err (!%p3955_p10)
}
  0x1d   :  { %s3959_s19 = scalar_lea.vmem %s42_s27, 16  ;;  %s3963_s1 = scalar_lea.vmem %s42_s27, 32 }
  0x1e   :  { %p3960_p11 = scmp.ne.s32.totalorder %s42_s27, %s3959_s19  ;;  %p3964_p12 = scmp.lt.s32.totalorder %s42_s27, %s42_s27 }
  0x1f   :  { %p3965_p13 = scmp.lt.s32.totalorder %s3963_s1, %s3959_s19 }
  0x21   :  { %p3966_p0 = por %p3965_p13, %p3964_p12 }
  0x23   :  { %p3967_p1 = pnand %p3966_p0, %p3960_p11 }
  0x25   :  { %3970 = shalt.err (!%p3967_p1)
}
  0x26   :  { %44 = dma.hbm_to_vmem [thread:$0]  %s5614_s5, 16, %s42_s27, [#allocation3]  }
  0x27   :  { %s4023_s20 = smov [#allocation7]   ;;  %s3971_s24 = scalar_lea.hbm %s5618_s9, 16 }
  0x28   :  { %s65_s21 = sshll.u32 %s4023_s20, 4  ;;  %p3972_p2 = scmp.ne.s32.totalorder %s5618_s9, %s3971_s24  ;;  %s66_s21 = int_to_ptr.vmem [resolvable:$true] %s65_s21 }
  0x29   :  { %p3975_p3 = scmp.lt.u32.totalorder %s3971_s24, %s5618_s9 }
  0x2b   :  { %p3977_p4 = pnand %p3975_p3, %p3972_p2 }
  0x2d   :  { %3980 = shalt.err (!%p3977_p4)
}
  0x2e   :  { %s3981_s30 = scalar_lea.vmem %s66_s21, 16  ;;  %s3985_s5 = scalar_lea.vmem %s66_s21, 32 }
  0x2f   :  { %p3982_p5 = scmp.ne.s32.totalorder %s66_s21, %s3981_s30  ;;  %p3986_p6 = scmp.lt.s32.totalorder %s66_s21, %s66_s21 }
  0x30   :  { %p3987_p7 = scmp.lt.s32.totalorder %s3985_s5, %s3981_s30 }
  0x32   :  { %p3988_p8 = por %p3987_p7, %p3986_p6 }
  0x34   :  { %p3989_p9 = pnand %p3988_p8, %p3982_p5 }
  0x36   :  { %3992 = shalt.err (!%p3989_p9)
}
  0x37   :  { %68 = dma.hbm_to_vmem [thread:$0]  %s5618_s9, 16, %s66_s21, [#allocation6]  }
  0x38   :  { %4015 = dma.done.wait [#allocation3], 16  }
  0x39   :  { %4016 = vsyncadd [#allocation3], 4294967280 }
  0x3a   :  { %4017 = dma.done.wait [#allocation6], 32  }
  0x3b   :  { %4018 = vsyncadd [#allocation6], 4294967264  ;;  %v3632_v0 = vld [vmem:[%s5613_s4] sm:$0xff]   ;;  %v3633_v1 = vld [vmem:[%s5613_s4 + $0x8] sm:$0xff]   ;;  %s5656_s23 = sld [smem:[#allocation38_spill]]  ;;  %vm172_vm0 = vcmask 261120  }
  0x3c   :  { %3365 = vmatprep.subr.bf16.mxu0 %v3632_v0  ;;  %v3636_v4 = vld [vmem:[%s5617_s8] sm:$0xff]   ;;  %v3641_v6 = vld [vmem:[%s5617_s8 + $0x8] sm:$0xff]   ;;  %v1107_v14 = vld [vmem:[%s5611_s2 + $0x10] sm:$0xff]   ;;  %v4024_v35 = vmov 0   ;;  %s5657_s30 = sld [smem:[#allocation39_spill]]  ;;  %vm590_vm1 = vcmask 31744  }
  0x3d   :  { %3366 = vmatpush3.bf16.msra.mxu0 %v3632_v0  ;;  %v1103_v12 = vld [vmem:[%s5611_s2] sm:$0xff]   ;;  %v1105_v13 = vld [vmem:[%s5611_s2 + $0x8] sm:$0xff]   ;;  %v1109_v15 = vld [vmem:[%s5611_s2 + $0x18] sm:$0xff]   ;;  %3510 = vset.pattern.permute.xlu0 %v4024_v35  ;;  %vm2807_vm2 = vcmask 1041409   ;;  %vm2809_vm3 = vcmask 1042434   ;;  %vm2811_vm4 = vcmask 1043459  }
  0x3e   :  { %3367 = vmatprep.subr.bf16.mxu0 %v3633_v1  ;;  %v1111_v16 = vld [vmem:[%s5611_s2 + $0x20] sm:$0xff]   ;;  %v1113_v17 = vld [vmem:[%s5611_s2 + $0x28] sm:$0xff]   ;;  %v1115_v18 = vld [vmem:[%s5611_s2 + $0x30] sm:$0xff]   ;;  %3521 = vset.pattern.permute.xlu1 %v4024_v35  ;;  %vm4026_vm5 = vmmov 0   ;;  %vm2813_vm6 = vcmask 1044484   ;;  %vm2815_vm7 = vcmask 1045509  }
  0x3f   :  { %v1117_v19 = vld [vmem:[%s5611_s2 + $0x38] sm:$0xff]   ;;  %v1119_v20 = vld [vmem:[%s5611_s2 + $0x40] sm:$0xff]   ;;  %v1121_v21 = vld [vmem:[%s5611_s2 + $0x48] sm:$0xff]   ;;  %vm2817_vm8 = vcmask 1046534   ;;  %vm2819_vm9 = vcmask 1047559  }
  0x40   :  { %v1123_v22 = vld [vmem:[%s5611_s2 + $0x50] sm:$0xff]   ;;  %v1125_v23 = vld [vmem:[%s5611_s2 + $0x58] sm:$0xff]   ;;  %v1127_v24 = vld [vmem:[%s5611_s2 + $0x60] sm:$0xff]  }
  0x41   :  { %v93_v2 = vld [vmem:[%s5656_s23] sm:$0xff]   ;;  %v95_v3 = vld [vmem:[%s5656_s23 + $0x8] sm:$0xff]   ;;  %v97_v5 = vld [vmem:[%s5656_s23 + $0x10] sm:$0xff]   ;;  %3368 = vmatpush3.bf16.msra.mxu0 %v3633_v1 }
  0x42   :  { %3369 = vmatprep.mubr.msk.bf16.mxu0 %vm172_vm0, %v93_v2  ;;  %3405 = vmatprep.subr.bf16.mxu0 %v3636_v4  ;;  %v99_v7 = vld [vmem:[%s5656_s23 + $0x18] sm:$0xff]   ;;  %v101_v8 = vld [vmem:[%s5656_s23 + $0x20] sm:$0xff]   ;;  %v103_v9 = vld [vmem:[%s5656_s23 + $0x28] sm:$0xff]  }
  0x43   :  { %v105_v10 = vld [vmem:[%s5656_s23 + $0x30] sm:$0xff]   ;;  %v107_v11 = vld [vmem:[%s5656_s23 + $0x38] sm:$0xff]   ;;  %v1129_v25 = vld [vmem:[%s5611_s2 + $0x68] sm:$0xff]  }
  0x44   :  { %3370 = vmatmul.mubr.msk.bf16.vlgmr.msra.gmra.mrb[0].mxu0 %vm172_vm0, %v95_v3  ;;  %v1131_v26 = vld [vmem:[%s5611_s2 + $0x70] sm:$0xff]   ;;  %v1133_v27 = vld [vmem:[%s5611_s2 + $0x78] sm:$0xff]   ;;  %v3660_v28 = vld [vmem:[%s5615_s6] sm:$0xff]  }
  0x45   :  { %3406 = vmatpush3.bf16.msra.mxu0 %v3636_v4  ;;  %3373 = vmatprep.mubr.msk.bf16.mxu0 %vm172_vm0, %v97_v5  ;;  %v3661_v29 = vld [vmem:[%s5615_s6 + $0x8] sm:$0xff]   ;;  %v4273_v30 = vld [vmem:[%s5619_s10] sm:$0xff]   ;;  %v3286_v45 = vld [vmem:[%s5612_s3 + $0x10] sm:$0xff]  }
  0x46   :  { %3407 = vmatprep.subr.bf16.mxu0 %v3641_v6  ;;  %3385 = vmatprep.subr.bf16.mxu1 %v3660_v28  ;;  %v3215_v31 = vld [vmem:[%s5612_s3] sm:$0xff]   ;;  %v3285_v37 = vld [vmem:[%s5612_s3 + $0x8] sm:$0xff]   ;;  %v3224_v48 = vunpack.c.l.bf16 %v3286_v45  ;;  %v3225_v49 = vunpack.c.h.bf16 %v3286_v45  ;;  %v3294_v52 = vld [vmem:[%s5612_s3 + $0x50] sm:$0xff]  }
  0x47   :  { %3386 = vmatpush3.bf16.msra.mxu1 %v3660_v28  ;;  %v3216_v32 = vunpack.c.l.bf16 %v3215_v31  ;;  %v3217_v33 = vunpack.c.h.bf16 %v3215_v31  ;;  %v3292_v36 = vld [vmem:[%s5612_s3 + $0x40] sm:$0xff]   ;;  %v3220_v40 = vunpack.c.l.bf16 %v3285_v37  ;;  %v3221_v41 = vunpack.c.h.bf16 %v3285_v37  ;;  %v3293_v44 = vld [vmem:[%s5612_s3 + $0x48] sm:$0xff]   ;;  %v3287_v53 = vld [vmem:[%s5612_s3 + $0x18] sm:$0xff]  }
  0x48   :  { %3387 = vmatprep.subr.bf16.mxu1 %v3661_v29  ;;  %v3248_v38 = vunpack.c.l.bf16 %v3292_v36  ;;  %v3249_v39 = vunpack.c.h.bf16 %v3292_v36  ;;  %v3252_v46 = vunpack.c.l.bf16 %v3293_v44  ;;  %v3253_v47 = vunpack.c.h.bf16 %v3293_v44  ;;  %v3295_v60 = vld [vmem:[%s5612_s3 + $0x58] sm:$0xff]   ;;  %v3288_v61 = vld [vmem:[%s5612_s3 + $0x20] sm:$0xff]   ;;  %v3289_v5 = vld [vmem:[%s5612_s3 + $0x28] sm:$0xff]  }
  0x49   :  { %3408 = vmatpush3.bf16.msra.mxu0 %v3641_v6  ;;  %v3511_v34 = vpack.i.bf16 %v3217_v33, %v3216_v32  ;;  %v3516_v43 = vpack.i.bf16 %v3221_v41, %v3220_v40  ;;  %v3532_v51 = vpack.i.bf16 %v3225_v49, %v3224_v48  ;;  %v3256_v54 = vunpack.c.l.bf16 %v3294_v52  ;;  %v3296_v4 = vld [vmem:[%s5612_s3 + $0x60] sm:$0xff]   ;;  %v3299_v37 = vld [vmem:[%s5612_s3 + $0x78] sm:$0xff]  }
  0x4a   :  { %v3522_v42 = vpack.i.bf16 %v3249_v39, %v3248_v38  ;;  %v3527_v50 = vpack.i.bf16 %v3253_v47, %v3252_v46  ;;  %v3257_v55 = vunpack.c.h.bf16 %v3294_v52  ;;  %v3228_v56 = vunpack.c.l.bf16 %v3287_v53  ;;  %v3281_v28 = vld [vmem:[%s5657_s30 + $0x20] sm:$0xff]   ;;  %v3278_v38 = vld [vmem:[%s5657_s30 + $0x8] sm:$0xff]   ;;  %v3279_v46 = vld [vmem:[%s5657_s30 + $0x10] sm:$0xff]  }
  0x4b   :  { %3388 = vmatpush3.bf16.msra.mxu1 %v3661_v29  ;;  %3512 = vperm.xlu0 %3510, %v3511_v34   ;;  %v3229_v57 = vunpack.c.h.bf16 %v3287_v53  ;;  %v3260_v62 = vunpack.c.l.bf16 %v3295_v60  ;;  %v3261_v63 = vunpack.c.h.bf16 %v3295_v60  ;;  %v3232_v0 = vunpack.c.l.bf16 %v3288_v61  ;;  %v3291_v29 = vld [vmem:[%s5612_s3 + $0x38] sm:$0xff]   ;;  %v3282_v39 = vld [vmem:[%s5657_s30 + $0x28] sm:$0xff]   ;;  %v3283_v47 = vld [vmem:[%s5657_s30 + $0x30] sm:$0xff]  }
  0x4c   :  { %3374 = vmatmul.mubr.msk.bf16.gmra.mrb[4].mxu0 %vm172_vm0, %v99_v7  ;;  %3441 = vmatprep.subr.bf16.mxu1 %v4273_v30  ;;  %v3537_v58 = vpack.i.bf16 %v3257_v55, %v3256_v54  ;;  %v3233_v1 = vunpack.c.h.bf16 %v3288_v61  ;;  %v3264_v6 = vunpack.c.l.bf16 %v3296_v4  ;;  %v3265_v7 = vunpack.c.h.bf16 %v3296_v4  ;;  %v3280_v54 = vld [vmem:[%s5657_s30 + $0x18] sm:$0xff]  }
  0x4d   :  { %3377 = vmatprep.mubr.msk.bf16.mxu0 %vm172_vm0, %v101_v8  ;;  %3523 = vperm.xlu1 %3521, %v3522_v42   ;;  %v3542_v59 = vpack.i.bf16 %v3229_v57, %v3228_v56  ;;  %v3547_v2 = vpack.i.bf16 %v3261_v63, %v3260_v62  ;;  %v3236_v8 = vunpack.c.l.bf16 %v3289_v5  ;;  %v3200_v31 = vunpack.c.l.bf16 %v3281_v28  ;;  %v3284_v55 = vld [vmem:[%s5657_s30 + $0x38] sm:$0xff]  }
  0x4e   :  { %v3552_v3 = vpack.i.bf16 %v3233_v1, %v3232_v0  ;;  %v3201_v32 = vunpack.c.h.bf16 %v3281_v28  ;;  %v3244_v33 = vunpack.c.l.bf16 %v3291_v29  ;;  %v3245_v34 = vunpack.c.h.bf16 %v3291_v29  ;;  %v3087_v1 = vld [vmem:[#allocation2] ss:$0 sm:$0xff] }
  0x4f   :  { %3517 = vperm.xlu0 %3510, %v3516_v43   ;;  %v3276_v40 = vunpack.c.l.bf16 %v3299_v37  ;;  %v3277_v41 = vunpack.c.h.bf16 %v3299_v37  ;;  %v3188_v42 = vunpack.c.l.bf16 %v3278_v38  ;;  %v3204_v43 = vunpack.c.l.bf16 %v3282_v39 }
  0x50   :  { %v3587_v35 = vpack.i.bf16 %v3201_v32, %v3200_v31  ;;  %v3592_v36 = vpack.i.bf16 %v3245_v34, %v3244_v33  ;;  %v3189_v48 = vunpack.c.h.bf16 %v3278_v38  ;;  %v3205_v49 = vunpack.c.h.bf16 %v3282_v39 }
  0x51   :  { %3528 = vperm.xlu1 %3521, %v3527_v50   ;;  %v3597_v44 = vpack.i.bf16 %v3277_v41, %v3276_v40  ;;  %v3602_v45 = vpack.i.bf16 %v3204_v43, %v3188_v42  ;;  %v3192_v50 = vunpack.c.l.bf16 %v3279_v46  ;;  %v3193_v56 = vunpack.c.h.bf16 %v3279_v46 }
  0x52   :  { %v3607_v52 = vpack.i.bf16 %v3205_v49, %v3189_v48  ;;  %v3209_v57 = vunpack.c.h.bf16 %v3283_v47  ;;  %v3197_v62 = vunpack.c.h.bf16 %v3280_v54  ;;  %v3213_v63 = vunpack.c.h.bf16 %v3284_v55 }
  0x53   :  { %3533 = vperm.xlu0 %3510, %v3532_v51   ;;  %v3208_v51 = vunpack.c.l.bf16 %v3283_v47 }
  0x54   :  { %3378 = vmatmul.mubr.msk.bf16.gmra.mrb[8].mxu0 %vm172_vm0, %v103_v9  ;;  %v3237_v9 = vunpack.c.h.bf16 %v3289_v5  ;;  %v3617_v60 = vpack.i.bf16 %v3209_v57, %v3193_v56  ;;  %v3627_v0 = vpack.i.bf16 %v3213_v63, %v3197_v62  ;;  %v4358_v57 = vld [vmem:[#allocation7] ss:$0 sm:$0xff] }
  0x55   :  { %3381 = vmatprep.mubr.msk.bf16.mxu0 %vm172_vm0, %v105_v10  ;;  %3538 = vperm.xlu1 %3521, %v3537_v58   ;;  %v3557_v10 = vpack.i.bf16 %v3265_v7, %v3264_v6  ;;  %v3612_v53 = vpack.i.bf16 %v3208_v51, %v3192_v50  ;;  %v3196_v58 = vunpack.c.l.bf16 %v3280_v54 }
  0x57   :  { %3543 = vperm.xlu0 %3510, %v3542_v59   ;;  %v3212_v59 = vunpack.c.l.bf16 %v3284_v55 }
  0x59   :  { %3548 = vperm.xlu1 %3521, %v3547_v2   ;;  %v3622_v61 = vpack.i.bf16 %v3212_v59, %v3196_v58 }
  0x5b   :  { %3553 = vperm.xlu0 %3510, %v3552_v3  }
  0x5c   :  { %3382 = vmatmul.mubr.msk.bf16.gmra.mrb[12].mxu0 %vm172_vm0, %v107_v11  ;;  %v3562_v11 = vpack.i.bf16 %v3237_v9, %v3236_v8 }
  0x5d   :  { %3409 = vmatprep.mubr.msk.bf16.mxu0 %vm172_vm0, %v1103_v12  ;;  %v3297_v12 = vld [vmem:[%s5612_s3 + $0x68] sm:$0xff]   ;;  %3558 = vperm.xlu1 %3521, %v3557_v10  }
  0x5f   :  { %3563 = vperm.xlu0 %3510, %v3562_v11  }
  0x64   :  { %3410 = vmatmul.mubr.msk.bf16.vlgmr.msra.gmra.mrb[16].mxu0 %vm172_vm0, %v1105_v13  ;;  %v3290_v13 = vld [vmem:[%s5612_s3 + $0x30] sm:$0xff]  }
  0x65   :  { %3413 = vmatprep.mubr.msk.bf16.mxu0 %vm172_vm0, %v1107_v14  ;;  %v3268_v14 = vunpack.c.l.bf16 %v3297_v12 }
  0x6c   :  { %3414 = vmatmul.mubr.msk.bf16.gmra.mrb[20].mxu0 %vm172_vm0, %v1109_v15  ;;  %v3269_v15 = vunpack.c.h.bf16 %v3297_v12 }
  0x6d   :  { %3417 = vmatprep.mubr.msk.bf16.mxu0 %vm172_vm0, %v1111_v16  ;;  %v3240_v16 = vunpack.c.l.bf16 %v3290_v13 }
  0x74   :  { %3418 = vmatmul.mubr.msk.bf16.gmra.mrb[24].mxu0 %vm172_vm0, %v1113_v17  ;;  %v3241_v17 = vunpack.c.h.bf16 %v3290_v13 }
  0x75   :  { %3421 = vmatprep.mubr.msk.bf16.mxu0 %vm172_vm0, %v1115_v18  ;;  %v3567_v18 = vpack.i.bf16 %v3269_v15, %v3268_v14 }
  0x77   :  { %3568 = vperm.xlu1 %3521, %v3567_v18  }
  0x7c   :  { %3422 = vmatmul.mubr.msk.bf16.gmra.mrb[28].mxu0 %vm172_vm0, %v1117_v19  ;;  %v3572_v19 = vpack.i.bf16 %v3241_v17, %v3240_v16 }
  0x7d   :  { %3425 = vmatprep.mubr.msk.bf16.mxu0 %vm172_vm0, %v1119_v20  ;;  %v3298_v20 = vld [vmem:[%s5612_s3 + $0x70] sm:$0xff]  }
  0x7e   :  { %3573 = vperm.xlu0 %3510, %v3572_v19   ;;  %v3663_v19 = vld [vmem:[%s5619_s10 + $0x8] sm:$0xff]  }
  0x84   :  { %3426 = vmatmul.mubr.msk.bf16.gmra.mrb[32].mxu0 %vm172_vm0, %v1121_v21  ;;  %v3183_v21 = vld [vmem:[%s5657_s30] sm:$0xff]  }
  0x85   :  { %3429 = vmatprep.mubr.msk.bf16.mxu0 %vm172_vm0, %v1123_v22  ;;  %v3272_v22 = vunpack.c.l.bf16 %v3298_v20 }
  0x8c   :  { %3430 = vmatmul.mubr.msk.bf16.gmra.mrb[36].mxu0 %vm172_vm0, %v1125_v23  ;;  %v3273_v23 = vunpack.c.h.bf16 %v3298_v20 }
  0x8d   :  { %3433 = vmatprep.mubr.msk.bf16.mxu0 %vm172_vm0, %v1127_v24  ;;  %v3184_v24 = vunpack.c.l.bf16 %v3183_v21 }
  0x94   :  { %3434 = vmatmul.mubr.msk.bf16.gmra.mrb[40].mxu0 %vm172_vm0, %v1129_v25  ;;  %v3185_v25 = vunpack.c.h.bf16 %v3183_v21 }
  0x95   :  { %3437 = vmatprep.mubr.msk.bf16.mxu0 %vm172_vm0, %v1131_v26  ;;  %v3577_v26 = vpack.i.bf16 %v3273_v23, %v3272_v22 }
  0x97   :  { %3578 = vperm.xlu1 %3521, %v3577_v26  }
  0x9b   :  { %3588 = vperm.xlu1 %3521, %v3587_v35  }
  0x9c   :  { %3438 = vmatmul.mubr.msk.bf16.gmra.mrb[44].mxu0 %vm172_vm0, %v1133_v27  ;;  %v3582_v27 = vpack.i.bf16 %v3185_v25, %v3184_v24 }
  0x9e   :  { %3583 = vperm.xlu0 %3510, %v3582_v27  }
  0x9f   :  { %3598 = vperm.xlu1 %3521, %v3597_v44  }
  0xa2   :  { %3593 = vperm.xlu0 %3510, %v3592_v36  }
  0xa3   :  { %3608 = vperm.xlu1 %3521, %v3607_v52  }
  0xa6   :  { %3603 = vperm.xlu0 %3510, %v3602_v45  }
  0xa7   :  { %3618 = vperm.xlu1 %3521, %v3617_v60  }
  0xaa   :  { %3613 = vperm.xlu0 %3510, %v3612_v53  }
  0xab   :  { %3628 = vperm.xlu1 %3521, %v3627_v0  }
  0xae   :  { %3623 = vperm.xlu0 %3510, %v3622_v61  }
 0x117   :  { %v3371_v2 = vpop.f32.mrb[0].mxu0 }
 0x118   :  { %v240_v3 = vadd.f32 %v3371_v2, %v3087_v1  ;;  %v231_v4 = vpop.f32.mrb[1].mxu0 }
 0x119   :  { %v232_v5 = vadd.f32 %v3087_v1, %v231_v4  ;;  %v3372_v6 = vpop.f32.mrb[2].mxu0 }
 0x11a   :  { %v243_v7 = vadd.f32 %v3372_v6, %v3087_v1  ;;  %v234_v8 = vpop.f32.mrb[3].mxu0  ;;  %v296_v10 = vmax.f32 %v240_v3, 0.0 }
 0x11b   :  { %v235_v9 = vadd.f32 %v3087_v1, %v234_v8  ;;  %v294_v12 = vmax.f32 %v232_v5, 0.0 }
 0x11c   :  { %v297_v11 = vmax.f32 %v243_v7, 0.0 }
 0x11d   :  { %v295_v13 = vmax.f32 %v235_v9, 0.0 }
 0x11e   :  { %v311_v14 = vpack.c.bf16 %v297_v11, %v296_v10 }
 0x11f   :  { %v3375_v15 = vpop.f32.mrb[4].mxu0  ;;  %v310_v16 = vpack.c.bf16 %v295_v13, %v294_v12 }
 0x120   :  { %v256_v17 = vadd.f32 %v3375_v15, %v3087_v1  ;;  %v247_v18 = vpop.f32.mrb[5].mxu0 }
 0x121   :  { %v248_v20 = vadd.f32 %v3087_v1, %v247_v18  ;;  %v3376_v21 = vpop.f32.mrb[6].mxu0  ;;  %3389 = vmatprep.mubr.msk.bf16.mxu1 %vm172_vm0, %v310_v16 }
 0x122   :  { %v259_v22 = vadd.f32 %v3376_v21, %v3087_v1  ;;  %v250_v23 = vpop.f32.mrb[7].mxu0  ;;  %3390 = vmatmul.mubr.msk.bf16.vlgmr.msra.gmra.mrb[0].mxu1 %vm172_vm0, %v311_v14  ;;  %v300_v25 = vmax.f32 %v256_v17, 0.0 }
 0x123   :  { %v251_v24 = vadd.f32 %v3087_v1, %v250_v23  ;;  %3442 = vmatpush3.bf16.msra.mxu1 %v4273_v30  ;;  %v298_v27 = vmax.f32 %v248_v20, 0.0 }
 0x124   :  { %v301_v26 = vmax.f32 %v259_v22, 0.0  ;;  %3443 = vmatprep.subr.bf16.mxu1 %v3663_v19 }
 0x125   :  { %v299_v28 = vmax.f32 %v251_v24, 0.0 }
 0x126   :  { %v313_v29 = vpack.c.bf16 %v301_v26, %v300_v25 }
 0x127   :  { %v312_v31 = vpack.c.bf16 %v299_v28, %v298_v27  ;;  %v3379_v32 = vpop.f32.mrb[8].mxu0  ;;  %3444 = vmatpush3.bf16.msra.mxu1 %v3663_v19 }
 0x128   :  { %v272_v33 = vadd.f32 %v3379_v32, %v3087_v1  ;;  %v263_v34 = vpop.f32.mrb[9].mxu0 }
 0x129   :  { %v264_v35 = vadd.f32 %v3087_v1, %v263_v34  ;;  %v3380_v36 = vpop.f32.mrb[10].mxu0  ;;  %3393 = vmatprep.mubr.msk.bf16.mxu1 %vm172_vm0, %v312_v31 }
 0x12a   :  { %v275_v37 = vadd.f32 %v3380_v36, %v3087_v1  ;;  %v266_v38 = vpop.f32.mrb[11].mxu0  ;;  %3394 = vmatmul.mubr.msk.bf16.gmra.mrb[4].mxu1 %vm172_vm0, %v313_v29  ;;  %v304_v39 = vmax.f32 %v272_v33, 0.0 }
 0x12b   :  { %v267_v30 = vadd.f32 %v3087_v1, %v266_v38  ;;  %v302_v41 = vmax.f32 %v264_v35, 0.0 }
 0x12c   :  { %v305_v40 = vmax.f32 %v275_v37, 0.0 }
 0x12d   :  { %v303_v42 = vmax.f32 %v267_v30, 0.0 }
 0x12e   :  { %v315_v43 = vpack.c.bf16 %v305_v40, %v304_v39 }
 0x12f   :  { %v314_v44 = vpack.c.bf16 %v303_v42, %v302_v41  ;;  %v3383_v45 = vpop.f32.mrb[12].mxu0 }
 0x130   :  { %v288_v46 = vadd.f32 %v3383_v45, %v3087_v1  ;;  %v279_v47 = vpop.f32.mrb[13].mxu0 }
 0x131   :  { %v280_v48 = vadd.f32 %v3087_v1, %v279_v47  ;;  %v3384_v49 = vpop.f32.mrb[14].mxu0  ;;  %3397 = vmatprep.mubr.msk.bf16.mxu1 %vm172_vm0, %v314_v44 }
 0x132   :  { %v308_v50 = vmax.f32 %v288_v46, 0.0  ;;  %v291_v51 = vadd.f32 %v3384_v49, %v3087_v1  ;;  %v282_v52 = vpop.f32.mrb[15].mxu0  ;;  %3398 = vmatmul.mubr.msk.bf16.gmra.mrb[8].mxu1 %vm172_vm0, %v315_v43 }
 0x133   :  { %v306_v53 = vmax.f32 %v280_v48, 0.0  ;;  %v283_v54 = vadd.f32 %v3087_v1, %v282_v52 }
 0x134   :  { %v309_v55 = vmax.f32 %v291_v51, 0.0 }
 0x135   :  { %v307_v56 = vmax.f32 %v283_v54, 0.0 }
 0x136   :  { %v317_v58 = vpack.c.bf16 %v309_v55, %v308_v50 }
 0x137   :  { %v316_v59 = vpack.c.bf16 %v307_v56, %v306_v53  ;;  %v3411_v60 = vpop.f32.mrb[16].mxu0 }
 0x138   :  { %v1329_v61 = vadd.f32 %v3411_v60, %v4358_v57  ;;  %v1320_v62 = vpop.f32.mrb[17].mxu0 }
 0x139   :  { %v1321_v63 = vadd.f32 %v4358_v57, %v1320_v62  ;;  %3401 = vmatprep.mubr.msk.bf16.mxu1 %vm172_vm0, %v316_v59  ;;  %v3412_v0 = vpop.f32.mrb[18].mxu0 }
 0x13a   :  { %v1449_v2 = vmax.f32 %v1329_v61, 0.0  ;;  %v1332_v3 = vadd.f32 %v3412_v0, %v4358_v57  ;;  %3402 = vmatmul.mubr.msk.bf16.gmra.mrb[12].mxu1 %vm172_vm0, %v317_v58  ;;  %v1323_v1 = vpop.f32.mrb[19].mxu0 }
 0x13b   :  { %v1447_v4 = vmax.f32 %v1321_v63, 0.0  ;;  %v1324_v5 = vadd.f32 %v4358_v57, %v1323_v1 }
 0x13c   :  { %v1450_v6 = vmax.f32 %v1332_v3, 0.0 }
 0x13d   :  { %v1448_v7 = vmax.f32 %v1324_v5, 0.0 }
 0x13e   :  { %v1480_v8 = vpack.c.bf16 %v1450_v6, %v1449_v2 }
 0x13f   :  { %v1479_v9 = vpack.c.bf16 %v1448_v7, %v1447_v4  ;;  %v3415_v10 = vpop.f32.mrb[20].mxu0 }
 0x140   :  { %v1345_v11 = vadd.f32 %v3415_v10, %v4358_v57  ;;  %v1336_v12 = vpop.f32.mrb[21].mxu0 }
 0x141   :  { %v1337_v13 = vadd.f32 %v4358_v57, %v1336_v12  ;;  %v3416_v14 = vpop.f32.mrb[22].mxu0  ;;  %3445 = vmatprep.mubr.msk.bf16.mxu1 %vm172_vm0, %v1479_v9 }
 0x142   :  { %v1453_v15 = vmax.f32 %v1345_v11, 0.0  ;;  %v1348_v16 = vadd.f32 %v3416_v14, %v4358_v57  ;;  %v1339_v17 = vpop.f32.mrb[23].mxu0  ;;  %3446 = vmatmul.mubr.msk.bf16.vlgmr.msra.gmra.mrb[16].mxu1 %vm172_vm0, %v1480_v8 }
 0x143   :  { %v1451_v18 = vmax.f32 %v1337_v13, 0.0  ;;  %v1340_v19 = vadd.f32 %v4358_v57, %v1339_v17 }
 0x144   :  { %v1454_v20 = vmax.f32 %v1348_v16, 0.0 }
 0x145   :  { %v1452_v21 = vmax.f32 %v1340_v19, 0.0 }
 0x146   :  { %v1482_v22 = vpack.c.bf16 %v1454_v20, %v1453_v15 }
 0x147   :  { %v1481_v23 = vpack.c.bf16 %v1452_v21, %v1451_v18  ;;  %v3419_v24 = vpop.f32.mrb[24].mxu0 }
 0x148   :  { %v1361_v25 = vadd.f32 %v3419_v24, %v4358_v57  ;;  %v1352_v26 = vpop.f32.mrb[25].mxu0 }
 0x149   :  { %v1353_v27 = vadd.f32 %v4358_v57, %v1352_v26  ;;  %v3420_v28 = vpop.f32.mrb[26].mxu0  ;;  %3449 = vmatprep.mubr.msk.bf16.mxu1 %vm172_vm0, %v1481_v23 }
 0x14a   :  { %v1457_v29 = vmax.f32 %v1361_v25, 0.0  ;;  %v1364_v31 = vadd.f32 %v3420_v28, %v4358_v57  ;;  %v1355_v32 = vpop.f32.mrb[27].mxu0  ;;  %3450 = vmatmul.mubr.msk.bf16.gmra.mrb[20].mxu1 %vm172_vm0, %v1482_v22 }
 0x14b   :  { %v1455_v33 = vmax.f32 %v1353_v27, 0.0  ;;  %v1356_v34 = vadd.f32 %v4358_v57, %v1355_v32 }
 0x14c   :  { %v1458_v35 = vmax.f32 %v1364_v31, 0.0 }
 0x14d   :  { %v1456_v36 = vmax.f32 %v1356_v34, 0.0 }
 0x14e   :  { %v1484_v37 = vpack.c.bf16 %v1458_v35, %v1457_v29 }
 0x14f   :  { %v1483_v38 = vpack.c.bf16 %v1456_v36, %v1455_v33  ;;  %v3423_v30 = vpop.f32.mrb[28].mxu0 }
 0x150   :  { %v1377_v39 = vadd.f32 %v3423_v30, %v4358_v57  ;;  %v1368_v40 = vpop.f32.mrb[29].mxu0 }
 0x151   :  { %v1369_v41 = vadd.f32 %v4358_v57, %v1368_v40  ;;  %v3424_v42 = vpop.f32.mrb[30].mxu0  ;;  %3453 = vmatprep.mubr.msk.bf16.mxu1 %vm172_vm0, %v1483_v38 }
 0x152   :  { %v1461_v43 = vmax.f32 %v1377_v39, 0.0  ;;  %v1380_v44 = vadd.f32 %v3424_v42, %v4358_v57  ;;  %v1371_v45 = vpop.f32.mrb[31].mxu0  ;;  %3454 = vmatmul.mubr.msk.bf16.gmra.mrb[24].mxu1 %vm172_vm0, %v1484_v37 }
 0x153   :  { %v1459_v46 = vmax.f32 %v1369_v41, 0.0  ;;  %v1372_v47 = vadd.f32 %v4358_v57, %v1371_v45  ;;  %v4410_v45 = vpop.permute.xlu0 %3512 }
 0x154   :  { %v1462_v48 = vmax.f32 %v1380_v44, 0.0 }
 0x155   :  { %v1460_v49 = vmax.f32 %v1372_v47, 0.0 }
 0x156   :  { %v1486_v50 = vpack.c.bf16 %v1462_v48, %v1461_v43 }
 0x157   :  { %v1485_v51 = vpack.c.bf16 %v1460_v49, %v1459_v46  ;;  %v3427_v52 = vpop.f32.mrb[32].mxu0  ;;  %v4412_v46 = vpop.permute.xlu1 %3523 }
 0x158   :  { %v1393_v53 = vadd.f32 %v3427_v52, %v4358_v57  ;;  %v1384_v54 = vpop.f32.mrb[33].mxu0  ;;  %v4414_v47 = vpop.permute.xlu0 %3517 }
 0x159   :  { %v1385_v55 = vadd.f32 %v4358_v57, %v1384_v54  ;;  %v3428_v56 = vpop.f32.mrb[34].mxu0  ;;  %3457 = vmatprep.mubr.msk.bf16.mxu1 %vm172_vm0, %v1485_v51 }
 0x15a   :  { %v1465_v58 = vmax.f32 %v1393_v53, 0.0  ;;  %v1396_v59 = vadd.f32 %v3428_v56, %v4358_v57  ;;  %v1387_v60 = vpop.f32.mrb[35].mxu0  ;;  %3458 = vmatmul.mubr.msk.bf16.gmra.mrb[28].mxu1 %vm172_vm0, %v1486_v50 }
 0x15b   :  { %v1463_v61 = vmax.f32 %v1385_v55, 0.0  ;;  %v1388_v62 = vadd.f32 %v4358_v57, %v1387_v60  ;;  %v4416_v48 = vpop.permute.xlu1 %3528 }
 0x15c   :  { %v1466_v63 = vmax.f32 %v1396_v59, 0.0  ;;  %v4418_v49 = vpop.permute.xlu0 %3533 }
 0x15d   :  { %v1464_v0 = vmax.f32 %v1388_v62, 0.0 }
 0x15e   :  { %v1488_v2 = vpack.c.bf16 %v1466_v63, %v1465_v58 }
 0x15f   :  { %v1487_v3 = vpack.c.bf16 %v1464_v0, %v1463_v61  ;;  %v3431_v1 = vpop.f32.mrb[36].mxu0  ;;  %v4420_v50 = vpop.permute.xlu1 %3538 }
 0x160   :  { %v1409_v4 = vadd.f32 %v3431_v1, %v4358_v57  ;;  %v1400_v5 = vpop.f32.mrb[37].mxu0 }
 0x161   :  { %v1401_v6 = vadd.f32 %v4358_v57, %v1400_v5  ;;  %v3432_v7 = vpop.f32.mrb[38].mxu0  ;;  %3461 = vmatprep.mubr.msk.bf16.mxu1 %vm172_vm0, %v1487_v3 }
 0x162   :  { %v1469_v8 = vmax.f32 %v1409_v4, 0.0  ;;  %v1412_v9 = vadd.f32 %v3432_v7, %v4358_v57  ;;  %v1403_v10 = vpop.f32.mrb[39].mxu0  ;;  %3462 = vmatmul.mubr.msk.bf16.gmra.mrb[32].mxu1 %vm172_vm0, %v1488_v2  ;;  %v4448_v2 = vld [vmem:[#allocation5] ss:$0 sm:$0xff] }
 0x163   :  { %v1467_v11 = vmax.f32 %v1401_v6, 0.0  ;;  %v1404_v12 = vadd.f32 %v4358_v57, %v1403_v10  ;;  %v4424_v51 = vpop.permute.xlu1 %3548 }
 0x164   :  { %v1470_v13 = vmax.f32 %v1412_v9, 0.0 }
 0x165   :  { %v1468_v14 = vmax.f32 %v1404_v12, 0.0 }
 0x166   :  { %v1490_v15 = vpack.c.bf16 %v1470_v13, %v1469_v8 }
 0x167   :  { %v1489_v16 = vpack.c.bf16 %v1468_v14, %v1467_v11  ;;  %v3435_v17 = vpop.f32.mrb[40].mxu0  ;;  %v4428_v53 = vpop.permute.xlu1 %3558 }
 0x168   :  { %v1425_v18 = vadd.f32 %v3435_v17, %v4358_v57  ;;  %v1416_v19 = vpop.f32.mrb[41].mxu0  ;;  %5658 = vst [vmem:[#allocation12_spill] sm:$0xff] %v4428_v53 }
 0x169   :  { %v1417_v20 = vadd.f32 %v4358_v57, %v1416_v19  ;;  %v3436_v21 = vpop.f32.mrb[42].mxu0  ;;  %3465 = vmatprep.mubr.msk.bf16.mxu1 %vm172_vm0, %v1489_v16 }
 0x16a   :  { %v1473_v22 = vmax.f32 %v1425_v18, 0.0  ;;  %v1428_v23 = vadd.f32 %v3436_v21, %v4358_v57  ;;  %v1419_v24 = vpop.f32.mrb[43].mxu0  ;;  %3466 = vmatmul.mubr.msk.bf16.gmra.mrb[36].mxu1 %vm172_vm0, %v1490_v15 }
 0x16b   :  { %v1471_v25 = vmax.f32 %v1417_v20, 0.0  ;;  %v1420_v26 = vadd.f32 %v4358_v57, %v1419_v24  ;;  %v4432_v55 = vpop.permute.xlu1 %3568 }
 0x16c   :  { %v1474_v27 = vmax.f32 %v1428_v23, 0.0  ;;  %5659 = vst [vmem:[#allocation13_spill] sm:$0xff] %v4432_v55 }
 0x16d   :  { %v1472_v28 = vmax.f32 %v1420_v26, 0.0 }
 0x16e   :  { %v1492_v29 = vpack.c.bf16 %v1474_v27, %v1473_v22 }
 0x16f   :  { %v1491_v31 = vpack.c.bf16 %v1472_v28, %v1471_v25  ;;  %v3439_v32 = vpop.f32.mrb[44].mxu0  ;;  %v4436_v58 = vpop.permute.xlu1 %3578 }
 0x170   :  { %v1441_v33 = vadd.f32 %v3439_v32, %v4358_v57  ;;  %v1432_v34 = vpop.f32.mrb[45].mxu0  ;;  %5660 = vst [vmem:[#allocation14_spill] sm:$0xff] %v4436_v58 }
 0x171   :  { %v1433_v35 = vadd.f32 %v4358_v57, %v1432_v34  ;;  %v3440_v36 = vpop.f32.mrb[46].mxu0  ;;  %3469 = vmatprep.mubr.msk.bf16.mxu1 %vm172_vm0, %v1491_v31 }
 0x172   :  { %v1477_v37 = vmax.f32 %v1441_v33, 0.0  ;;  %v1444_v38 = vadd.f32 %v3440_v36, %v4358_v57  ;;  %v1435_v30 = vpop.f32.mrb[47].mxu0  ;;  %3470 = vmatmul.mubr.msk.bf16.gmra.mrb[40].mxu1 %vm172_vm0, %v1492_v29 }
 0x173   :  { %v1475_v39 = vmax.f32 %v1433_v35, 0.0  ;;  %v1436_v40 = vadd.f32 %v4358_v57, %v1435_v30  ;;  %v4422_v57 = vpop.permute.xlu0 %3543  ;;  %v4438_v60 = vpop.permute.xlu1 %3588 }
 0x174   :  { %v1478_v41 = vmax.f32 %v1444_v38, 0.0 }
 0x175   :  { %v1476_v42 = vmax.f32 %v1436_v40, 0.0 }
 0x176   :  { %v1494_v43 = vpack.c.bf16 %v1478_v41, %v1477_v37 }
 0x177   :  { %v1493_v44 = vpack.c.bf16 %v1476_v42, %v1475_v39  ;;  %v4426_v52 = vpop.permute.xlu0 %3553  ;;  %v4442_v62 = vpop.permute.xlu1 %3598 }
 0x178   :  { %5661 = vst [vmem:[#allocation15_spill] sm:$0xff] %v4442_v62 }
 0x179   :  { %3473 = vmatprep.mubr.msk.bf16.mxu1 %vm172_vm0, %v1493_v44 }
 0x17a   :  { %3474 = vmatmul.mubr.msk.bf16.gmra.mrb[44].mxu1 %vm172_vm0, %v1494_v43 }
 0x17b   :  { %v4430_v54 = vpop.permute.xlu0 %3563  ;;  %v4446_v0 = vpop.permute.xlu1 %3608 }
 0x17f   :  { %v4434_v56 = vpop.permute.xlu0 %3573  ;;  %v4452_v4 = vpop.permute.xlu1 %3618 }
 0x183   :  { %v3584_v59 = vpop.permute.xlu0 %3583  ;;  %v4474_v20 = vpop.permute.xlu1 %3628 }
 0x187   :  { %v4440_v61 = vpop.permute.xlu0 %3593 }
 0x18b   :  { %v4444_v63 = vpop.permute.xlu0 %3603 }
 0x18f   :  { %v4450_v3 = vpop.permute.xlu0 %3613 }
 0x193   :  { %v4468_v16 = vpop.permute.xlu0 %3623 }
 0x1f5   :  { %v3391_v1 = vpop.f32.mrb[0].mxu1 }
 0x1f6   :  { %v408_v5 = vadd.f32 %v3391_v1, %v4448_v2  ;;  %v399_v6 = vpop.f32.mrb[1].mxu1 }
 0x1f7   :  { %v400_v7 = vadd.f32 %v4448_v2, %v399_v6  ;;  %v3392_v8 = vpop.f32.mrb[2].mxu1 }
 0x1f8   :  { %v4457_v9 = vadd.low.f32.bf16 %v408_v5, %v4444_v63  ;;  %v411_v10 = vadd.f32 %v3392_v8, %v4448_v2  ;;  %v402_v11 = vpop.f32.mrb[3].mxu1 }
 0x1f9   :  { %v4460_v12 = vadd.low.f32.bf16 %v400_v7, %v3584_v59  ;;  %v403_v13 = vadd.f32 %v4448_v2, %v402_v11 }
 0x1fa   :  { %v605_v14 = vsel %vm590_vm1, %v4457_v9, -inf  ;;  %v4466_v15 = vadd.low.f32.bf16 %v411_v10, %v4446_v0 }
 0x1fb   :  { %v606_v17 = vrot.slane %v605_v14, 4  ;;  %v591_v18 = vsel %vm590_vm1, %v4460_v12, -inf  ;;  %v4472_v19 = vadd.high.f32.bf16 %v403_v13, %v3584_v59 }
 0x1fc   :  { %v592_v21 = vrot.slane %v591_v18, 4  ;;  %v612_v22 = vsel %vm590_vm1, %v4466_v15, -inf }
 0x1fd   :  { %v607_v23 = vmax.f32 %v605_v14, %v606_v17  ;;  %v613_v24 = vrot.slane %v612_v22, 4  ;;  %v598_v25 = vsel %vm590_vm1, %v4472_v19, -inf  ;;  %v3395_v26 = vpop.f32.mrb[4].mxu1 }
 0x1fe   :  { %v593_v27 = vmax.f32 %v591_v18, %v592_v21  ;;  %v599_v28 = vrot.slane %v598_v25, 4  ;;  %v424_v29 = vadd.f32 %v3395_v26, %v4448_v2  ;;  %v415_v31 = vpop.f32.mrb[5].mxu1 }
 0x1ff   :  { %v608_v32 = vrot.slane %v607_v23, 2  ;;  %v614_v33 = vmax.f32 %v612_v22, %v613_v24  ;;  %v416_v34 = vadd.f32 %v4448_v2, %v415_v31  ;;  %v3396_v35 = vpop.f32.mrb[6].mxu1 }
 0x200   :  { %v594_v36 = vrot.slane %v593_v27, 2  ;;  %v600_v37 = vmax.f32 %v598_v25, %v599_v28  ;;  %v4483_v38 = vadd.low.f32.bf16 %v424_v29, %v4468_v16  ;;  %v427_v30 = vadd.f32 %v3396_v35, %v4448_v2  ;;  %v418_v39 = vpop.f32.mrb[7].mxu1 }
 0x201   :  { %v609_v40 = vmax.f32 %v607_v23, %v608_v32  ;;  %v615_v41 = vrot.slane %v614_v33, 2  ;;  %v4487_v42 = vadd.low.f32.bf16 %v416_v34, %v4450_v3  ;;  %v419_v43 = vadd.f32 %v4448_v2, %v418_v39 }
 0x202   :  { %v595_v44 = vmax.f32 %v593_v27, %v594_v36  ;;  %v601_v59 = vrot.slane %v600_v37, 2  ;;  %v633_v1 = vsel %vm590_vm1, %v4483_v38, -inf  ;;  %v4493_v5 = vadd.low.f32.bf16 %v427_v30, %v4474_v20 }
 0x203   :  { %v610_v6 = vrot.slane %v609_v40, 1  ;;  %v616_v7 = vmax.f32 %v614_v33, %v615_v41  ;;  %v634_v8 = vrot.slane %v633_v1, 4  ;;  %v619_v10 = vsel %vm590_vm1, %v4487_v42, -inf }
 0x204   :  { %v596_v11 = vrot.slane %v595_v44, 1  ;;  %v602_v13 = vmax.f32 %v600_v37, %v601_v59  ;;  %v620_v14 = vrot.slane %v619_v10, 4  ;;  %v640_v17 = vsel %vm590_vm1, %v4493_v5, -inf }
 0x205   :  { %v611_v18 = vmax.f32 %v609_v40, %v610_v6  ;;  %v617_v21 = vrot.slane %v616_v7, 1  ;;  %v635_v22 = vmax.f32 %v633_v1, %v634_v8  ;;  %v641_v23 = vrot.slane %v640_v17, 4  ;;  %v3399_v24 = vpop.f32.mrb[8].mxu1 }
 0x206   :  { %v597_v25 = vmax.f32 %v595_v44, %v596_v11  ;;  %v603_v26 = vrot.slane %v602_v13, 1  ;;  %v621_v27 = vmax.f32 %v619_v10, %v620_v14  ;;  %v4500_v28 = vadd.low.f32.bf16 %v419_v43, %v4452_v4  ;;  %v431_v29 = vpop.f32.mrb[9].mxu1 }
 0x207   :  { %v705_v31 = vsub.f32 %v4457_v9, %v611_v18  ;;  %v618_v32 = vmax.f32 %v616_v7, %v617_v21  ;;  %v636_v33 = vrot.slane %v635_v22, 2  ;;  %v642_v34 = vmax.f32 %v640_v17, %v641_v23  ;;  %v3400_v35 = vpop.f32.mrb[10].mxu1 }
 0x208   :  { %v703_v36 = vsub.f32 %v4460_v12, %v597_v25  ;;  %v604_v37 = vmax.f32 %v602_v13, %v603_v26  ;;  %v622_v30 = vrot.slane %v621_v27, 2  ;;  %v626_v39 = vsel %vm590_vm1, %v4500_v28, -inf  ;;  %v434_v40 = vpop.f32.mrb[11].mxu1 }
 0x209   :  { %v723_v41 = vmul.f32 1.442695, %v705_v31  ;;  %v706_v44 = vsub.f32 %v4466_v15, %v618_v32  ;;  %v637_v43 = vmax.f32 %v635_v22, %v636_v33  ;;  %v643_v59 = vrot.slane %v642_v34, 2 }
 0x20a   :  { %v719_v1 = vmul.f32 1.442695, %v703_v36  ;;  %v704_v9 = vsub.f32 %v4472_v19, %v604_v37  ;;  %v623_v6 = vmax.f32 %v621_v27, %v622_v30  ;;  %v627_v7 = vrot.slane %v626_v39, 4 }
 0x20b   :  { %3694 = vpow2.f32 %v723_v41  ;;  %v725_v8 = vmul.f32 1.442695, %v706_v44  ;;  %v638_v10 = vrot.slane %v637_v43, 1  ;;  %v644_v12 = vmax.f32 %v642_v34, %v643_v59 }
 0x20c   :  { %3696 = vpow2.f32 %v719_v1  ;;  %v721_v11 = vmul.f32 1.442695, %v704_v9  ;;  %v624_v13 = vrot.slane %v623_v6, 1  ;;  %v628_v14 = vmax.f32 %v626_v39, %v627_v7 }
 0x20d   :  { %3698 = vpow2.f32 %v725_v8  ;;  %v639_v17 = vmax.f32 %v637_v43, %v638_v10  ;;  %v645_v18 = vrot.slane %v644_v12, 1  ;;  %v440_v15 = vadd.f32 %v3399_v24, %v4448_v2  ;;  %v3403_v21 = vpop.f32.mrb[12].mxu1 }
 0x20e   :  { %v625_v22 = vmax.f32 %v623_v6, %v624_v13  ;;  %v629_v23 = vrot.slane %v628_v14, 2  ;;  %v432_v19 = vadd.f32 %v4448_v2, %v431_v29  ;;  %v447_v25 = vpop.f32.mrb[13].mxu1  ;;  %3700 = vpow2.f32 %v721_v11 }
 0x20f   :  { %v709_v26 = vsub.f32 %v4483_v38, %v639_v17  ;;  %v4512_v27 = vadd.high.f32.bf16 %v440_v15, %v4444_v63  ;;  %v443_v31 = vadd.f32 %v3400_v35, %v4448_v2  ;;  %v3404_v32 = vpop.f32.mrb[14].mxu1  ;;  %v646_v34 = vmax.f32 %v644_v12, %v645_v18 }
 0x210   :  { %v707_v33 = vsub.f32 %v4487_v42, %v625_v22  ;;  %v630_v36 = vmax.f32 %v628_v14, %v629_v23  ;;  %v4517_v24 = vadd.low.f32.bf16 %v432_v19, %v4438_v60  ;;  %v4519_v37 = vpop.f32.mrb[15].mxu1  ;;  %v435_v63 = vadd.f32 %v4448_v2, %v434_v40 }
 0x211   :  { %v731_v29 = vmul.f32 1.442695, %v709_v26  ;;  %v661_v30 = vsel %vm590_vm1, %v4512_v27, -inf  ;;  %v4524_v38 = vadd.high.f32.bf16 %v443_v31, %v4446_v0  ;;  %v710_v0 = vsub.f32 %v4493_v5, %v646_v34 }
 0x212   :  { %v727_v35 = vmul.f32 1.442695, %v707_v33  ;;  %v631_v39 = vrot.slane %v630_v36, 1  ;;  %v662_v41 = vrot.slane %v661_v30, 4  ;;  %v647_v42 = vsel %vm590_vm1, %v4517_v24, -inf }
 0x213   :  { %v648_v44 = vrot.slane %v647_v42, 4  ;;  %v668_v43 = vsel %vm590_vm1, %v4524_v38, -inf  ;;  %3702 = vpow2.f32 %v731_v29  ;;  %v4535_v40 = vadd.high.f32.bf16 %v435_v63, %v4438_v60 }
 0x214   :  { %v632_v59 = vmax.f32 %v630_v36, %v631_v39  ;;  %v663_v1 = vmax.f32 %v661_v30, %v662_v41  ;;  %v669_v9 = vrot.slane %v668_v43, 4  ;;  %3704 = vpow2.f32 %v727_v35 }
 0x215   :  { %v4531_v6 = vpop.eup %3694  ;;  %v649_v7 = vmax.f32 %v647_v42, %v648_v44  ;;  %v4537_v8 = vpop.f32.mrb[16].mxu1  ;;  %v456_v13 = vadd.f32 %v3403_v21, %v4448_v2  ;;  %v654_v21 = vsel %vm590_vm1, %v4535_v40, -inf  ;;  %v733_v29 = vmul.f32 1.442695, %v710_v0 }
 0x216   :  { %v4539_v10 = vpop.eup %3696  ;;  %v708_v12 = vsub.f32 %v4500_v28, %v632_v59  ;;  %v664_v11 = vrot.slane %v663_v1, 2  ;;  %v4543_v14 = vpop.f32.mrb[17].mxu1  ;;  %v765_v5 = vsel %vm590_vm1, %v4531_v6, 0.0  ;;  %v670_v15 = vmax.f32 %v668_v43, %v669_v9 }
 0x217   :  { %v4545_v17 = vpop.eup %3698  ;;  %v751_v60 = vsel %vm590_vm1, %v4539_v10, 0.0  ;;  %v650_v18 = vrot.slane %v649_v7, 2  ;;  %v4551_v22 = vpop.f32.mrb[18].mxu1  ;;  %v766_v34 = vrot.slane %v765_v5, 4  ;;  %v655_v41 = vrot.slane %v654_v21, 4 }
 0x218   :  { %5662 = vst [vmem:[#allocation16_spill] sm:$0xff] %v4545_v17  ;;  %v772_v28 = vsel %vm590_vm1, %v4545_v17, 0.0  ;;  %v729_v23 = vmul.f32 1.442695, %v708_v12  ;;  %v665_v19 = vmax.f32 %v663_v1, %v664_v11  ;;  %v4557_v26 = vpop.f32.mrb[19].mxu1  ;;  %v4559_v31 = vpop.eup %3700  ;;  %v752_v36 = vrot.slane %v751_v60, 4 }
 0x219   :  { %v651_v33 = vmax.f32 %v649_v7, %v650_v18  ;;  %v773_v63 = vrot.slane %v772_v28, 4  ;;  %v671_v39 = vrot.slane %v670_v15, 2  ;;  %v4562_v44 = vadd.high.f32.bf16 %v456_v13, %v4468_v16 }
 0x21a   :  { %v666_v30 = vrot.slane %v665_v19, 1  ;;  %3706 = vpow2.f32 %v729_v23  ;;  %v448_v43 = vadd.f32 %v4448_v2, %v447_v25  ;;  %v656_v9 = vmax.f32 %v654_v21, %v655_v41 }
 0x21b   :  { %v652_v35 = vrot.slane %v651_v33, 1  ;;  %v672_v1 = vmax.f32 %v670_v15, %v671_v39  ;;  %v459_v7 = vadd.f32 %v3404_v32, %v4448_v2  ;;  %v758_v0 = vsel %vm590_vm1, %v4559_v31, 0.0 }
 0x21c   :  { %v667_v42 = vmax.f32 %v665_v19, %v666_v30  ;;  %3708 = vpow2.f32 %v733_v29  ;;  %v689_v13 = vsel %vm590_vm1, %v4562_v44, -inf  ;;  %v4579_v32 = vadd.high.f32.bf16 %v448_v43, %v4450_v3 }
 0x21d   :  { %v653_v59 = vmax.f32 %v651_v33, %v652_v35  ;;  %v4566_v12 = vpop.f32.mrb[20].mxu1  ;;  %v4573_v23 = vpop.eup %3702  ;;  %v673_v25 = vrot.slane %v672_v1, 1  ;;  %v4585_v21 = vadd.f32 %v766_v34, %v765_v5  ;;  %v657_v29 = vrot.slane %v656_v9, 2  ;;  %v4598_v5 = vld [vmem:[%s5620_s11] ss:$0 sm:$0xff] }
 0x21e   :  { %v713_v11 = vsub.f32 %v4512_v27, %v667_v42  ;;  %v4571_v18 = vpop.f32.mrb[21].mxu1  ;;  %5663 = vst [vmem:[#allocation17_spill] sm:$0xff] %v4573_v23  ;;  %v4583_v19 = vpop.eup %3704  ;;  %v4587_v27 = vadd.f32 %v752_v36, %v751_v60  ;;  %v759_v35 = vrot.slane %v758_v0, 4  ;;  %v793_v3 = vsel %vm590_vm1, %v4573_v23, 0.0 }
 0x21f   :  { %v711_v16 = vsub.f32 %v4517_v24, %v653_v59  ;;  %v4581_v15 = vpop.f32.mrb[22].mxu1  ;;  %5664 = vst [vmem:[#allocation18_spill] sm:$0xff] %v4583_v19  ;;  %v4591_v24 = vadd.f32 %v773_v63, %v772_v28  ;;  %v674_v41 = vmax.f32 %v672_v1, %v673_v25  ;;  %v658_v42 = vmax.f32 %v656_v9, %v657_v29 }
 0x220   :  { %v739_v33 = vmul.f32 1.442695, %v713_v11  ;;  %v4589_v30 = vpop.f32.mrb[23].mxu1  ;;  %v690_v43 = vrot.slane %v689_v13, 4  ;;  %v779_v60 = vsel %vm590_vm1, %v4583_v19, 0.0  ;;  %v675_v34 = vsel %vm590_vm1, %v4579_v32, -inf }
 0x221   :  { %v735_v39 = vmul.f32 1.442695, %v711_v16  ;;  %v714_v28 = vsub.f32 %v4524_v38, %v674_v41  ;;  %v659_v36 = vrot.slane %v658_v42, 1  ;;  %v676_v59 = vrot.slane %v675_v34, 4 }
 0x222   :  { %3710 = vpow2.f32 %v739_v33  ;;  %v691_v63 = vmax.f32 %v689_v13, %v690_v43  ;;  %v4606_v1 = vadd.high.f32.bf16 %v459_v7, %v4474_v20  ;;  %v4608_v9 = vadd.f32 %v759_v35, %v758_v0 }
 0x223   :  { %3712 = vpow2.f32 %v735_v39  ;;  %v741_v11 = vmul.f32 1.442695, %v714_v28  ;;  %v451_v16 = vadd.f32 %v4448_v2, %v4519_v37  ;;  %v1609_v25 = vadd.f32 %v4537_v8, %v4598_v5 }
 0x224   :  { %v4616_v38 = vpop.eup %3706  ;;  %v794_v29 = vrot.slane %v793_v3, 4  ;;  %v660_v39 = vmax.f32 %v658_v42, %v659_v36  ;;  %v692_v13 = vrot.slane %v691_v63, 2  ;;  %v677_v41 = vmax.f32 %v675_v34, %v676_v59 }
 0x225   :  { %v4614_v33 = vpop.f32.mrb[24].mxu1  ;;  %5665 = vst [vmem:[#allocation19_spill] sm:$0xff] %v4616_v38  ;;  %v780_v20 = vrot.slane %v779_v60, 4  ;;  %v696_v7 = vsel %vm590_vm1, %v4606_v1, -inf  ;;  %v4623_v0 = vadd.high.f32.bf16 %v451_v16, %v4452_v4  ;;  %v4626_v2 = vadd.low.f32.bf16 %v1609_v25, %v4414_v47 }
 0x226   :  { %v4618_v43 = vpop.f32.mrb[25].mxu1  ;;  %v4630_v8 = vpop.eup %3708  ;;  %3714 = vpow2.f32 %v741_v11  ;;  %v712_v35 = vsub.f32 %v4535_v40, %v660_v39  ;;  %v693_v42 = vmax.f32 %v691_v63, %v692_v13  ;;  %v678_v28 = vrot.slane %v677_v41, 2 }
 0x227   :  { %v4628_v37 = vpop.f32.mrb[26].mxu1  ;;  %5666 = vst [vmem:[#allocation20_spill] sm:$0xff] %v4630_v8  ;;  %v786_v36 = vsel %vm590_vm1, %v4616_v38, 0.0  ;;  %v697_v59 = vrot.slane %v696_v7, 4  ;;  %v682_v4 = vsel %vm590_vm1, %v4623_v0, -inf  ;;  %v1601_v16 = vadd.f32 %v4598_v5, %v4543_v14 }
 0x228   :  { %v4633_v34 = vpop.f32.mrb[27].mxu1  ;;  %v737_v25 = vmul.f32 1.442695, %v712_v35  ;;  %v694_v58 = vrot.slane %v693_v42, 1  ;;  %v679_v8 = vmax.f32 %v677_v41, %v678_v28  ;;  %v683_v11 = vrot.slane %v682_v4, 4 }
 0x229   :  { %v4641_v62 = vadd.f32 %v794_v29, %v793_v3  ;;  %v698_v40 = vmax.f32 %v696_v7, %v697_v59  ;;  %v4644_v63 = vadd.low.f32.bf16 %v1601_v16, %v4410_v45  ;;  %v1612_v39 = vadd.f32 %v4551_v22, %v4598_v5 }
 0x22a   :  { %3716 = vpow2.f32 %v737_v25  ;;  %v695_v38 = vmax.f32 %v693_v42, %v694_v58  ;;  %v680_v19 = vrot.slane %v679_v8, 1  ;;  %v684_v53 = vmax.f32 %v682_v4, %v683_v11 }
 0x22b   :  { %v787_v35 = vrot.slane %v786_v36, 4  ;;  %v699_v41 = vrot.slane %v698_v40, 2  ;;  %v4653_v3 = vadd.high.f32.bf16 %v1612_v39, %v4414_v47  ;;  %v1604_v29 = vadd.f32 %v4598_v5, %v4557_v26 }
 0x22c   :  { %v4648_v13 = vpop.eup %3710  ;;  %v4659_v28 = vadd.f32 %v780_v20, %v779_v60  ;;  %v717_v22 = vsub.f32 %v4562_v44, %v695_v38  ;;  %v681_v59 = vmax.f32 %v679_v8, %v680_v19  ;;  %v1992_v58 = vsel %vm590_vm1, %v4626_v2, -inf }
 0x22d   :  { %5667 = vst [vmem:[#allocation21_spill] sm:$0xff] %v4648_v13  ;;  %v4650_v14 = vpop.eup %3712  ;;  %v4657_v7 = vpop.f32.mrb[28].mxu1  ;;  %v821_v4 = vsel %vm590_vm1, %v4648_v13, 0.0  ;;  %v700_v47 = vmax.f32 %v698_v40, %v699_v41  ;;  %v685_v16 = vrot.slane %v684_v53, 2  ;;  %v1993_v26 = vsel %vm590_vm1, %v4653_v3, -inf }
 0x22e   :  { %5668 = vst [vmem:[#allocation22_spill] sm:$0xff] %v4650_v14  ;;  %v4664_v42 = vpop.f32.mrb[29].mxu1  ;;  %v807_v60 = vsel %vm590_vm1, %v4650_v14, 0.0  ;;  %v747_v44 = vmul.f32 1.442695, %v717_v22  ;;  %v715_v19 = vsub.f32 %v4579_v32, %v681_v59  ;;  %v1994_v38 = vmax.f32 %v1992_v58, %v1993_v26 }
 0x22f   :  { %v4670_v25 = vpop.f32.mrb[30].mxu1  ;;  %v4677_v8 = vadd.f32 %v787_v35, %v786_v36  ;;  %v701_v11 = vrot.slane %v700_v47, 1  ;;  %v686_v39 = vmax.f32 %v684_v53, %v685_v16  ;;  %v4680_v40 = vadd.high.f32.bf16 %v1604_v29, %v4410_v45 }
 0x230   :  { %v4675_v20 = vpop.f32.mrb[31].mxu1  ;;  %v4682_v41 = vpop.eup %3714  ;;  %3718 = vpow2.f32 %v747_v44  ;;  %v743_v13 = vmul.f32 1.442695, %v715_v19  ;;  %v1983_v14 = vsel %vm590_vm1, %v4644_v63, -inf  ;;  %v1995_v22 = vrot.slane %v1994_v38, 4 }
 0x231   :  { %5669 = vst [vmem:[#allocation23_spill] sm:$0xff] %v4682_v41  ;;  %v822_v55 = vrot.slane %v821_v4, 4  ;;  %v808_v32 = vrot.slane %v807_v60, 4  ;;  %v687_v59 = vrot.slane %v686_v39, 1  ;;  %v1984_v36 = vsel %vm590_vm1, %v4680_v40, -inf }
 0x232   :  { %3720 = vpow2.f32 %v743_v13  ;;  %v1996_v35 = vmax.f32 %v1994_v38, %v1995_v22  ;;  %v1985_v53 = vmax.f32 %v1983_v14, %v1984_v36  ;;  %v1625_v45 = vadd.f32 %v4566_v12, %v4598_v5 }
 0x233   :  { %v828_v29 = vsel %vm590_vm1, %v4682_v41, 0.0  ;;  %v702_v58 = vmax.f32 %v700_v47, %v701_v11  ;;  %v688_v16 = vmax.f32 %v686_v39, %v687_v59  ;;  %v1617_v26 = vadd.f32 %v4598_v5, %v4571_v18 }
 0x234   :  { %v4696_v19 = vpop.eup %3716  ;;  %v1997_v23 = vrot.slane %v1996_v35, 2  ;;  %v1986_v17 = vrot.slane %v1985_v53, 4  ;;  %v4699_v13 = vadd.low.f32.bf16 %v1625_v45, %v4422_v57  ;;  %v1628_v12 = vadd.f32 %v4581_v15, %v4598_v5 }
 0x235   :  { %v4694_v44 = vpop.f32.mrb[32].mxu1  ;;  %5670 = vst [vmem:[#allocation24_spill] sm:$0xff] %v4696_v19  ;;  %v4705_v38 = vadd.f32 %v822_v55, %v821_v4  ;;  %v814_v47 = vsel %vm590_vm1, %v4696_v19, 0.0  ;;  %v716_v18 = vsub.f32 %v4623_v0, %v688_v16  ;;  %v4711_v11 = vadd.low.f32.bf16 %v1617_v26, %v4418_v49 }
 0x236   :  { %v4703_v14 = vpop.f32.mrb[33].mxu1  ;;  %v4715_v22 = vadd.f32 %v808_v32, %v807_v60  ;;  %v829_v59 = vrot.slane %v828_v29, 4  ;;  %v1998_v36 = vmax.f32 %v1996_v35, %v1997_v23  ;;  %v1987_v45 = vmax.f32 %v1985_v53, %v1986_v17 }
 0x237   :  { %v4713_v39 = vpop.f32.mrb[34].mxu1  ;;  %v815_v41 = vrot.slane %v814_v47, 4  ;;  %v718_v55 = vsub.f32 %v4606_v1, %v702_v58  ;;  %v745_v4 = vmul.f32 1.442695, %v716_v18  ;;  %v4721_v19 = vadd.high.f32.bf16 %v1628_v12, %v4422_v57 }
 0x238   :  { %5671 = vst [vmem:[#allocation25_spill] sm:$0xff] %v4715_v22  ;;  %v4717_v15 = vpop.f32.mrb[35].mxu1  ;;  %v1999_v0 = vrot.slane %v1998_v36, 1  ;;  %v1988_v16 = vrot.slane %v1987_v45, 2  ;;  %v2010_v26 = vsel %vm590_vm1, %v4699_v13, -inf  ;;  %v1620_v60 = vadd.f32 %v4598_v5, %v4589_v30 }
 0x239   :  { %3722 = vpow2.f32 %v745_v4  ;;  %v2011_v17 = vsel %vm590_vm1, %v4721_v19, -inf  ;;  %v1641_v23 = vadd.f32 %v4614_v33, %v4598_v5  ;;  %v1633_v1 = vadd.f32 %v4598_v5, %v4618_v43 }
 0x23a   :  { %v4733_v57 = vpop.eup %3718  ;;  %v2000_v32 = vmax.f32 %v1998_v36, %v1999_v0  ;;  %v1989_v35 = vmax.f32 %v1987_v45, %v1988_v16  ;;  %v2012_v53 = vmax.f32 %v2010_v26, %v2011_v17  ;;  %v4736_v58 = vadd.high.f32.bf16 %v1620_v60, %v4418_v49 }
 0x23b   :  { %5672 = vst [vmem:[#allocation26_spill] sm:$0xff] %v4733_v57  ;;  %v4738_v12 = vadd.f32 %v829_v59, %v828_v29  ;;  %v849_v30 = vsel %vm590_vm1, %v4733_v57, 0.0  ;;  %v4743_v18 = vadd.low.f32.bf16 %v1641_v23, %v4430_v54  ;;  %v4746_v33 = vadd.low.f32.bf16 %v1633_v1, %v4426_v52 }
 0x23c   :  { %v4750_v4 = vpop.eup %3720  ;;  %v2129_v36 = vsub.f32 %v4626_v2, %v2000_v32  ;;  %v2130_v49 = vsub.f32 %v4653_v3, %v2000_v32  ;;  %v1990_v45 = vrot.slane %v1989_v35, 1  ;;  %v1644_v29 = vadd.f32 %v4628_v37, %v4598_v5 }
 0x23d   :  { %v4748_v43 = vpop.f32.mrb[36].mxu1  ;;  %5673 = vst [vmem:[#allocation27_spill] sm:$0xff] %v4750_v4  ;;  %v835_v0 = vsel %vm590_vm1, %v4750_v4, 0.0  ;;  %v4760_v16 = vmul.f32 1.442695, %v718_v55  ;;  %v2013_v26 = vrot.slane %v2012_v53, 4  ;;  %v4766_v2 = vadd.f32 %v815_v41, %v814_v47 }
 0x23e   :  { %v4756_v59 = vpop.f32.mrb[37].mxu1  ;;  %v2002_v60 = vsel %vm590_vm1, %v4736_v58, -inf  ;;  %v2163_v3 = vmul.f32 1.442695, %v2129_v36  ;;  %v2165_v23 = vmul.f32 1.442695, %v2130_v49  ;;  %v1991_v57 = vmax.f32 %v1989_v35, %v1990_v45 }
 0x23f   :  { %5674 = vst [vmem:[#allocation28_spill] sm:$0xff] %v4760_v16  ;;  %v4764_v17 = vpop.f32.mrb[38].mxu1  ;;  %5675 = vst [vmem:[#allocation29_spill] sm:$0xff] %v4766_v2  ;;  %v2001_v37 = vsel %vm590_vm1, %v4711_v11, -inf  ;;  %v850_v32 = vrot.slane %v849_v30, 4  ;;  %v2014_v4 = vmax.f32 %v2012_v53, %v2013_v26  ;;  %v836_v16 = vrot.slane %v835_v0, 4 }
 0x240   :  { %v4770_v1 = vpop.f32.mrb[39].mxu1  ;;  %v2003_v55 = vmax.f32 %v2001_v37, %v2002_v60  ;;  %3724 = vpow2.f32 %v2163_v3  ;;  %v4773_v22 = vadd.high.f32.bf16 %v1644_v29, %v4430_v54  ;;  %v1636_v41 = vadd.f32 %v4598_v5, %v4633_v34 }
 0x241   :  { %3726 = vpow2.f32 %v2165_v23  ;;  %v2127_v47 = vsub.f32 %v4644_v63, %v1991_v57  ;;  %v2128_v36 = vsub.f32 %v4680_v40, %v1991_v57  ;;  %v2015_v49 = vrot.slane %v2014_v4, 2 }
 0x242   :  { %v2004_v2 = vrot.slane %v2003_v55, 4  ;;  %v2028_v35 = vsel %vm590_vm1, %v4743_v18, -inf  ;;  %v2029_v53 = vsel %vm590_vm1, %v4773_v22, -inf  ;;  %v4784_v45 = vadd.high.f32.bf16 %v1636_v41, %v4426_v52 }
 0x243   :  { %v4786_v54 = vpop.eup %3722  ;;  %v4788_v29 = vadd.f32 %v850_v32, %v849_v30  ;;  %v2159_v34 = vmul.f32 1.442695, %v2127_v47  ;;  %v2161_v26 = vmul.f32 1.442695, %v2128_v36  ;;  %v2016_v63 = vmax.f32 %v2014_v4, %v2015_v49 }
 0x244   :  { %5676 = vst [vmem:[#allocation30_spill] sm:$0xff] %v4786_v54  ;;  %v842_v40 = vsel %vm590_vm1, %v4786_v54, 0.0  ;;  %v2005_v57 = vmax.f32 %v2003_v55, %v2004_v2  ;;  %v2030_v3 = vmax.f32 %v2028_v35, %v2029_v53  ;;  %v2020_v23 = vsel %vm590_vm1, %v4784_v45, -inf }
 0x245   :  { %5677 = vst [vmem:[#allocation31_spill] sm:$0xff] %v4788_v29  ;;  %v4790_v60 = vpop.f32.mrb[40].mxu1  ;;  %v4798_v52 = vadd.f32 %v836_v16, %v835_v0  ;;  %3728 = vpow2.f32 %v2159_v34  ;;  %v2017_v30 = vrot.slane %v2016_v63, 1  ;;  %v2019_v32 = vsel %vm590_vm1, %v4746_v33, -inf }
 0x246   :  { %v4796_v37 = vpop.f32.mrb[41].mxu1  ;;  %3730 = vpow2.f32 %v2161_v26  ;;  %v2006_v41 = vrot.slane %v2005_v57, 2  ;;  %v2031_v47 = vrot.slane %v2030_v3, 4  ;;  %v2021_v36 = vmax.f32 %v2019_v32, %v2020_v23 }
 0x247   :  { %5678 = vst [vmem:[#allocation32_spill] sm:$0xff] %v4798_v52  ;;  %v4802_v4 = vpop.f32.mrb[42].mxu1  ;;  %v843_v55 = vrot.slane %v842_v40, 4  ;;  %v2018_v49 = vmax.f32 %v2016_v63, %v2017_v30  ;;  %v1657_v35 = vadd.f32 %v4657_v7, %v4598_v5  ;;  %v1649_v0 = vadd.f32 %v4598_v5, %v4664_v42 }
 0x248   :  { %v4804_v2 = vpop.f32.mrb[43].mxu1  ;;  %v2007_v16 = vmax.f32 %v2005_v57, %v2006_v41  ;;  %v2032_v53 = vmax.f32 %v2030_v3, %v2031_v47  ;;  %v2022_v34 = vrot.slane %v2021_v36, 4  ;;  %v1660_v54 = vadd.f32 %v4670_v25, %v4598_v5 }
 0x249   :  { %v2133_v26 = vsub.f32 %v4699_v13, %v2018_v49  ;;  %v2134_v23 = vsub.f32 %v4721_v19, %v2018_v49  ;;  %v4815_v32 = vadd.low.f32.bf16 %v1657_v35, %v4440_v61  ;;  %v4818_v63 = vadd.low.f32.bf16 %v1649_v0, %v4434_v56 }
 0x24a   :  { %v4820_v7 = vpop.eup %3724  ;;  %v2008_v30 = vrot.slane %v2007_v16, 1  ;;  %v2033_v42 = vrot.slane %v2032_v53, 2  ;;  %v2023_v57 = vmax.f32 %v2021_v36, %v2022_v34  ;;  %v4823_v3 = vadd.high.f32.bf16 %v1660_v54, %v4440_v61 }
 0x24b   :  { %5679 = vst [vmem:[#allocation33_spill] sm:$0xff] %v4820_v7  ;;  %v4825_v41 = vpop.eup %3726  ;;  %v4827_v25 = vadd.f32 %v843_v55, %v842_v40  ;;  %v2232_v19 = vsel %vm590_vm1, %v4820_v7, 0.0  ;;  %v2171_v13 = vmul.f32 1.442695, %v2133_v26  ;;  %v2173_v47 = vmul.f32 1.442695, %v2134_v23 }
 0x24c   :  { %5680 = vst [vmem:[#allocation34_spill] sm:$0xff] %v4825_v41  ;;  %v2233_v49 = vsel %vm590_vm1, %v4825_v41, 0.0  ;;  %v2009_v35 = vmax.f32 %v2007_v16, %v2008_v30  ;;  %v2034_v0 = vmax.f32 %v2032_v53, %v2033_v42  ;;  %v2024_v52 = vrot.slane %v2023_v57, 2 }
 0x24d   :  { %5681 = vst [vmem:[#allocation35_spill] sm:$0xff] %v4827_v25  ;;  %v4833_v29 = vpop.f32.mrb[44].mxu1  ;;  %v4835_v36 = vadd.f32 %v2233_v49, %v2232_v19  ;;  %3732 = vpow2.f32 %v2171_v13  ;;  %v2046_v61 = vsel %vm590_vm1, %v4815_v32, -inf  ;;  %v2047_v54 = vsel %vm590_vm1, %v4823_v3, -inf }
 0x24e   :  { %v4841_v40 = vpop.f32.mrb[45].mxu1  ;;  %3734 = vpow2.f32 %v2173_v47  ;;  %v2131_v55 = vsub.f32 %v4711_v11, %v2009_v35  ;;  %v2132_v16 = vsub.f32 %v4736_v58, %v2009_v35  ;;  %v2035_v53 = vrot.slane %v2034_v0, 1 }
 0x24f   :  { %v4845_v34 = vpop.f32.mrb[46].mxu1  ;;  %v4847_v26 = vpop.eup %3728  ;;  %v2025_v23 = vmax.f32 %v2023_v57, %v2024_v52  ;;  %v2037_v30 = vsel %vm590_vm1, %v4818_v63, -inf  ;;  %v2048_v42 = vmax.f32 %v2046_v61, %v2047_v54  ;;  %v1652_v19 = vadd.f32 %v4598_v5, %v4675_v20 }
 0x250   :  { %5682 = vst [vmem:[#allocation36_spill] sm:$0xff] %v4847_v26  ;;  %v4853_v13 = vpop.f32.mrb[47].mxu1  ;;  %v4855_v47 = vpop.eup %3730  ;;  %v2223_v11 = vsel %vm590_vm1, %v4847_v26, 0.0  ;;  %v2167_v58 = vmul.f32 1.442695, %v2131_v55  ;;  %v2036_v35 = vmax.f32 %v2034_v0, %v2035_v53 }
 0x251   :  { %5683 = vst [vmem:[#allocation37_spill] sm:$0xff] %v4855_v47  ;;  %v2169_v49 = vmul.f32 1.442695, %v2132_v16  ;;  %v2224_v52 = vsel %vm590_vm1, %v4855_v47, 0.0  ;;  %v2026_v57 = vrot.slane %v2025_v23, 1  ;;  %v2049_v41 = vrot.slane %v2048_v42, 4 }
 0x252   :  { %v4862_v61 = vadd.high.f32.bf16 %v1652_v19, %v4434_v56  ;;  %v4864_v54 = vadd.f32 %v2224_v52, %v2223_v11  ;;  %3736 = vpow2.f32 %v2167_v58  ;;  %v2137_v20 = vsub.f32 %v4743_v18, %v2036_v35 }
 0x253   :  { %v2138_v7 = vsub.f32 %v4773_v22, %v2036_v35  ;;  %3738 = vpow2.f32 %v2169_v49  ;;  %v2027_v26 = vmax.f32 %v2025_v23, %v2026_v57  ;;  %v2050_v55 = vmax.f32 %v2048_v42, %v2049_v41 }
 0x254   :  { %v2038_v0 = vsel %vm590_vm1, %v4862_v61, -inf  ;;  %v2235_v16 = vrot.slane %v4835_v36, 4  ;;  %v2179_v53 = vmul.f32 1.442695, %v2137_v20  ;;  %v768_v18 = vrot.slane %v4585_v21, 2 }
 0x255   :  { %v2181_v47 = vmul.f32 1.442695, %v2138_v7  ;;  %v2039_v25 = vmax.f32 %v2037_v30, %v2038_v0  ;;  %v2135_v56 = vsub.f32 %v4746_v33, %v2027_v26  ;;  %v2136_v19 = vsub.f32 %v4784_v45, %v2027_v26 }
 0x256   :  { %v2051_v11 = vrot.slane %v2050_v55, 2  ;;  %3740 = vpow2.f32 %v2179_v53  ;;  %v761_v23 = vrot.slane %v4608_v9, 2  ;;  %v1673_v41 = vadd.f32 %v4694_v44, %v4598_v5 }
 0x257   :  { %v2040_v22 = vrot.slane %v2039_v25, 4  ;;  %v4877_v42 = vpop.eup %3732  ;;  %3742 = vpow2.f32 %v2181_v47  ;;  %v2175_v58 = vmul.f32 1.442695, %v2135_v56  ;;  %v2177_v7 = vmul.f32 1.442695, %v2136_v19 }
 0x258   :  { %v2052_v30 = vmax.f32 %v2050_v55, %v2051_v11  ;;  %v4879_v49 = vpop.eup %3734  ;;  %v2250_v33 = vsel %vm590_vm1, %v4877_v42, 0.0  ;;  %v769_v26 = vadd.f32 %v768_v18, %v4585_v21  ;;  %v762_v35 = vadd.f32 %v761_v23, %v4608_v9 }
 0x259   :  { %v2041_v45 = vmax.f32 %v2039_v25, %v2040_v22  ;;  %v2251_v52 = vsel %vm590_vm1, %v4879_v49, 0.0  ;;  %3744 = vpow2.f32 %v2175_v58  ;;  %v4888_v47 = vadd.low.f32.bf16 %v1673_v41, %v4416_v48 }
 0x25a   :  { %v2053_v44 = vrot.slane %v2052_v30, 1  ;;  %v4890_v57 = vadd.f32 %v2251_v52, %v2250_v33  ;;  %3746 = vpow2.f32 %v2177_v7  ;;  %v770_v55 = vrot.slane %v769_v26, 1 }
 0x25b   :  { %v2042_v20 = vrot.slane %v2041_v45, 2  ;;  %v2226_v0 = vrot.slane %v4864_v54, 4  ;;  %v763_v53 = vrot.slane %v762_v35, 1  ;;  %v754_v21 = vrot.slane %v4587_v27, 2 }
 0x25c   :  { %v2054_v25 = vmax.f32 %v2052_v30, %v2053_v44  ;;  %v4894_v9 = vpop.eup %3736  ;;  %v771_v19 = vadd.f32 %v770_v55, %v769_v26  ;;  %v2064_v11 = vsel %vm590_vm1, %v4888_v47, -inf  ;;  %v1665_v18 = vadd.f32 %v4598_v5, %v4703_v14 }
 0x25d   :  { %v2043_v56 = vmax.f32 %v2041_v45, %v2042_v20  ;;  %v4900_v22 = vpop.eup %3738  ;;  %v2241_v23 = vsel %vm590_vm1, %v4894_v9, 0.0  ;;  %v764_v7 = vadd.f32 %v763_v53, %v762_v35  ;;  %v755_v45 = vadd.f32 %v754_v21, %v4587_v27 }
 0x25e   :  { %v2141_v41 = vsub.f32 %v4815_v32, %v2054_v25  ;;  %v2142_v58 = vsub.f32 %v4823_v3, %v2054_v25  ;;  %v2242_v30 = vsel %vm590_vm1, %v4900_v22, 0.0  ;;  %3748 = vrcp.f32 %v771_v19 }
 0x25f   :  { %v2044_v33 = vrot.slane %v2043_v56, 1  ;;  %v4909_v26 = vadd.f32 %v2242_v30, %v2241_v23  ;;  %3750 = vrcp.f32 %v764_v7  ;;  %v756_v55 = vrot.slane %v755_v45, 1 }
 0x260   :  { %v2187_v14 = vmul.f32 1.442695, %v2141_v41  ;;  %v2189_v52 = vmul.f32 1.442695, %v2142_v58  ;;  %v4911_v44 = vpop.eup %3740  ;;  %v4914_v32 = vadd.low.f32.bf16 %v1665_v18, %v4412_v46  ;;  %v1676_v3 = vadd.f32 %v4713_v39, %v4598_v5 }
 0x261   :  { %v2045_v20 = vmax.f32 %v2043_v56, %v2044_v33  ;;  %v4918_v35 = vpop.eup %3742  ;;  %v2268_v27 = vsel %vm590_vm1, %v4911_v44, 0.0  ;;  %v1668_v53 = vadd.f32 %v4598_v5, %v4717_v15  ;;  %v757_v41 = vadd.f32 %v756_v55, %v755_v45 }
 0x262   :  { %3752 = vpow2.f32 %v2187_v14  ;;  %v2269_v21 = vsel %vm590_vm1, %v4918_v35, 0.0  ;;  %v4935_v58 = vadd.high.f32.bf16 %v1676_v3, %v4416_v48  ;;  %v2055_v45 = vsel %vm590_vm1, %v4914_v32, -inf }
 0x263   :  { %3754 = vpow2.f32 %v2189_v52  ;;  %v2139_v56 = vsub.f32 %v4818_v63, %v2045_v20  ;;  %v2140_v19 = vsub.f32 %v4862_v61, %v2045_v20  ;;  %v4929_v39 = vpop.eup %3744  ;;  %v4932_v23 = vadd.f32 %v2269_v21, %v2268_v27 }
 0x264   :  { %v4937_v7 = vpop.eup %3746  ;;  %v2259_v15 = vsel %vm590_vm1, %v4929_v39, 0.0  ;;  %v4942_v63 = vadd.high.f32.bf16 %v1668_v53, %v4412_v46  ;;  %3756 = vrcp.f32 %v757_v41  ;;  %v2065_v48 = vsel %vm590_vm1, %v4935_v58, -inf }
 0x265   :  { %v2183_v30 = vmul.f32 1.442695, %v2139_v56  ;;  %v2185_v33 = vmul.f32 1.442695, %v2140_v19  ;;  %v2260_v61 = vsel %vm590_vm1, %v4937_v7, 0.0  ;;  %v2066_v52 = vmax.f32 %v2064_v11, %v2065_v48 }
 0x266   :  { %v4950_v14 = vadd.f32 %v2260_v61, %v2259_v15  ;;  %v2056_v20 = vsel %vm590_vm1, %v4942_v63, -inf  ;;  %v775_v55 = vrot.slane %v4591_v24, 2  ;;  %v1689_v3 = vadd.f32 %v4748_v43, %v4598_v5 }
 0x267   :  { %3758 = vpow2.f32 %v2183_v30  ;;  %v2057_v46 = vmax.f32 %v2055_v45, %v2056_v20  ;;  %v2067_v21 = vrot.slane %v2066_v52, 4  ;;  %v796_v56 = vrot.slane %v4641_v62, 2 }
 0x268   :  { %3760 = vpow2.f32 %v2185_v33  ;;  %v3749_v27 = vpop.eup %3748  ;;  %v1681_v19 = vadd.f32 %v4598_v5, %v4756_v59  ;;  %v776_v30 = vadd.f32 %v775_v55, %v4591_v24  ;;  %v4964_v33 = vadd.low.f32.bf16 %v1689_v3, %v4424_v51 }
 0x269   :  { %v3751_v11 = vpop.eup %3750  ;;  %v881_v41 = vmul.f32 %v3749_v27, %v4531_v6  ;;  %v2058_v15 = vrot.slane %v2057_v46, 4  ;;  %v2068_v61 = vmax.f32 %v2066_v52, %v2067_v21  ;;  %v797_v45 = vadd.f32 %v796_v56, %v4641_v62 }
 0x26a   :  { %v880_v43 = vmul.f32 %v3751_v11, %v4559_v31  ;;  %v4969_v48 = vadd.low.f32.bf16 %v1681_v19, %v4420_v50  ;;  %v777_v53 = vrot.slane %v776_v30, 1  ;;  %v1684_v59 = vadd.f32 %v4598_v5, %v4770_v1 }
 0x26b   :  { %v901_v6 = vsel %vm590_vm1, %v881_v41, 0.0  ;;  %v2059_v27 = vmax.f32 %v2057_v46, %v2058_v15  ;;  %v2069_v62 = vrot.slane %v2068_v61, 2  ;;  %v798_v52 = vrot.slane %v797_v45, 1 }
 0x26c   :  { %v4971_v20 = vpop.eup %3752  ;;  %902 = vadd.xlane.f32.xlu1 %v901_v6  ;;  %v898_v31 = vsel %vm590_vm1, %v880_v43, 0.0  ;;  %v778_v56 = vadd.f32 %v777_v53, %v776_v30  ;;  %v2082_v46 = vsel %vm590_vm1, %v4964_v33, -inf  ;;  %v1692_v15 = vadd.f32 %v4764_v17, %v4598_v5 }
 0x26d   :  { %v4975_v24 = vpop.eup %3754  ;;  %v2286_v55 = vsel %vm590_vm1, %v4971_v20, 0.0  ;;  %899 = vadd.xlane.f32.xlu0 %v898_v31  ;;  %v2060_v21 = vrot.slane %v2059_v27, 2  ;;  %v2070_v11 = vmax.f32 %v2068_v61, %v2069_v62  ;;  %v799_v41 = vadd.f32 %v798_v52, %v797_v45 }
 0x26e   :  { %v2287_v3 = vsel %vm590_vm1, %v4975_v24, 0.0  ;;  %v3757_v6 = vpop.eup %3756  ;;  %3762 = vrcp.f32 %v778_v56  ;;  %v824_v31 = vrot.slane %v4705_v38, 2  ;;  %v2073_v61 = vsel %vm590_vm1, %v4969_v48, -inf }
 0x26f   :  { %v4984_v19 = vadd.f32 %v2287_v3, %v2286_v55  ;;  %v2061_v43 = vmax.f32 %v2059_v27, %v2060_v21  ;;  %v879_v53 = vmul.f32 %v3757_v6, %v4539_v10  ;;  %v2071_v30 = vrot.slane %v2070_v11, 1 }
 0x270   :  { %3764 = vrcp.f32 %v799_v41  ;;  %v5001_v55 = vadd.high.f32.bf16 %v1692_v15, %v4424_v51  ;;  %v5004_v1 = vadd.high.f32.bf16 %v1684_v59, %v4420_v50  ;;  %v825_v3 = vadd.f32 %v824_v31, %v4705_v38 }
 0x271   :  { %v4991_v18 = vpop.eup %3758  ;;  %v2062_v27 = vrot.slane %v2061_v43, 1  ;;  %v895_v62 = vsel %vm590_vm1, %v879_v53, 0.0  ;;  %v2072_v52 = vmax.f32 %v2070_v11, %v2071_v30  ;;  %v2289_v11 = vrot.slane %v4984_v19, 4 }
 0x272   :  { %v4996_v45 = vpop.eup %3760  ;;  %v2277_v17 = vsel %vm590_vm1, %v4991_v18, 0.0  ;;  %896 = vadd.xlane.f32.xlu1 %v895_v62  ;;  %v2083_v41 = vsel %vm590_vm1, %v5001_v55, -inf  ;;  %v2074_v51 = vsel %vm590_vm1, %v5004_v1, -inf  ;;  %v826_v53 = vrot.slane %v825_v3, 1 }
 0x273   :  { %v2278_v10 = vsel %vm590_vm1, %v4996_v45, 0.0  ;;  %v2063_v56 = vmax.f32 %v2061_v43, %v2062_v27  ;;  %v2145_v50 = vsub.f32 %v4888_v47, %v2072_v52  ;;  %v2146_v59 = vsub.f32 %v4935_v58, %v2072_v52 }
 0x274   :  { %v5010_v21 = vadd.f32 %v2278_v10, %v2277_v17  ;;  %v2084_v15 = vmax.f32 %v2082_v46, %v2083_v41  ;;  %v2075_v6 = vmax.f32 %v2073_v61, %v2074_v51  ;;  %v827_v25 = vadd.f32 %v826_v53, %v825_v3  ;;  %v5684_v51 = vld [vmem:[#allocation16_spill] sm:$0xff] }
 0x275   :  { %v2143_v38 = vsub.f32 %v4914_v32, %v2063_v56  ;;  %v2144_v31 = vsub.f32 %v4942_v63, %v2063_v56  ;;  %v2195_v43 = vmul.f32 1.442695, %v2145_v50  ;;  %v2197_v30 = vmul.f32 1.442695, %v2146_v59 }
 0x276   :  { %v2085_v17 = vrot.slane %v2084_v15, 4  ;;  %v2076_v27 = vrot.slane %v2075_v6, 4  ;;  %v782_v47 = vrot.slane %v4659_v28, 2  ;;  %v1705_v61 = vadd.f32 %v4790_v60, %v4598_v5 }
 0x277   :  { %v2191_v10 = vmul.f32 1.442695, %v2143_v38  ;;  %v2193_v62 = vmul.f32 1.442695, %v2144_v31  ;;  %3766 = vpow2.f32 %v2195_v43  ;;  %v831_v63 = vrot.slane %v4738_v12, 2  ;;  %v5686_v31 = vld [vmem:[#allocation13_spill] sm:$0xff] }
 0x278   :  { %v2086_v58 = vmax.f32 %v2084_v15, %v2085_v17  ;;  %v2077_v46 = vmax.f32 %v2075_v6, %v2076_v27  ;;  %v3763_v52 = vpop.eup %3762  ;;  %3768 = vpow2.f32 %v2197_v30  ;;  %v783_v32 = vadd.f32 %v782_v47, %v4659_v28  ;;  %v5685_v15 = vld [vmem:[#allocation17_spill] sm:$0xff] }
 0x279   :  { %v789_v56 = vrot.slane %v4677_v8, 2  ;;  %3770 = vpow2.f32 %v2191_v10  ;;  %v882_v3 = vmul.f32 %v3763_v52, %v5684_v51  ;;  %v5030_v60 = vadd.low.f32.bf16 %v1705_v61, %v5686_v31 }
 0x27a   :  { %v3765_v41 = vpop.eup %3764  ;;  %v2087_v50 = vrot.slane %v2086_v58, 2  ;;  %v2078_v59 = vrot.slane %v2077_v46, 2  ;;  %3772 = vpow2.f32 %v2193_v62  ;;  %v784_v38 = vrot.slane %v783_v32, 1 }
 0x27b   :  { %v885_v6 = vmul.f32 %v3765_v41, %v5685_v15  ;;  %v904_v53 = vsel %vm590_vm1, %v882_v3, 0.0  ;;  %3774 = vrcp.f32 %v827_v25  ;;  %v2280_v30 = vrot.slane %v5010_v21, 4  ;;  %v5687_v3 = vld [vmem:[#allocation12_spill] sm:$0xff] }
 0x27c   :  { %v2088_v28 = vmax.f32 %v2086_v58, %v2087_v50  ;;  %v2079_v43 = vmax.f32 %v2077_v46, %v2078_v59  ;;  %905 = vadd.xlane.f32.xlu1 %v904_v53  ;;  %v785_v27 = vadd.f32 %v784_v38, %v783_v32  ;;  %v832_v10 = vadd.f32 %v831_v63, %v4738_v12  ;;  %v5688_v53 = vld [vmem:[#allocation29_spill] sm:$0xff] }
 0x27d   :  { %v913_v17 = vsel %vm590_vm1, %v885_v6, 0.0  ;;  %v790_v52 = vadd.f32 %v789_v56, %v4677_v8  ;;  %v1697_v61 = vadd.f32 %v4598_v5, %v4796_v37  ;;  %v1708_v25 = vadd.f32 %v4802_v4, %v4598_v5 }
 0x27e   :  { %v2089_v62 = vrot.slane %v2088_v28, 1  ;;  %v2080_v47 = vrot.slane %v2079_v43, 1  ;;  %3776 = vrcp.f32 %v785_v27  ;;  %v833_v41 = vrot.slane %v832_v10, 1 }
 0x27f   :  { %v1700_v58 = vadd.f32 %v4598_v5, %v4804_v2  ;;  %v791_v32 = vrot.slane %v790_v52, 1  ;;  %v5044_v12 = vadd.low.f32.bf16 %v1697_v61, %v5687_v3  ;;  %v2100_v8 = vsel %vm590_vm1, %v5030_v60, -inf }
 0x280   :  { %v2090_v46 = vmax.f32 %v2088_v28, %v2089_v62  ;;  %v2081_v51 = vmax.f32 %v2079_v43, %v2080_v47  ;;  %914 = vadd.xlane.f32.xlu1 %v913_v17  ;;  %v834_v63 = vadd.f32 %v833_v41, %v832_v10  ;;  %v5049_v37 = vadd.high.f32.bf16 %v1708_v25, %v5686_v31 }
 0x281   :  { %v5052_v56 = vadd.high.f32.bf16 %v1700_v58, %v5687_v3  ;;  %v5054_v4 = vpop.eup %3766  ;;  %v792_v31 = vadd.f32 %v791_v32, %v790_v52  ;;  %v817_v28 = vrot.slane %v5688_v53, 2  ;;  %v2091_v32 = vsel %vm590_vm1, %v5044_v12, -inf }
 0x282   :  { %v2149_v2 = vsub.f32 %v4964_v33, %v2090_v46  ;;  %v2150_v50 = vsub.f32 %v5001_v55, %v2090_v46  ;;  %v2147_v59 = vsub.f32 %v4969_v48, %v2081_v51  ;;  %v2148_v15 = vsub.f32 %v5004_v1, %v2081_v51  ;;  %v5060_v6 = vpop.eup %3768  ;;  %v5689_v46 = vld [vmem:[#allocation21_spill] sm:$0xff] }
 0x283   :  { %v2304_v38 = vsel %vm590_vm1, %v5054_v4, 0.0  ;;  %3778 = vrcp.f32 %v834_v63  ;;  %v5065_v43 = vpop.eup %3770  ;;  %v2305_v33 = vsel %vm590_vm1, %v5060_v6, 0.0  ;;  %v2101_v48 = vsel %vm590_vm1, %v5049_v37, -inf }
 0x284   :  { %v2203_v17 = vmul.f32 1.442695, %v2149_v2  ;;  %v2205_v55 = vmul.f32 1.442695, %v2150_v50  ;;  %v5071_v1 = vpop.eup %3772  ;;  %v5073_v27 = vadd.f32 %v2305_v33, %v2304_v38  ;;  %v2295_v10 = vsel %vm590_vm1, %v5065_v43, 0.0  ;;  %v5691_v33 = vld [vmem:[#allocation18_spill] sm:$0xff] }
 0x285   :  { %v2199_v62 = vmul.f32 1.442695, %v2147_v59  ;;  %v2201_v47 = vmul.f32 1.442695, %v2148_v15  ;;  %v3775_v52 = vpop.eup %3774  ;;  %v2296_v61 = vsel %vm590_vm1, %v5071_v1, 0.0  ;;  %v2102_v41 = vmax.f32 %v2100_v8, %v2101_v48  ;;  %v5690_v15 = vld [vmem:[#allocation25_spill] sm:$0xff] }
 0x286   :  { %3780 = vpow2.f32 %v2203_v17  ;;  %v2092_v25 = vsel %vm590_vm1, %v5052_v56, -inf  ;;  %v5081_v58 = vadd.f32 %v2296_v61, %v2295_v10  ;;  %v889_v51 = vmul.f32 %v3775_v52, %v5689_v46 }
 0x287   :  { %3782 = vpow2.f32 %v2205_v55  ;;  %v2103_v3 = vrot.slane %v2102_v41, 4  ;;  %v2093_v63 = vmax.f32 %v2091_v32, %v2092_v25  ;;  %v818_v2 = vadd.f32 %v817_v28, %v5688_v53  ;;  %v5692_v28 = vld [vmem:[#allocation31_spill] sm:$0xff] }
 0x288   :  { %3784 = vpow2.f32 %v2199_v62  ;;  %v3777_v50 = vpop.eup %3776  ;;  %v925_v8 = vsel %vm590_vm1, %v889_v51, 0.0  ;;  %v810_v38 = vrot.slane %v5690_v15, 2  ;;  %v1721_v53 = vadd.f32 %v4833_v29, %v4598_v5  ;;  %v5693_v32 = vld [vmem:[#allocation15_spill] sm:$0xff] }
 0x289   :  { %3786 = vpow2.f32 %v2201_v47  ;;  %926 = vadd.xlane.f32.xlu0 %v925_v8  ;;  %v883_v17 = vmul.f32 %v3777_v50, %v5691_v33  ;;  %v2104_v55 = vmax.f32 %v2102_v41, %v2103_v3  ;;  %v2094_v48 = vrot.slane %v2093_v63, 4  ;;  %v5694_v8 = vld [vmem:[#allocation23_spill] sm:$0xff]  ;;  %v5695_v33 = vld [vmem:[#allocation14_spill] sm:$0xff] }
 0x28a   :  { %3788 = vrcp.f32 %v792_v31  ;;  %v819_v10 = vrot.slane %v818_v2, 1  ;;  %v811_v62 = vadd.f32 %v810_v38, %v5690_v15  ;;  %v852_v52 = vrot.slane %v5692_v28, 2 }
 0x28b   :  { %v907_v47 = vsel %vm590_vm1, %v883_v17, 0.0  ;;  %v2105_v61 = vrot.slane %v2104_v55, 2  ;;  %v2095_v25 = vmax.f32 %v2093_v63, %v2094_v48  ;;  %v1713_v46 = vadd.f32 %v4598_v5, %v4841_v40 }
 0x28c   :  { %908 = vadd.xlane.f32.xlu1 %v907_v47  ;;  %v820_v31 = vadd.f32 %v819_v10, %v818_v2  ;;  %v812_v41 = vrot.slane %v811_v62, 1  ;;  %v5099_v3 = vadd.low.f32.bf16 %v1721_v53, %v5693_v32  ;;  %v853_v50 = vadd.f32 %v852_v52, %v5692_v28 }
 0x28d   :  { %v3779_v51 = vpop.eup %3778  ;;  %v2106_v15 = vmax.f32 %v2104_v55, %v2105_v61  ;;  %v2096_v38 = vrot.slane %v2095_v25, 2  ;;  %v5104_v17 = vadd.low.f32.bf16 %v1713_v46, %v5695_v33 }
 0x28e   :  { %v890_v29 = vmul.f32 %v3779_v51, %v5694_v8  ;;  %3790 = vrcp.f32 %v820_v31  ;;  %v813_v5 = vadd.f32 %v812_v41, %v811_v62  ;;  %v854_v40 = vrot.slane %v853_v50, 1  ;;  %v3854_v62 = vld [vmem:[%s5620_s11] ss:$0 sm:$0xff] }
 0x28f   :  { %v2107_v10 = vrot.slane %v2106_v15, 1  ;;  %v2097_v53 = vmax.f32 %v2095_v25, %v2096_v38  ;;  %v2118_v28 = vsel %vm590_vm1, %v5099_v3, -inf  ;;  %v1724_v61 = vadd.f32 %v3854_v62, %v4845_v34 }
 0x290   :  { %v5107_v48 = vpop.eup %3780  ;;  %v928_v2 = vsel %vm590_vm1, %v890_v29, 0.0  ;;  %3792 = vrcp.f32 %v813_v5  ;;  %v855_v47 = vadd.f32 %v854_v40, %v853_v50  ;;  %v1716_v41 = vadd.f32 %v3854_v62, %v4853_v13 }
 0x291   :  { %v5112_v52 = vpop.eup %3782  ;;  %v2322_v55 = vsel %vm590_vm1, %v5107_v48, 0.0  ;;  %929 = vadd.xlane.f32.xlu0 %v928_v2  ;;  %v2108_v51 = vmax.f32 %v2106_v15, %v2107_v10  ;;  %v2098_v31 = vrot.slane %v2097_v53, 1  ;;  %v5132_v38 = vadd.high.f32.bf16 %v1724_v61, %v5693_v32  ;;  %v5696_v10 = vld [vmem:[#allocation19_spill] sm:$0xff] }
 0x292   :  { %v5120_v46 = vpop.eup %3784  ;;  %v2323_v25 = vsel %vm590_vm1, %v5112_v52, 0.0  ;;  %3794 = vrcp.f32 %v855_v47  ;;  %v2109_v62 = vsel %vm590_vm1, %v5104_v17, -inf }
 0x293   :  { %v5125_v8 = vpop.eup %3786  ;;  %v5127_v29 = vadd.f32 %v2323_v25, %v2322_v55  ;;  %v2313_v50 = vsel %vm590_vm1, %v5120_v46, 0.0  ;;  %v2153_v15 = vsub.f32 %v5030_v60, %v2108_v51  ;;  %v2154_v40 = vsub.f32 %v5049_v37, %v2108_v51 }
 0x294   :  { %v3789_v34 = vpop.eup %3788  ;;  %v2314_v5 = vsel %vm590_vm1, %v5125_v8, 0.0  ;;  %v2099_v13 = vmax.f32 %v2097_v53, %v2098_v31  ;;  %v2119_v32 = vsel %vm590_vm1, %v5132_v38, -inf  ;;  %v5150_v51 = vadd.high.f32.bf16 %v1716_v41, %v5695_v33 }
 0x295   :  { %v5138_v2 = vadd.f32 %v2314_v5, %v2313_v50  ;;  %v884_v55 = vmul.f32 %v3789_v34, %v5696_v10  ;;  %v2211_v47 = vmul.f32 1.442695, %v2153_v15  ;;  %v2213_v61 = vmul.f32 1.442695, %v2154_v40  ;;  %v5697_v34 = vld [vmem:[#allocation32_spill] sm:$0xff] }
 0x296   :  { %v2151_v25 = vsub.f32 %v5044_v12, %v2099_v13  ;;  %v2152_v63 = vsub.f32 %v5052_v56, %v2099_v13  ;;  %v2120_v53 = vmax.f32 %v2118_v28, %v2119_v32  ;;  %v838_v5 = vrot.slane %v5697_v34, 2  ;;  %v5698_v56 = vld [vmem:[#allocation35_spill] sm:$0xff]  ;;  %v5699_v10 = vld [vmem:[#allocation24_spill] sm:$0xff] }
 0x297   :  { %v910_v37 = vsel %vm590_vm1, %v884_v55, 0.0  ;;  %3796 = vpow2.f32 %v2211_v47  ;;  %v2110_v12 = vsel %vm590_vm1, %v5150_v51, -inf  ;;  %v845_v13 = vrot.slane %v5698_v56, 2 }
 0x298   :  { %911 = vadd.xlane.f32.xlu1 %v910_v37  ;;  %v2207_v31 = vmul.f32 1.442695, %v2151_v25  ;;  %v2209_v50 = vmul.f32 1.442695, %v2152_v63  ;;  %v3791_v15 = vpop.eup %3790  ;;  %3798 = vpow2.f32 %v2213_v61  ;;  %v2121_v40 = vrot.slane %v2120_v53, 4  ;;  %v5700_v25 = vld [vmem:[#allocation22_spill] sm:$0xff] }
 0x299   :  { %v888_v28 = vmul.f32 %v3791_v15, %v5699_v10  ;;  %v2111_v55 = vmax.f32 %v2109_v62, %v2110_v12  ;;  %v839_v33 = vadd.f32 %v838_v5, %v5697_v34  ;;  %v846_v63 = vadd.f32 %v845_v13, %v5698_v56  ;;  %v5701_v5 = vld [vmem:[#allocation26_spill] sm:$0xff] }
 0x29a   :  { %3800 = vpow2.f32 %v2207_v31  ;;  %v3793_v41 = vpop.eup %3792  ;;  %v2122_v32 = vmax.f32 %v2120_v53, %v2121_v40  ;;  %v2227_v47 = vadd.f32 %v2226_v0, %v4864_v54  ;;  %v2236_v53 = vadd.f32 %v2235_v16, %v4835_v36 }
 0x29b   :  { %3802 = vpow2.f32 %v2209_v50  ;;  %v922_v61 = vsel %vm590_vm1, %v888_v28, 0.0  ;;  %v887_v37 = vmul.f32 %v3793_v41, %v5700_v25  ;;  %v2112_v60 = vrot.slane %v2111_v55, 4 }
 0x29c   :  { %v840_v31 = vrot.slane %v839_v33, 1  ;;  %v3795_v59 = vpop.eup %3794  ;;  %923 = vadd.xlane.f32.xlu0 %v922_v61  ;;  %v2123_v62 = vrot.slane %v2122_v32, 2  ;;  %v847_v15 = vrot.slane %v846_v63, 1  ;;  %v2228_v34 = vrot.slane %v2227_v47, 2 }
 0x29d   :  { %v919_v50 = vsel %vm590_vm1, %v887_v37, 0.0  ;;  %v893_v40 = vmul.f32 %v3795_v59, %v5701_v5  ;;  %v2113_v54 = vmax.f32 %v2111_v55, %v2112_v60  ;;  %v2237_v10 = vrot.slane %v2236_v53, 2 }
 0x29e   :  { %v841_v0 = vadd.f32 %v840_v31, %v839_v33  ;;  %920 = vadd.xlane.f32.xlu1 %v919_v50  ;;  %v2124_v12 = vmax.f32 %v2122_v32, %v2123_v62  ;;  %v848_v56 = vadd.f32 %v847_v15, %v846_v63  ;;  %v2229_v13 = vadd.f32 %v2228_v34, %v2227_v47 }
 0x29f   :  { %v937_v28 = vsel %vm590_vm1, %v893_v40, 0.0  ;;  %v2114_v41 = vrot.slane %v2113_v54, 2  ;;  %v5702_v61 = vrot.slane %v4890_v57, 4  ;;  %v2238_v59 = vadd.f32 %v2237_v10, %v2236_v53 }
 0x2a0   :  { %3804 = vrcp.f32 %v841_v0  ;;  %938 = vadd.xlane.f32.xlu0 %v937_v28  ;;  %v2125_v36 = vrot.slane %v2124_v12, 1  ;;  %v2230_v16 = vrot.slane %v2229_v13, 1  ;;  %v5703_v32 = vrot.slane %v4909_v26, 4 }
 0x2a1   :  { %v2254_v25 = vadd.f32 %v5702_v61, %v4890_v57  ;;  %3806 = vrcp.f32 %v848_v56  ;;  %v5173_v60 = vpop.eup %3796  ;;  %v2115_v55 = vmax.f32 %v2113_v54, %v2114_v41  ;;  %v5704_v47 = vrot.slane %v4932_v23, 4 }
 0x2a2   :  { %v2245_v63 = vadd.f32 %v5703_v32, %v4909_v26  ;;  %v5181_v31 = vpop.eup %3798  ;;  %v2340_v57 = vsel %vm590_vm1, %v5173_v60, 0.0  ;;  %v2126_v62 = vmax.f32 %v2124_v12, %v2125_v36  ;;  %v2231_v15 = vadd.f32 %v2230_v16, %v2229_v13 }
 0x2a3   :  { %v2255_v33 = vrot.slane %v2254_v25, 2  ;;  %v2272_v37 = vadd.f32 %v5704_v47, %v4932_v23  ;;  %v2239_v34 = vrot.slane %v2238_v59, 1  ;;  %v2341_v50 = vsel %vm590_vm1, %v5181_v31, 0.0 }
 0x2a4   :  { %v5185_v53 = vpop.eup %3800  ;;  %v2116_v5 = vrot.slane %v2115_v55, 1  ;;  %v2246_v26 = vrot.slane %v2245_v63, 2  ;;  %v5191_v0 = vadd.f32 %v2341_v50, %v2340_v57  ;;  %v2157_v56 = vsub.f32 %v5099_v3, %v2126_v62 }
 0x2a5   :  { %v2256_v40 = vadd.f32 %v2255_v33, %v2254_v25  ;;  %v5189_v54 = vpop.eup %3802  ;;  %v2331_v23 = vsel %vm590_vm1, %v5185_v53, 0.0  ;;  %v2158_v12 = vsub.f32 %v5132_v38, %v2126_v62  ;;  %3808 = vrcp.f32 %v2231_v15 }
 0x2a6   :  { %v2332_v13 = vsel %vm590_vm1, %v5189_v54, 0.0  ;;  %v2117_v10 = vmax.f32 %v2115_v55, %v2116_v5  ;;  %v2240_v28 = vadd.f32 %v2239_v34, %v2238_v59  ;;  %v2316_v41 = vrot.slane %v5138_v2, 4  ;;  %v5705_v34 = vld [vmem:[#allocation27_spill] sm:$0xff] }
 0x2a7   :  { %v5200_v61 = vadd.f32 %v2332_v13, %v2331_v23  ;;  %v2219_v25 = vmul.f32 1.442695, %v2157_v56  ;;  %v2221_v36 = vmul.f32 1.442695, %v2158_v12  ;;  %v2257_v3 = vrot.slane %v2256_v40, 1  ;;  %v5707_v56 = vld [vmem:[#allocation30_spill] sm:$0xff] }
 0x2a8   :  { %v2155_v16 = vsub.f32 %v5104_v17, %v2117_v10  ;;  %v2156_v33 = vsub.f32 %v5150_v51, %v2117_v10  ;;  %3810 = vrcp.f32 %v2240_v28  ;;  %v2343_v38 = vrot.slane %v5191_v0, 4 }
 0x2a9   :  { %3812 = vpow2.f32 %v2219_v25  ;;  %v2247_v32 = vadd.f32 %v2246_v26, %v2245_v63  ;;  %v2273_v47 = vrot.slane %v2272_v37, 2  ;;  %v2258_v62 = vadd.f32 %v2257_v3, %v2256_v40 }
 0x2aa   :  { %v3805_v55 = vpop.eup %3804  ;;  %3814 = vpow2.f32 %v2221_v36  ;;  %v2215_v59 = vmul.f32 1.442695, %v2155_v16  ;;  %v2217_v57 = vmul.f32 1.442695, %v2156_v33  ;;  %v5706_v17 = vrot.slane %v4950_v14, 4 }
 0x2ab   :  { %v3807_v15 = vpop.eup %3806  ;;  %v891_v50 = vmul.f32 %v3805_v55, %v5705_v34  ;;  %v2248_v5 = vrot.slane %v2247_v32, 1  ;;  %v2274_v23 = vadd.f32 %v2273_v47, %v2272_v37  ;;  %v2290_v63 = vadd.f32 %v2289_v11, %v4984_v19  ;;  %v5710_v47 = vld [vmem:[#allocation37_spill] sm:$0xff] }
 0x2ac   :  { %v2263_v51 = vadd.f32 %v5706_v17, %v4950_v14  ;;  %3816 = vpow2.f32 %v2215_v59  ;;  %v892_v12 = vmul.f32 %v3807_v15, %v5707_v56  ;;  %v2281_v40 = vadd.f32 %v2280_v30, %v5010_v21  ;;  %v5711_v59 = vld [vmem:[#allocation36_spill] sm:$0xff] }
 0x2ad   :  { %3818 = vpow2.f32 %v2217_v57  ;;  %v931_v26 = vsel %vm590_vm1, %v891_v50, 0.0  ;;  %v2249_v13 = vadd.f32 %v2248_v5, %v2247_v32  ;;  %v2275_v37 = vrot.slane %v2274_v23, 1 }
 0x2ae   :  { %v2334_v10 = vrot.slane %v5200_v61, 4  ;;  %932 = vadd.xlane.f32.xlu0 %v931_v26  ;;  %3820 = vrcp.f32 %v2258_v62  ;;  %v2264_v14 = vrot.slane %v2263_v51, 2  ;;  %v2291_v28 = vrot.slane %v2290_v63, 2 }
 0x2af   :  { %3822 = vrcp.f32 %v2249_v13  ;;  %v2276_v25 = vadd.f32 %v2275_v37, %v2274_v23  ;;  %v2282_v36 = vrot.slane %v2281_v40, 2  ;;  %v5708_v19 = vrot.slane %v5073_v27, 4  ;;  %v3809_v16 = vpop.eup %3808 }
 0x2b0   :  { %v934_v21 = vsel %vm590_vm1, %v892_v12, 0.0  ;;  %v2265_v30 = vadd.f32 %v2264_v14, %v2263_v51  ;;  %v2292_v33 = vadd.f32 %v2291_v28, %v2290_v63  ;;  %v5709_v3 = vrot.slane %v5081_v58, 4  ;;  %v5712_v51 = vld [vmem:[#allocation33_spill] sm:$0xff]  ;;  %v5713_v12 = vld [vmem:[#allocation34_spill] sm:$0xff] }
 0x2b1   :  { %v2308_v11 = vadd.f32 %v5708_v19, %v5073_v27  ;;  %v2384_v55 = vmul.f32 %v3809_v16, %v5710_v47  ;;  %v2383_v57 = vmul.f32 %v3809_v16, %v5711_v59  ;;  %3824 = vrcp.f32 %v2276_v25 }
 0x2b2   :  { %v2299_v32 = vadd.f32 %v5709_v3, %v5081_v58  ;;  %v2283_v62 = vadd.f32 %v2282_v36, %v2281_v40  ;;  %v3811_v15 = vpop.eup %3810  ;;  %935 = vadd.xlane.f32.xlu0 %v934_v21  ;;  %v2266_v34 = vrot.slane %v2265_v30, 1  ;;  %v2293_v50 = vrot.slane %v2292_v33, 1 }
 0x2b3   :  { %v2309_v27 = vrot.slane %v2308_v11, 2  ;;  %v5227_v23 = vpop.eup %3812  ;;  %v2418_v17 = vsel %vm590_vm1, %v2384_v55, 0.0  ;;  %v2385_v56 = vmul.f32 %v3811_v15, %v5712_v51  ;;  %v2386_v58 = vmul.f32 %v3811_v15, %v5713_v12 }
 0x2b4   :  { %v2300_v5 = vrot.slane %v2299_v32, 2  ;;  %v5714_v63 = vrot.slane %v5127_v29, 4  ;;  %v5235_v13 = vpop.eup %3814  ;;  %v2358_v40 = vsel %vm590_vm1, %v5227_v23, 0.0  ;;  %2419 = vadd.xlane.f32.xlu1 %v2418_v17  ;;  %v2267_v37 = vadd.f32 %v2266_v34, %v2265_v30 }
 0x2b5   :  { %v2294_v14 = vadd.f32 %v2293_v50, %v2292_v33  ;;  %v2284_v28 = vrot.slane %v2283_v62, 1  ;;  %v2359_v25 = vsel %vm590_vm1, %v5235_v13, 0.0  ;;  %v2421_v36 = vsel %vm590_vm1, %v2385_v56, 0.0 }
 0x2b6   :  { %v2326_v26 = vadd.f32 %v5714_v63, %v5127_v29  ;;  %v2424_v19 = vsel %vm590_vm1, %v2386_v58, 0.0  ;;  %v2310_v16 = vadd.f32 %v2309_v27, %v2308_v11  ;;  %v5243_v21 = vpop.eup %3816  ;;  %v2360_v29 = vadd.f32 %v2359_v25, %v2358_v40  ;;  %2422 = vadd.xlane.f32.xlu0 %v2421_v36 }
 0x2b7   :  { %3826 = vrcp.f32 %v2267_v37  ;;  %v2285_v3 = vadd.f32 %v2284_v28, %v2283_v62  ;;  %v2301_v47 = vadd.f32 %v2300_v5, %v2299_v32  ;;  %v5245_v55 = vpop.eup %3818  ;;  %v2349_v30 = vsel %vm590_vm1, %v5243_v21, 0.0 }
 0x2b8   :  { %3828 = vrcp.f32 %v2294_v14  ;;  %v2311_v33 = vrot.slane %v2310_v16, 1  ;;  %v2327_v59 = vrot.slane %v2326_v26, 2  ;;  %v3821_v15 = vpop.eup %3820  ;;  %v2361_v34 = vrot.slane %v2360_v29, 4 }
 0x2b9   :  { %v2350_v11 = vsel %vm590_vm1, %v5245_v55, 0.0  ;;  %3830 = vrcp.f32 %v2285_v3  ;;  %v2302_v50 = vrot.slane %v2301_v47, 1  ;;  %v3823_v27 = vpop.eup %3822  ;;  %v2389_v62 = vmul.f32 %v3821_v15, %v4877_v42 }
 0x2ba   :  { %v2351_v17 = vadd.f32 %v2350_v11, %v2349_v30  ;;  %v2390_v32 = vmul.f32 %v3821_v15, %v4879_v49  ;;  %v2312_v5 = vadd.f32 %v2311_v33, %v2310_v16  ;;  %2425 = vadd.xlane.f32.xlu0 %v2424_v19  ;;  %v2387_v51 = vmul.f32 %v3823_v27, %v4894_v9 }
 0x2bb   :  { %v2388_v56 = vmul.f32 %v3823_v27, %v4900_v22  ;;  %v2303_v12 = vadd.f32 %v2302_v50, %v2301_v47  ;;  %v2328_v58 = vadd.f32 %v2327_v59, %v2326_v26  ;;  %v3825_v63 = vpop.eup %3824  ;;  %v2433_v40 = vsel %vm590_vm1, %v2389_v62, 0.0  ;;  %v5715_v26 = vld [vmem:[#allocation28_spill] sm:$0xff] }
 0x2bc   :  { %3832 = vrcp.f32 %v2312_v5  ;;  %2434 = vadd.xlane.f32.xlu1 %v2433_v40  ;;  %v2415_v37 = vsel %vm590_vm1, %v2383_v57, 0.0  ;;  %v2393_v14 = vmul.f32 %v3825_v63, %v4911_v44  ;;  %v2394_v42 = vmul.f32 %v3825_v63, %v4918_v35 }
 0x2bd   :  { %3834 = vrcp.f32 %v2303_v12  ;;  %v2329_v49 = vrot.slane %v2328_v58, 1  ;;  %v2317_v9 = vadd.f32 %v2316_v41, %v5138_v2  ;;  %v2344_v22 = vadd.f32 %v2343_v38, %v5191_v0 }
 0x2be   :  { %3836 = vpow2.f32 %v5715_v26  ;;  %v2352_v28 = vrot.slane %v2351_v17, 4  ;;  %2416 = vadd.xlane.f32.xlu0 %v2415_v37  ;;  %v2335_v44 = vadd.f32 %v2334_v10, %v5200_v61  ;;  %v2362_v57 = vadd.f32 %v2361_v34, %v2360_v29 }
 0x2bf   :  { %v2427_v35 = vsel %vm590_vm1, %v2387_v51, 0.0  ;;  %v2330_v25 = vadd.f32 %v2329_v49, %v2328_v58  ;;  %v2318_v36 = vrot.slane %v2317_v9, 2  ;;  %v2345_v19 = vrot.slane %v2344_v22, 2 }
 0x2c0   :  { %2428 = vadd.xlane.f32.xlu1 %v2427_v35  ;;  %v2436_v2 = vsel %vm590_vm1, %v2390_v32, 0.0  ;;  %v2445_v0 = vsel %vm590_vm1, %v2393_v14, 0.0  ;;  %v2336_v41 = vrot.slane %v2335_v44, 2  ;;  %v2363_v38 = vrot.slane %v2362_v57, 2 }
 0x2c1   :  { %v3827_v16 = vpop.eup %3826  ;;  %3838 = vrcp.f32 %v2330_v25  ;;  %v2319_v61 = vadd.f32 %v2318_v36, %v2317_v9  ;;  %v2346_v59 = vadd.f32 %v2345_v19, %v2344_v22  ;;  %v2353_v50 = vadd.f32 %v2352_v28, %v2351_v17 }
 0x2c2   :  { %v3829_v3 = vpop.eup %3828  ;;  %v2391_v47 = vmul.f32 %v3827_v16, %v4929_v39  ;;  %v2392_v30 = vmul.f32 %v3827_v16, %v4937_v7  ;;  %2437 = vadd.xlane.f32.xlu0 %v2436_v2  ;;  %v2337_v15 = vadd.f32 %v2336_v41, %v2335_v44  ;;  %v5716_v7 = vld [vmem:[#allocation20_spill] sm:$0xff]  ;;  %v2430_v5 = vsel %vm590_vm1, %v2388_v56, 0.0 }
 0x2c3   :  { %v3831_v10 = vpop.eup %3830  ;;  %v2397_v29 = vmul.f32 %v3829_v3, %v4971_v20  ;;  %v2398_v33 = vmul.f32 %v3829_v3, %v4975_v24  ;;  %v2320_v27 = vrot.slane %v2319_v61, 1  ;;  %v2347_v39 = vrot.slane %v2346_v59, 1 }
 0x2c4   :  { %v2395_v34 = vmul.f32 %v3831_v10, %v4991_v18  ;;  %v2396_v11 = vmul.f32 %v3831_v10, %v4996_v45  ;;  %2446 = vadd.xlane.f32.xlu1 %v2445_v0  ;;  %v800_v32 = vsel %vm590_vm1, %v5716_v7, 0.0  ;;  %v2338_v51 = vrot.slane %v2337_v15, 1 }
 0x2c5   :  { %v2364_v20 = vadd.f32 %v2363_v38, %v2362_v57  ;;  %v2321_v18 = vadd.f32 %v2320_v27, %v2319_v61  ;;  %v2348_v58 = vadd.f32 %v2347_v39, %v2346_v59  ;;  %v2439_v17 = vsel %vm590_vm1, %v2391_v47, 0.0 }
 0x2c6   :  { %v3833_v62 = vpop.eup %3832  ;;  %2431 = vadd.xlane.f32.xlu0 %v2430_v5  ;;  %v2339_v63 = vadd.f32 %v2338_v51, %v2337_v15  ;;  %v2354_v37 = vrot.slane %v2353_v50, 2  ;;  %v2448_v56 = vsel %vm590_vm1, %v2394_v42, 0.0  ;;  %v801_v26 = vrot.slane %v800_v32, 4 }
 0x2c7   :  { %v2401_v24 = vmul.f32 %v3833_v62, %v5054_v4  ;;  %v2402_v12 = vmul.f32 %v3833_v62, %v5060_v6  ;;  %v3835_v45 = vpop.eup %3834  ;;  %v2365_v40 = vrot.slane %v2364_v20, 1  ;;  %v2457_v4 = vsel %vm590_vm1, %v2397_v29, 0.0 }
 0x2c8   :  { %v5284_v14 = vpop.eup %3836  ;;  %2440 = vadd.xlane.f32.xlu1 %v2439_v17  ;;  %v2399_v49 = vmul.f32 %v3835_v45, %v5065_v43  ;;  %v2400_v9 = vmul.f32 %v3835_v45, %v5071_v1  ;;  %3840 = vrcp.f32 %v2321_v18  ;;  %v2355_v22 = vadd.f32 %v2354_v37, %v2353_v50 }
 0x2c9   :  { %v2366_v6 = vadd.f32 %v2365_v40, %v2364_v20  ;;  %3842 = vrcp.f32 %v2348_v58  ;;  %v856_v43 = vsel %vm590_vm1, %v5284_v14, 0.0  ;;  %v2442_v1 = vsel %vm590_vm1, %v2392_v30, 0.0 }
 0x2ca   :  { %2449 = vadd.xlane.f32.xlu0 %v2448_v56  ;;  %3844 = vrcp.f32 %v2339_v63  ;;  %v2356_v44 = vrot.slane %v2355_v22, 1  ;;  %v802_v25 = vadd.f32 %v801_v26, %v800_v32  ;;  %v2451_v36 = vsel %vm590_vm1, %v2395_v34, 0.0 }
 0x2cb   :  { %v3839_v28 = vpop.eup %3838  ;;  %3846 = vrcp.f32 %v2366_v6  ;;  %v857_v19 = vrot.slane %v856_v43, 4  ;;  %v2460_v16 = vsel %vm590_vm1, %v2398_v33, 0.0  ;;  %v2454_v30 = vsel %vm590_vm1, %v2396_v11, 0.0  ;;  %v3664_v6 = vld [vmem:[%s5622_s13] sm:$0xff]  }
 0x2cc   :  { %2458 = vadd.xlane.f32.xlu1 %v2457_v4  ;;  %v2405_v57 = vmul.f32 %v3839_v28, %v5107_v48  ;;  %v2406_v42 = vmul.f32 %v3839_v28, %v5112_v52  ;;  %v2357_v35 = vadd.f32 %v2356_v44, %v2355_v22  ;;  %v2469_v48 = vsel %vm590_vm1, %v2401_v24, 0.0  ;;  %v3665_v22 = vld [vmem:[%s5621_s12] sm:$0xff]  }
 0x2cd   :  { %v803_v52 = vrot.slane %v802_v25, 2  ;;  %v858_v41 = vadd.f32 %v857_v19, %v856_v43  ;;  %v2463_v34 = vsel %vm590_vm1, %v2399_v49, 0.0  ;;  %v2466_v62 = vsel %vm590_vm1, %v2400_v9, 0.0 }
 0x2ce   :  { %2443 = vadd.xlane.f32.xlu0 %v2442_v1  ;;  %3848 = vrcp.f32 %v2357_v35  ;;  %v2484_v5 = vsel %vm590_vm1, %v2406_v42, 0.0  ;;  %v4025_v56 = vmov 0.0  }
 0x2cf   :  { %v804_v15 = vadd.f32 %v803_v52, %v802_v25  ;;  %v859_v50 = vrot.slane %v858_v41, 2  ;;  %3477 = vmatprep.subr.bf16.mxu0 %v4025_v56  ;;  %3485 = vmatprep.subr.bf16.mxu1 %v4025_v56 }
 0x2d0   :  { %2452 = vadd.xlane.f32.xlu1 %v2451_v36  ;;  %3478 = vmatpush3.bf16.msra.mxu0 %v3664_v6 }
 0x2d1   :  { %v860_v39 = vadd.f32 %v859_v50, %v858_v41  ;;  %3486 = vmatpush3.bf16.msra.mxu1 %v3665_v22  ;;  %3479 = vmatprep.subr.bf16.mxu0 %v4025_v56 }
 0x2d2   :  { %2461 = vadd.xlane.f32.xlu0 %v2460_v16  ;;  %v3841_v2 = vpop.eup %3840  ;;  %3487 = vmatprep.subr.bf16.mxu1 %v4025_v56 }
 0x2d3   :  { %v3843_v0 = vpop.eup %3842  ;;  %v2403_v38 = vmul.f32 %v3841_v2, %v5120_v46  ;;  %v2404_v3 = vmul.f32 %v3841_v2, %v5125_v8  ;;  %v861_v32 = vrot.slane %v860_v39, 1  ;;  %3481 = vmatprep.mubr.msk.bf16.mxu0 %vm4026_vm5, %v4025_v56  ;;  %3489 = vmatprep.mubr.msk.bf16.mxu1 %vm4026_vm5, %v4025_v56 }
 0x2d4   :  { %2470 = vadd.xlane.f32.xlu1 %v2469_v48  ;;  %v3845_v47 = vpop.eup %3844  ;;  %v2409_v61 = vmul.f32 %v3843_v0, %v5173_v60  ;;  %v2410_v10 = vmul.f32 %v3843_v0, %v5181_v31  ;;  %v2472_v60 = vsel %vm590_vm1, %v2402_v12, 0.0  ;;  %v2481_v31 = vsel %vm590_vm1, %v2405_v57, 0.0 }
 0x2d5   :  { %v3847_v29 = vpop.eup %3846  ;;  %v2407_v33 = vmul.f32 %v3845_v47, %v5185_v53  ;;  %v2408_v59 = vmul.f32 %v3845_v47, %v5189_v54  ;;  %v805_v53 = vrot.slane %v804_v15, 1 }
 0x2d6   :  { %2455 = vadd.xlane.f32.xlu0 %v2454_v30  ;;  %v2413_v46 = vmul.f32 %v3847_v29, %v5227_v23  ;;  %v2414_v8 = vmul.f32 %v3847_v29, %v5235_v13  ;;  %v2475_v13 = vsel %vm590_vm1, %v2403_v38, 0.0  ;;  %v2493_v51 = vsel %vm590_vm1, %v2409_v61, 0.0 }
 0x2d7   :  { %v806_v23 = vadd.f32 %v805_v53, %v804_v15  ;;  %v2487_v20 = vsel %vm590_vm1, %v2407_v33, 0.0  ;;  %v2496_v24 = vsel %vm590_vm1, %v2410_v10, 0.0  ;;  %v2490_v58 = vsel %vm590_vm1, %v2408_v59, 0.0 }
 0x2d8   :  { %2464 = vadd.xlane.f32.xlu1 %v2463_v34  ;;  %v3849_v11 = vpop.eup %3848  ;;  %v2505_v12 = vsel %vm590_vm1, %v2413_v46, 0.0  ;;  %v2508_v63 = vsel %vm590_vm1, %v2414_v8, 0.0 }
 0x2d9   :  { %v2411_v27 = vmul.f32 %v3849_v11, %v5243_v21  ;;  %v2412_v54 = vmul.f32 %v3849_v11, %v5245_v55  ;;  %3850 = vrcp.f32 %v806_v23  ;;  %v862_v21 = vadd.f32 %v861_v32, %v860_v39 }
 0x2da   :  { %2473 = vadd.xlane.f32.xlu0 %v2472_v60  ;;  %v2478_v55 = vsel %vm590_vm1, %v2404_v3, 0.0 }
 0x2db   :  { %3852 = vrcp.f32 %v862_v21  ;;  %v2499_v45 = vsel %vm590_vm1, %v2411_v27, 0.0  ;;  %v2502_v49 = vsel %vm590_vm1, %v2412_v54, 0.0 }
 0x2dc   :  { %2482 = vadd.xlane.f32.xlu1 %v2481_v31 }
 0x2de   :  { %2467 = vadd.xlane.f32.xlu0 %v2466_v62 }
 0x2e0   :  { %2476 = vadd.xlane.f32.xlu1 %v2475_v13  ;;  %v5351_v13 = vld [vmem:[%s5656_s23 + $0x18] sm:$0xff]  }
 0x2e1   :  { %v949_v32 = vunpack.c.l.bf16 %v5351_v13 }
 0x2e2   :  { %2485 = vadd.xlane.f32.xlu0 %v2484_v5 }
 0x2e3   :  { %v3851_v18 = vpop.eup %3850 }
 0x2e4   :  { %2494 = vadd.xlane.f32.xlu1 %v2493_v51  ;;  %v886_v17 = vmul.f32 %v3851_v18, %v5716_v7  ;;  %v3855_v7 = vld [vmem:[%s5656_s23 + $0x8] sm:$0xff]  }
 0x2e5   :  { %v3853_v40 = vpop.eup %3852  ;;  %v945_v4 = vunpack.c.l.bf16 %v3855_v7  ;;  %v946_v33 = vunpack.c.h.bf16 %v3855_v7 }
 0x2e6   :  { %2479 = vadd.xlane.f32.xlu0 %v2478_v55  ;;  %v916_v37 = vsel %vm590_vm1, %v886_v17, 0.0  ;;  %v894_v9 = vmul.f32 %v3853_v40, %v5284_v14  ;;  %v3856_v14 = vld [vmem:[%s5656_s23] sm:$0xff]   ;;  %v3667_v17 = vld [vmem:[%s5621_s12 + $0x8] sm:$0xff]  }
 0x2e7   :  { %v944_v26 = vunpack.c.h.bf16 %v3856_v14  ;;  %v943_v36 = vunpack.c.l.bf16 %v3856_v14  ;;  %3488 = vmatpush3.bf16.msra.mxu1 %v3667_v17 }
 0x2e8   :  { %2488 = vadd.xlane.f32.xlu1 %v2487_v20  ;;  %v940_v28 = vsel %vm590_vm1, %v894_v9, 0.0 }
 0x2ea   :  { %2497 = vadd.xlane.f32.xlu0 %v2496_v24 }
 0x2ec   :  { %2506 = vadd.xlane.f32.xlu1 %v2505_v12 }
 0x2ee   :  { %2491 = vadd.xlane.f32.xlu0 %v2490_v58 }
 0x2f0   :  { %2500 = vadd.xlane.f32.xlu1 %v2499_v45  ;;  %v3666_v45 = vld [vmem:[%s5622_s13 + $0x8] sm:$0xff]  }
 0x2f1   :  { %3480 = vmatpush3.bf16.msra.mxu0 %v3666_v45 }
 0x2f2   :  { %2509 = vadd.xlane.f32.xlu0 %v2508_v63  ;;  %3493 = vmatprep.subr.bf16.mxu0 %v4025_v56 }
 0x2f4   :  { %917 = vadd.xlane.f32.xlu1 %v916_v37  ;;  %v3858_v37 = vld [vmem:[%s5656_s23 + $0x28] sm:$0xff]  }
 0x2f6   :  { %2503 = vadd.xlane.f32.xlu0 %v2502_v49  ;;  %v953_v49 = vunpack.c.l.bf16 %v3858_v37 }
 0x2f9   :  { %v903_v44 = vpop.xlane.xlu1 %902 }
 0x2fa   :  { %941 = vadd.xlane.f32.xlu0 %v940_v28  ;;  %v961_v57 = vmul.f32 %v945_v4, %v903_v44  ;;  %v900_v42 = vpop.xlane.xlu0 %899  ;;  %v3859_v4 = vld [vmem:[%s5656_s23 + $0x10] sm:$0xff]  }
 0x2fb   :  { %v960_v43 = vmul.f32 %v944_v26, %v900_v42  ;;  %v947_v6 = vunpack.c.l.bf16 %v3859_v4 }
 0x2fc   :  { %v989_v1 = vsel %vm172_vm0, %v961_v57, 0.0 }
 0x2fd   :  { %v990_v35 = vrot.slane %v989_v1, 4  ;;  %v982_v25 = vsel %vm172_vm0, %v960_v43, 0.0  ;;  %v954_v43 = vunpack.c.h.bf16 %v3858_v37 }
 0x2fe   :  { %v983_v19 = vrot.slane %v982_v25, 4 }
 0x2ff   :  { %v991_v16 = vadd.f32 %v990_v35, %v989_v1  ;;  %v897_v52 = vpop.xlane.xlu1 %896 }
 0x300   :  { %v984_v48 = vadd.f32 %v983_v19, %v982_v25  ;;  %v959_v0 = vmul.f32 %v943_v36, %v897_v52 }
 0x301   :  { %v992_v2 = vrot.slane %v991_v16, 2 }
 0x302   :  { %v985_v41 = vrot.slane %v984_v48, 2  ;;  %v975_v3 = vsel %vm172_vm0, %v959_v0, 0.0 }
 0x303   :  { %v993_v38 = vadd.f32 %v992_v2, %v991_v16  ;;  %v976_v30 = vrot.slane %v975_v3, 4 }
 0x304   :  { %v986_v47 = vadd.f32 %v985_v41, %v984_v48 }
 0x305   :  { %v994_v61 = vrot.slane %v993_v38, 1  ;;  %v977_v29 = vadd.f32 %v976_v30, %v975_v3  ;;  %v948_v30 = vunpack.c.h.bf16 %v3859_v4 }
 0x306   :  { %v987_v10 = vrot.slane %v986_v47, 1 }
 0x307   :  { %v978_v15 = vrot.slane %v977_v29, 2  ;;  %v995_v34 = vadd.f32 %v994_v61, %v993_v38 }
 0x308   :  { %v988_v59 = vadd.f32 %v987_v10, %v986_v47 }
 0x309   :  { %v979_v8 = vadd.f32 %v978_v15, %v977_v29  ;;  %v906_v50 = vpop.xlane.xlu1 %905  ;;  %v1089_v31 = vmul.f32 0.25, %v995_v34 }
 0x30a   :  { %v1088_v46 = vmul.f32 0.25, %v988_v59  ;;  %v962_v11 = vmul.f32 %v946_v33, %v906_v50 }
 0x30b   :  { %v980_v60 = vrot.slane %v979_v8, 1  ;;  %v2737_v5 = vpack.c.bf16 %v1089_v31, %v1089_v31 }
 0x30c   :  { %v996_v27 = vsel %vm172_vm0, %v962_v11, 0.0  ;;  %v2736_v53 = vpack.c.bf16 %v1088_v46, %v1088_v46 }
 0x30d   :  { %v981_v54 = vadd.f32 %v980_v60, %v979_v8  ;;  %v997_v39 = vrot.slane %v996_v27, 4  ;;  %v915_v51 = vpop.xlane.xlu1 %914  ;;  %v2903_v58 = vunpack.c.l.b16 %v2737_v5  ;;  %v3860_v8 = vld [vmem:[%s5656_s23 + $0x20] sm:$0xff]  }
 0x30e   :  { %v2902_v21 = vunpack.c.l.b16 %v2736_v53  ;;  %v965_v18 = vmul.f32 %v949_v32, %v915_v51  ;;  %v952_v50 = vunpack.c.h.bf16 %v3860_v8  ;;  %v951_v53 = vunpack.c.l.bf16 %v3860_v8  ;;  %v5385_v51 = vld [vmem:[%s5656_s23 + $0x38] sm:$0xff]  }
 0x30f   :  { %v1087_v62 = vmul.f32 0.25, %v981_v54  ;;  %v998_v23 = vadd.f32 %v997_v39, %v996_v27 }
 0x310   :  { %v1017_v14 = vsel %vm172_vm0, %v965_v18, 0.0 }
 0x311   :  { %v2735_v55 = vpack.c.bf16 %v1087_v62, %v1087_v62  ;;  %v999_v20 = vrot.slane %v998_v23, 2  ;;  %v1018_v57 = vrot.slane %v1017_v14, 4 }
 0x313   :  { %v2901_v24 = vunpack.c.l.b16 %v2735_v55  ;;  %v1000_v12 = vadd.f32 %v999_v20, %v998_v23  ;;  %v1019_v48 = vadd.f32 %v1018_v57, %v1017_v14 }
 0x315   :  { %v2917_v63 = vsel %vm2807_vm2, %v2902_v21, %v2901_v24  ;;  %v1001_v40 = vrot.slane %v1000_v12, 1  ;;  %v1020_v61 = vrot.slane %v1019_v48, 2  ;;  %v957_v21 = vunpack.c.l.bf16 %v5385_v51 }
 0x316   :  { %v2918_v9 = vsel %vm2809_vm3, %v2903_v58, %v2917_v63  ;;  %v927_v7 = vpop.xlane.xlu0 %926 }
 0x317   :  { %v1002_v22 = vadd.f32 %v1001_v40, %v1000_v12  ;;  %v969_v28 = vmul.f32 %v953_v49, %v927_v7  ;;  %v1021_v46 = vadd.f32 %v1020_v61, %v1019_v48 }
 0x319   :  { %v1090_v26 = vmul.f32 0.25, %v1002_v22  ;;  %v909_v44 = vpop.xlane.xlu1 %908  ;;  %v1045_v36 = vsel %vm172_vm0, %v969_v28, 0.0  ;;  %v1022_v23 = vrot.slane %v1021_v46, 1 }
 0x31a   :  { %v963_v42 = vmul.f32 %v947_v6, %v909_v44  ;;  %v1046_v41 = vrot.slane %v1045_v36, 4 }
 0x31b   :  { %v2738_v1 = vpack.c.bf16 %v1090_v26, %v1090_v26  ;;  %v1023_v37 = vadd.f32 %v1022_v23, %v1021_v46 }
 0x31c   :  { %v1003_v35 = vsel %vm172_vm0, %v963_v42, 0.0  ;;  %v1047_v29 = vadd.f32 %v1046_v41, %v1045_v36 }
 0x31d   :  { %v2904_v25 = vunpack.c.l.b16 %v2738_v1  ;;  %v1004_v19 = vrot.slane %v1003_v35, 4 }
 0x31e   :  { %v930_v16 = vpop.xlane.xlu0 %929  ;;  %v1048_v31 = vrot.slane %v1047_v29, 2 }
 0x31f   :  { %v970_v52 = vmul.f32 %v954_v43, %v930_v16  ;;  %v2919_v2 = vsel %vm2811_vm4, %v2904_v25, %v2918_v9  ;;  %v1005_v0 = vadd.f32 %v1004_v19, %v1003_v35  ;;  %v1093_v43 = vmul.f32 0.25, %v1023_v37 }
 0x320   :  { %v1049_v24 = vadd.f32 %v1048_v31, %v1047_v29 }
 0x321   :  { %v1052_v38 = vsel %vm172_vm0, %v970_v52, 0.0  ;;  %v1006_v3 = vrot.slane %v1005_v0, 2 }
 0x322   :  { %v1053_v47 = vrot.slane %v1052_v38, 4  ;;  %v1050_v14 = vrot.slane %v1049_v24, 1 }
 0x323   :  { %v1007_v10 = vadd.f32 %v1006_v3, %v1005_v0 }
 0x324   :  { %v1054_v15 = vadd.f32 %v1053_v47, %v1052_v38  ;;  %v1051_v19 = vadd.f32 %v1050_v14, %v1049_v24 }
 0x325   :  { %v912_v33 = vpop.xlane.xlu1 %911  ;;  %v1008_v59 = vrot.slane %v1007_v10, 1 }
 0x326   :  { %v964_v34 = vmul.f32 %v948_v30, %v912_v33  ;;  %v1055_v39 = vrot.slane %v1054_v15, 2  ;;  %v3862_v30 = vld [vmem:[%s5656_s23 + $0x30] sm:$0xff]  }
 0x327   :  { %v1009_v11 = vadd.f32 %v1008_v59, %v1007_v10  ;;  %v955_v61 = vunpack.c.l.bf16 %v3862_v30  ;;  %v1097_v10 = vmul.f32 0.25, %v1051_v19 }
 0x328   :  { %v1010_v60 = vsel %vm172_vm0, %v964_v34, 0.0  ;;  %v1056_v17 = vadd.f32 %v1055_v39, %v1054_v15 }
 0x329   :  { %v1011_v27 = vrot.slane %v1010_v60, 4  ;;  %v1091_v54 = vmul.f32 0.25, %v1009_v11  ;;  %v924_v62 = vpop.xlane.xlu0 %923 }
 0x32a   :  { %v968_v5 = vmul.f32 %v952_v50, %v924_v62  ;;  %v1057_v44 = vrot.slane %v1056_v17, 1  ;;  %v956_v50 = vunpack.c.h.bf16 %v3862_v30 }
 0x32b   :  { %v1012_v32 = vadd.f32 %v1011_v27, %v1010_v60  ;;  %v2739_v55 = vpack.c.bf16 %v1091_v54, %v1091_v54  ;;  %v921_v20 = vpop.xlane.xlu1 %920 }
 0x32c   :  { %v1038_v18 = vsel %vm172_vm0, %v968_v5, 0.0  ;;  %v967_v58 = vmul.f32 %v951_v53, %v921_v20  ;;  %v1058_v48 = vadd.f32 %v1057_v44, %v1056_v17  ;;  %v2745_v53 = vpack.c.bf16 %v1097_v10, %v1097_v10  ;;  %v3864_v44 = vld [vmem:[%s5611_s2] sm:$0xff]  }
 0x32d   :  { %v1013_v12 = vrot.slane %v1012_v32, 2  ;;  %v2905_v45 = vunpack.c.l.b16 %v2739_v55  ;;  %v1039_v63 = vrot.slane %v1038_v18, 4  ;;  %v939_v40 = vpop.xlane.xlu0 %938  ;;  %v2511_v19 = vunpack.c.l.bf16 %v3864_v44 }
 0x32e   :  { %v1031_v9 = vsel %vm172_vm0, %v967_v58, 0.0  ;;  %v973_v7 = vmul.f32 %v957_v21, %v939_v40  ;;  %v1098_v33 = vmul.f32 0.25, %v1058_v48 }
 0x32f   :  { %v1014_v49 = vadd.f32 %v1013_v12, %v1012_v32  ;;  %v2920_v4 = vsel %vm2813_vm6, %v2905_v45, %v2919_v2  ;;  %v1040_v6 = vadd.f32 %v1039_v63, %v1038_v18  ;;  %v1032_v22 = vrot.slane %v1031_v9, 4 }
 0x330   :  { %v1073_v28 = vsel %vm172_vm0, %v973_v7, 0.0  ;;  %v2741_v2 = vpack.c.bf16 %v1093_v43, %v1093_v43  ;;  %v2746_v39 = vpack.c.bf16 %v1098_v33, %v1098_v33  ;;  %v2911_v12 = vunpack.c.l.b16 %v2745_v53 }
 0x331   :  { %v1015_v26 = vrot.slane %v1014_v49, 1  ;;  %v1041_v57 = vrot.slane %v1040_v6, 2  ;;  %v1033_v42 = vadd.f32 %v1032_v22, %v1031_v9  ;;  %v1074_v36 = vrot.slane %v1073_v28, 4 }
 0x332   :  { %v2907_v34 = vunpack.c.l.b16 %v2741_v2  ;;  %v2912_v58 = vunpack.c.l.b16 %v2746_v39 }
 0x333   :  { %v1016_v1 = vadd.f32 %v1015_v26, %v1014_v49  ;;  %v1042_v35 = vadd.f32 %v1041_v57, %v1040_v6  ;;  %v1034_v25 = vrot.slane %v1033_v42, 2  ;;  %v1075_v47 = vadd.f32 %v1074_v36, %v1073_v28 }
 0x334   :  { %v2512_v57 = vunpack.c.h.bf16 %v3864_v44 }
 0x335   :  { %v1092_v16 = vmul.f32 0.25, %v1016_v1  ;;  %v1043_v52 = vrot.slane %v1042_v35, 1  ;;  %v1035_v0 = vadd.f32 %v1034_v25, %v1033_v42  ;;  %v1076_v31 = vrot.slane %v1075_v47, 2 }
 0x337   :  { %v2740_v41 = vpack.c.bf16 %v1092_v16, %v1092_v16  ;;  %v1044_v38 = vadd.f32 %v1043_v52, %v1042_v35  ;;  %v1036_v3 = vrot.slane %v1035_v0, 1  ;;  %v1077_v20 = vadd.f32 %v1076_v31, %v1075_v47 }
 0x339   :  { %v2906_v29 = vunpack.c.l.b16 %v2740_v41  ;;  %v1096_v59 = vmul.f32 0.25, %v1044_v38  ;;  %v1037_v15 = vadd.f32 %v1036_v3, %v1035_v0  ;;  %v1078_v9 = vrot.slane %v1077_v20, 1  ;;  %v3865_v3 = vld [vmem:[%s5611_s2 + $0x18] sm:$0xff]  }
 0x33a   :  { %v2517_v47 = vunpack.c.l.bf16 %v3865_v3  ;;  %v2518_v33 = vunpack.c.h.bf16 %v3865_v3 }
 0x33b   :  { %v2921_v46 = vsel %vm2815_vm7, %v2906_v29, %v2920_v4  ;;  %v933_v8 = vpop.xlane.xlu0 %932  ;;  %v2744_v11 = vpack.c.bf16 %v1096_v59, %v1096_v59  ;;  %v1095_v60 = vmul.f32 0.25, %v1037_v15  ;;  %v3863_v4 = vld [vmem:[%s5611_s2 + $0x8] sm:$0xff]   ;;  %v1079_v35 = vadd.f32 %v1078_v9, %v1077_v20 }
 0x33c   :  { %v971_v27 = vmul.f32 %v955_v61, %v933_v8  ;;  %v5397_v54 = vsel %vm2817_vm8, %v2907_v34, %v2921_v46  ;;  %v2513_v6 = vunpack.c.l.bf16 %v3863_v4  ;;  %v2514_v22 = vunpack.c.h.bf16 %v3863_v4 }
 0x33d   :  { %v2910_v62 = vunpack.c.l.b16 %v2744_v11  ;;  %v2743_v23 = vpack.c.bf16 %v1095_v60, %v1095_v60  ;;  %v1101_v61 = vmul.f32 0.25, %v1079_v35  ;;  %v3866_v11 = vld [vmem:[%s5611_s2 + $0x10] sm:$0xff]  }
 0x33e   :  { %v1059_v32 = vsel %vm172_vm0, %v971_v27, 0.0  ;;  %v2515_v60 = vunpack.c.l.bf16 %v3866_v11 }
 0x33f   :  { %v1060_v5 = vrot.slane %v1059_v32, 4  ;;  %v936_v21 = vpop.xlane.xlu0 %935  ;;  %v2909_v55 = vunpack.c.l.b16 %v2743_v23  ;;  %v2749_v23 = vpack.c.bf16 %v1101_v61, %v1101_v61 }
 0x340   :  { %v972_v24 = vmul.f32 %v956_v50, %v936_v21 }
 0x341   :  { %v1061_v18 = vadd.f32 %v1060_v5, %v1059_v32  ;;  %v2924_v45 = vsel %vm2807_vm2, %v2910_v62, %v2909_v55  ;;  %v2420_v28 = vpop.xlane.xlu1 %2419  ;;  %v2516_v5 = vunpack.c.h.bf16 %v3866_v11  ;;  %v2915_v9 = vunpack.c.l.b16 %v2749_v23 }
 0x342   :  { %v1066_v17 = vsel %vm172_vm0, %v972_v24, 0.0  ;;  %v2925_v63 = vsel %vm2809_vm3, %v2911_v12, %v2924_v45  ;;  %v2544_v0 = vmul.f32 %v2512_v57, %v2420_v28 }
 0x343   :  { %v1062_v40 = vrot.slane %v1061_v18, 2  ;;  %v1067_v37 = vrot.slane %v1066_v17, 4  ;;  %v2423_v49 = vpop.xlane.xlu0 %2422  ;;  %v2926_v7 = vsel %vm2811_vm4, %v2912_v58, %v2925_v63  ;;  %v3867_v63 = vld [vmem:[%s5611_s2 + $0x28] sm:$0xff]  }
 0x344   :  { %v2545_v25 = vmul.f32 %v2513_v6, %v2423_v49  ;;  %v2576_v8 = vsel %vm172_vm0, %v2544_v0, 0.0  ;;  %v2522_v49 = vunpack.c.h.bf16 %v3867_v63 }
 0x345   :  { %v1063_v14 = vadd.f32 %v1062_v40, %v1061_v18  ;;  %v1068_v26 = vadd.f32 %v1067_v37, %v1066_v17  ;;  %v2521_v40 = vunpack.c.l.bf16 %v3867_v63 }
 0x346   :  { %v2584_v10 = vsel %vm172_vm0, %v2545_v25, 0.0 }
 0x347   :  { %v1064_v42 = vrot.slane %v1063_v14, 1  ;;  %v1069_v43 = vrot.slane %v1068_v26, 2  ;;  %v2426_v1 = vpop.xlane.xlu0 %2425 }
 0x348   :  { %v2546_v36 = vmul.f32 %v2514_v22, %v2426_v1  ;;  %v3868_v1 = vld [vmem:[%s5611_s2 + $0x20] sm:$0xff]  }
 0x349   :  { %v1065_v16 = vadd.f32 %v1064_v42, %v1063_v14  ;;  %v1070_v48 = vadd.f32 %v1069_v43, %v1068_v26  ;;  %v2435_v52 = vpop.xlane.xlu1 %2434  ;;  %v2520_v35 = vunpack.c.h.bf16 %v3868_v1 }
 0x34a   :  { %v2585_v2 = vsel %vm172_vm0, %v2546_v36, 0.0  ;;  %v2549_v53 = vmul.f32 %v2517_v47, %v2435_v52 }
 0x34b   :  { %v1099_v41 = vmul.f32 0.25, %v1065_v16  ;;  %v1071_v38 = vrot.slane %v1070_v48, 1  ;;  %v2417_v30 = vpop.xlane.xlu0 %2416  ;;  %v2586_v34 = vadd.f32 %v2585_v2, %v2584_v10  ;;  %v2519_v2 = vunpack.c.l.bf16 %v3868_v1 }
 0x34c   :  { %v2543_v29 = vmul.f32 %v2511_v19, %v2417_v30  ;;  %v2602_v17 = vsel %vm172_vm0, %v2549_v53, 0.0 }
 0x34d   :  { %v2747_v59 = vpack.c.bf16 %v1099_v41, %v1099_v41  ;;  %v1072_v15 = vadd.f32 %v1071_v38, %v1070_v48  ;;  %v2429_v46 = vpop.xlane.xlu1 %2428  ;;  %v2587_v20 = vrot.slane %v2586_v34, 4 }
 0x34e   :  { %v2575_v50 = vsel %vm172_vm0, %v2543_v29, 0.0  ;;  %v2547_v18 = vmul.f32 %v2515_v60, %v2429_v46  ;;  %v3869_v46 = vld [vmem:[%s5611_s2 + $0x38] sm:$0xff]  }
 0x34f   :  { %v2913_v31 = vunpack.c.l.b16 %v2747_v59  ;;  %v1100_v27 = vmul.f32 0.25, %v1072_v15  ;;  %v2577_v39 = vadd.f32 %v2576_v8, %v2575_v50  ;;  %v2438_v62 = vpop.xlane.xlu0 %2437  ;;  %v2588_v14 = vadd.f32 %v2587_v20, %v2586_v34  ;;  %v3870_v50 = vld [vmem:[%s5611_s2 + $0x30] sm:$0xff]   ;;  %v3872_v20 = vld [vmem:[%s5611_s2 + $0x40] sm:$0xff]  }
 0x350   :  { %v2550_v32 = vmul.f32 %v2518_v33, %v2438_v62  ;;  %v2593_v28 = vsel %vm172_vm0, %v2547_v18, 0.0  ;;  %v2525_v8 = vunpack.c.l.bf16 %v3869_v46  ;;  %v2523_v11 = vunpack.c.l.bf16 %v3870_v50  ;;  %v3871_v62 = vld [vmem:[%s5611_s2 + $0x48] sm:$0xff]  }
 0x351   :  { %v2927_v21 = vsel %vm2813_vm6, %v2913_v31, %v2926_v7  ;;  %v2748_v55 = vpack.c.bf16 %v1100_v27, %v1100_v27  ;;  %v2578_v24 = vrot.slane %v2577_v39, 4  ;;  %v2447_v12 = vpop.xlane.xlu1 %2446  ;;  %v2589_v48 = vrot.slane %v2588_v14, 2 }
 0x352   :  { %v2603_v58 = vsel %vm172_vm0, %v2550_v32, 0.0  ;;  %v2553_v19 = vmul.f32 %v2521_v40, %v2447_v12  ;;  %v2526_v60 = vunpack.c.h.bf16 %v3869_v46  ;;  %v2529_v23 = vunpack.c.l.bf16 %v3871_v62 }
 0x353   :  { %v2914_v45 = vunpack.c.l.b16 %v2748_v55  ;;  %v2432_v37 = vpop.xlane.xlu0 %2431  ;;  %v2579_v4 = vadd.f32 %v2578_v24, %v2577_v39  ;;  %v2604_v7 = vadd.f32 %v2603_v58, %v2602_v17  ;;  %v2590_v29 = vadd.f32 %v2589_v48, %v2588_v14 }
 0x354   :  { %v2548_v6 = vmul.f32 %v2516_v5, %v2432_v37  ;;  %v2620_v61 = vsel %vm172_vm0, %v2553_v19, 0.0  ;;  %v2524_v55 = vunpack.c.h.bf16 %v3870_v50  ;;  %v2527_v24 = vunpack.c.l.bf16 %v3872_v20 }
 0x355   :  { %v2928_v22 = vsel %vm2815_vm7, %v2914_v45, %v2927_v21  ;;  %v2441_v26 = vpop.xlane.xlu1 %2440  ;;  %v2580_v25 = vrot.slane %v2579_v4, 2  ;;  %v2605_v36 = vrot.slane %v2604_v7, 4  ;;  %v2591_v32 = vrot.slane %v2590_v29, 1  ;;  %v5456_v45 = vld [vmem:[%s5611_s2 + $0x58] sm:$0xff]  }
 0x356   :  { %v2594_v44 = vsel %vm172_vm0, %v2548_v6, 0.0  ;;  %v5430_v57 = vsel %vm2817_vm8, %v2915_v9, %v2928_v22  ;;  %v2551_v34 = vmul.f32 %v2519_v2, %v2441_v26  ;;  %v2530_v58 = vunpack.c.h.bf16 %v3871_v62  ;;  %v5469_v22 = vld [vmem:[%s5611_s2 + $0x68] sm:$0xff]  }
 0x357   :  { %v2595_v42 = vadd.f32 %v2594_v44, %v2593_v28  ;;  %v2450_v43 = vpop.xlane.xlu0 %2449  ;;  %v2581_v47 = vadd.f32 %v2580_v25, %v2579_v4  ;;  %v2606_v30 = vadd.f32 %v2605_v36, %v2604_v7  ;;  %v2533_v17 = vunpack.c.l.bf16 %v5456_v45 }
 0x358   :  { %v2554_v16 = vmul.f32 %v2522_v49, %v2450_v43  ;;  %v2611_v18 = vsel %vm172_vm0, %v2551_v34, 0.0  ;;  %v2528_v37 = vunpack.c.h.bf16 %v3872_v20  ;;  %v5462_v49 = vld [vmem:[%s5611_s2 + $0x50] sm:$0xff]   ;;  %v2534_v4 = vunpack.c.h.bf16 %v5456_v45  ;;  %v5476_v43 = vld [vmem:[%s5611_s2 + $0x60] sm:$0xff]  }
 0x359   :  { %v2596_v52 = vrot.slane %v2595_v42, 4  ;;  %v5435_v0 = vpop.xlane.xlu1 %2458  ;;  %v2582_v27 = vrot.slane %v2581_v47, 1  ;;  %v2607_v53 = vrot.slane %v2606_v30, 2  ;;  %v2531_v9 = vunpack.c.l.bf16 %v5462_v49 }
 0x35a   :  { %v2621_v41 = vsel %vm172_vm0, %v2554_v16, 0.0  ;;  %v2537_v14 = vunpack.c.l.bf16 %v5469_v22  ;;  %v2532_v26 = vunpack.c.h.bf16 %v5462_v49  ;;  %v2592_v28 = vadd.f32 %v2591_v32, %v2590_v29  ;;  %v5483_v16 = vld [vmem:[%s5611_s2 + $0x78] sm:$0xff]  }
 0x35b   :  { %v2597_v38 = vadd.f32 %v2596_v52, %v2595_v42  ;;  %v2444_v3 = vpop.xlane.xlu0 %2443  ;;  %v2622_v33 = vadd.f32 %v2621_v41, %v2620_v61  ;;  %v2583_v7 = vadd.f32 %v2582_v27, %v2581_v47  ;;  %v2608_v6 = vadd.f32 %v2607_v53, %v2606_v30 }
 0x35c   :  { %v2552_v10 = vmul.f32 %v2520_v35, %v2444_v3  ;;  %v2535_v1 = vunpack.c.l.bf16 %v5476_v43  ;;  %v2538_v35 = vunpack.c.h.bf16 %v5469_v22  ;;  %v2541_v48 = vunpack.c.l.bf16 %v5483_v16 }
 0x35d   :  { %v2453_v59 = vpop.xlane.xlu1 %2452  ;;  %v2598_v15 = vrot.slane %v2597_v38, 2  ;;  %v2623_v5 = vrot.slane %v2622_v33, 4  ;;  %v2536_v41 = vunpack.c.h.bf16 %v5476_v43  ;;  %v2542_v47 = vunpack.c.h.bf16 %v5483_v16 }
 0x35e   :  { %v2612_v39 = vsel %vm172_vm0, %v2552_v10, 0.0  ;;  %v2719_v30 = vmul.f32 0.25, %v2583_v7  ;;  %v2609_v61 = vrot.slane %v2608_v6, 1  ;;  %v2557_v10 = vmul.f32 %v2525_v8, %v5435_v0 }
 0x35f   :  { %v2462_v31 = vpop.xlane.xlu0 %2461  ;;  %v2599_v12 = vadd.f32 %v2598_v15, %v2597_v38  ;;  %v2613_v63 = vadd.f32 %v2612_v39, %v2611_v18  ;;  %v2624_v44 = vadd.f32 %v2623_v5, %v2622_v33  ;;  %v5490_v38 = vld [vmem:[%s5611_s2 + $0x70] sm:$0xff]   ;;  %v2720_v33 = vmul.f32 0.25, %v2592_v28 }
 0x360   :  { %v2558_v36 = vmul.f32 %v2526_v60, %v2462_v31  ;;  %v2539_v3 = vunpack.c.l.bf16 %v5490_v38  ;;  %v2555_v34 = vmul.f32 %v2523_v11, %v2453_v59  ;;  %v950_v5 = vunpack.c.h.bf16 %v5351_v13 }
 0x361   :  { %v2471_v21 = vpop.xlane.xlu1 %2470  ;;  %v2600_v25 = vrot.slane %v2599_v12, 1  ;;  %v2614_v52 = vrot.slane %v2613_v63, 4  ;;  %v2625_v15 = vrot.slane %v2624_v44, 2  ;;  %v2755_v0 = vpack.c.bf16 %v2719_v30, %v2719_v30 }
 0x362   :  { %v2561_v19 = vmul.f32 %v2529_v23, %v2471_v21  ;;  %v2639_v31 = vsel %vm172_vm0, %v2558_v36, 0.0  ;;  %v2610_v8 = vadd.f32 %v2609_v61, %v2608_v6  ;;  %v2638_v21 = vsel %vm172_vm0, %v2557_v10, 0.0 }
 0x363   :  { %v2456_v40 = vpop.xlane.xlu0 %2455  ;;  %v2601_v60 = vadd.f32 %v2600_v25, %v2599_v12  ;;  %v2615_v39 = vadd.f32 %v2614_v52, %v2613_v63  ;;  %v2540_v59 = vunpack.c.h.bf16 %v5490_v38  ;;  %v2626_v11 = vadd.f32 %v2625_v15, %v2624_v44 }
 0x364   :  { %v2556_v46 = vmul.f32 %v2524_v55, %v2456_v40  ;;  %v2656_v27 = vsel %vm172_vm0, %v2561_v19, 0.0  ;;  %v2640_v55 = vadd.f32 %v2639_v31, %v2638_v21  ;;  %v2722_v25 = vmul.f32 0.25, %v2610_v8 }
 0x365   :  { %v2465_v42 = vpop.xlane.xlu1 %2464  ;;  %v2721_v45 = vmul.f32 0.25, %v2601_v60  ;;  %v2616_v40 = vrot.slane %v2615_v39, 2  ;;  %v2791_v52 = vunpack.c.l.b16 %v2755_v0  ;;  %v958_v61 = vunpack.c.h.bf16 %v5385_v51 }
 0x366   :  { %v2559_v62 = vmul.f32 %v2527_v24, %v2465_v42  ;;  %v2630_v20 = vsel %vm172_vm0, %v2556_v46, 0.0  ;;  %v2629_v24 = vsel %vm172_vm0, %v2555_v34, 0.0  ;;  %v2758_v31 = vpack.c.bf16 %v2722_v25, %v2722_v25 }
 0x367   :  { %v2474_v2 = vpop.xlane.xlu0 %2473  ;;  %v2631_v36 = vadd.f32 %v2630_v20, %v2629_v24  ;;  %v2757_v10 = vpack.c.bf16 %v2721_v45, %v2721_v45  ;;  %v2617_v15 = vadd.f32 %v2616_v40, %v2615_v39 }
 0x368   :  { %v2562_v29 = vmul.f32 %v2530_v58, %v2474_v2  ;;  %v2756_v58 = vpack.c.bf16 %v2720_v33, %v2720_v33  ;;  %v2647_v7 = vsel %vm172_vm0, %v2559_v62, 0.0  ;;  %v2627_v2 = vrot.slane %v2626_v11, 1 }
 0x369   :  { %v2483_v50 = vpop.xlane.xlu1 %2482  ;;  %v2793_v39 = vunpack.c.l.b16 %v2757_v10 }
 0x36a   :  { %v2657_v53 = vsel %vm172_vm0, %v2562_v29, 0.0  ;;  %v2565_v63 = vmul.f32 %v2533_v17, %v2483_v50  ;;  %v2628_v62 = vadd.f32 %v2627_v2, %v2626_v11 }
 0x36b   :  { %v2658_v23 = vadd.f32 %v2657_v53, %v2656_v27  ;;  %v2468_v32 = vpop.xlane.xlu0 %2467  ;;  %v2632_v27 = vrot.slane %v2631_v36, 4 }
 0x36c   :  { %v2560_v12 = vmul.f32 %v2528_v37, %v2468_v32  ;;  %v2641_v37 = vrot.slane %v2640_v55, 4  ;;  %v2674_v17 = vsel %vm172_vm0, %v2565_v63, 0.0  ;;  %v5521_v40 = vmul.f32 0.25, %v2628_v62 }
 0x36d   :  { %v2477_v18 = vpop.xlane.xlu1 %2476  ;;  %v2659_v28 = vrot.slane %v2658_v23, 4 }
 0x36e   :  { %v2648_v6 = vsel %vm172_vm0, %v2560_v12, 0.0  ;;  %v2563_v46 = vmul.f32 %v2531_v9, %v2477_v18  ;;  %v2642_v32 = vadd.f32 %v2641_v37, %v2640_v55  ;;  %v2618_v12 = vrot.slane %v2617_v15, 1 }
 0x36f   :  { %v2486_v42 = vpop.xlane.xlu0 %2485  ;;  %v2649_v44 = vadd.f32 %v2648_v6, %v2647_v7  ;;  %v2660_v34 = vadd.f32 %v2659_v28, %v2658_v23  ;;  %v2633_v55 = vadd.f32 %v2632_v27, %v2631_v36 }
 0x370   :  { %v2566_v19 = vmul.f32 %v2534_v4, %v2486_v42  ;;  %v2792_v4 = vunpack.c.l.b16 %v2756_v58  ;;  %v2665_v58 = vsel %vm172_vm0, %v2563_v46, 0.0  ;;  %v2643_v7 = vrot.slane %v2642_v32, 2 }
 0x371   :  { %v2495_v30 = vpop.xlane.xlu1 %2494  ;;  %v2650_v29 = vrot.slane %v2649_v44, 4  ;;  %v2661_v18 = vrot.slane %v2660_v34, 2  ;;  %v2619_v22 = vadd.f32 %v2618_v12, %v2617_v15  ;;  %v2634_v2 = vrot.slane %v2633_v55, 2 }
 0x372   :  { %v2675_v33 = vsel %vm172_vm0, %v2566_v19, 0.0  ;;  %v2808_v20 = vsel %vm2807_vm2, %v2792_v4, %v2791_v52  ;;  %v2569_v9 = vmul.f32 %v2537_v14, %v2495_v30 }
 0x373   :  { %v2676_v50 = vadd.f32 %v2675_v33, %v2674_v17  ;;  %v2480_v60 = vpop.xlane.xlu0 %2479  ;;  %v2651_v53 = vadd.f32 %v2650_v29, %v2649_v44  ;;  %v5528_v44 = vsel %vm2809_vm3, %v2793_v39, %v2808_v20  ;;  %v2760_v17 = vpack.c.bf16 %v5521_v40, %v5521_v40 }
 0x374   :  { %v2564_v8 = vmul.f32 %v2532_v26, %v2480_v60  ;;  %v5519_v26 = vunpack.c.l.b16 %v2758_v31  ;;  %v2692_v6 = vsel %vm172_vm0, %v2569_v9, 0.0  ;;  %v5540_v4 = vmul.f32 0.25, %v2619_v22 }
 0x375   :  { %v2677_v0 = vrot.slane %v2676_v50, 4  ;;  %v2489_v21 = vpop.xlane.xlu1 %2488  ;;  %v2652_v23 = vrot.slane %v2651_v53, 2 }
 0x376   :  { %v2666_v45 = vsel %vm172_vm0, %v2564_v8, 0.0  ;;  %v2567_v25 = vmul.f32 %v2535_v1, %v2489_v21 }
 0x377   :  { %v2498_v11 = vpop.xlane.xlu0 %2497  ;;  %v2678_v24 = vadd.f32 %v2677_v0, %v2676_v50  ;;  %v2667_v63 = vadd.f32 %v2666_v45, %v2665_v58  ;;  %v2653_v28 = vadd.f32 %v2652_v23, %v2651_v53  ;;  %v5536_v50 = vadd.f32 %v2643_v7, %v2642_v32 }
 0x378   :  { %v2570_v49 = vmul.f32 %v2538_v35, %v2498_v11  ;;  %v2662_v35 = vadd.f32 %v2661_v18, %v2660_v34  ;;  %v2683_v34 = vsel %vm172_vm0, %v2567_v25, 0.0  ;;  %v2635_v53 = vadd.f32 %v2634_v2, %v2633_v55 }
 0x379   :  { %v2507_v14 = vpop.xlane.xlu1 %2506  ;;  %v2668_v42 = vrot.slane %v2667_v63, 4  ;;  %v2679_v37 = vrot.slane %v2678_v24, 2  ;;  %v2654_v29 = vrot.slane %v2653_v28, 1  ;;  %v2645_v58 = vrot.slane %v5536_v50, 1 }
 0x37a   :  { %v2693_v36 = vsel %vm172_vm0, %v2570_v49, 0.0  ;;  %v2573_v33 = vmul.f32 %v2541_v48, %v2507_v14  ;;  %v2663_v43 = vrot.slane %v2662_v35, 1  ;;  %v2636_v7 = vrot.slane %v2635_v53, 1 }
 0x37b   :  { %v2694_v19 = vadd.f32 %v2693_v36, %v2692_v6  ;;  %v2492_v52 = vpop.xlane.xlu0 %2491  ;;  %v2669_v30 = vadd.f32 %v2668_v42, %v2667_v63  ;;  %v2680_v62 = vadd.f32 %v2679_v37, %v2678_v24  ;;  %v2655_v8 = vadd.f32 %v2654_v29, %v2653_v28 }
 0x37c   :  { %v2568_v10 = vmul.f32 %v2536_v41, %v2492_v52  ;;  %v2710_v21 = vsel %vm172_vm0, %v2573_v33, 0.0  ;;  %v2664_v45 = vadd.f32 %v2663_v43, %v2662_v35 }
 0x37d   :  { %v2695_v1 = vrot.slane %v2694_v19, 4  ;;  %v2501_v46 = vpop.xlane.xlu1 %2500  ;;  %v2670_v15 = vrot.slane %v2669_v30, 2  ;;  %v2681_v55 = vrot.slane %v2680_v62, 1  ;;  %v2727_v6 = vmul.f32 0.25, %v2655_v8 }
 0x37e   :  { %v2684_v60 = vsel %vm172_vm0, %v2568_v10, 0.0  ;;  %v2571_v9 = vmul.f32 %v2539_v3, %v2501_v46  ;;  %v2728_v52 = vmul.f32 0.25, %v2664_v45 }
 0x37f   :  { %v2696_v41 = vadd.f32 %v2695_v1, %v2694_v19  ;;  %v2685_v31 = vadd.f32 %v2684_v60, %v2683_v34  ;;  %v2510_v27 = vpop.xlane.xlu0 %2509  ;;  %v2671_v0 = vadd.f32 %v2670_v15, %v2669_v30  ;;  %v2682_v2 = vadd.f32 %v2681_v55, %v2680_v62 }
 0x380   :  { %v2574_v48 = vmul.f32 %v2542_v47, %v2510_v27  ;;  %v2701_v13 = vsel %vm172_vm0, %v2571_v9, 0.0  ;;  %v2637_v1 = vadd.f32 %v2636_v7, %v2635_v53  ;;  %v2763_v33 = vpack.c.bf16 %v2727_v6, %v2727_v6 }
 0x381   :  { %v2697_v32 = vrot.slane %v2696_v41, 2  ;;  %v2686_v20 = vrot.slane %v2685_v31, 4  ;;  %v918_v39 = vpop.xlane.xlu1 %917  ;;  %v2672_v23 = vrot.slane %v2671_v0, 1  ;;  %v2764_v27 = vpack.c.bf16 %v2728_v52, %v2728_v52 }
 0x382   :  { %v2711_v12 = vsel %vm172_vm0, %v2574_v48, 0.0  ;;  %v966_v18 = vmul.f32 %v950_v5, %v918_v39  ;;  %v2646_v39 = vadd.f32 %v2645_v58, %v5536_v50 }
 0x383   :  { %v2687_v16 = vadd.f32 %v2686_v20, %v2685_v31  ;;  %v2712_v47 = vadd.f32 %v2711_v12, %v2710_v21  ;;  %v2504_v11 = vpop.xlane.xlu0 %2503  ;;  %v2673_v24 = vadd.f32 %v2672_v23, %v2671_v0  ;;  %v2698_v3 = vadd.f32 %v2697_v32, %v2696_v41 }
 0x384   :  { %v1024_v63 = vsel %vm172_vm0, %v966_v18, 0.0  ;;  %v2572_v49 = vmul.f32 %v2540_v59, %v2504_v11  ;;  %v2759_v31 = vpack.c.bf16 %v5540_v4, %v5540_v4  ;;  %v2725_v32 = vmul.f32 0.25, %v2637_v1 }
 0x385   :  { %v2688_v28 = vrot.slane %v2687_v16, 2  ;;  %v2713_v14 = vrot.slane %v2712_v47, 4  ;;  %v1025_v5 = vrot.slane %v1024_v63, 4  ;;  %v2729_v25 = vmul.f32 0.25, %v2673_v24 }
 0x386   :  { %v2702_v42 = vsel %vm172_vm0, %v2572_v49, 0.0  ;;  %v2699_v59 = vrot.slane %v2698_v3, 1  ;;  %v2799_v23 = vunpack.c.l.b16 %v2763_v33  ;;  %v2800_v11 = vunpack.c.l.b16 %v2764_v27 }
 0x387   :  { %v2689_v36 = vadd.f32 %v2688_v28, %v2687_v16  ;;  %v2714_v22 = vadd.f32 %v2713_v14, %v2712_v47  ;;  %v2703_v35 = vadd.f32 %v2702_v42, %v2701_v13  ;;  %v942_v19 = vpop.xlane.xlu0 %941  ;;  %v1026_v37 = vadd.f32 %v1025_v5, %v1024_v63 }
 0x388   :  { %v974_v38 = vmul.f32 %v958_v61, %v942_v19  ;;  %v2765_v34 = vpack.c.bf16 %v2729_v25, %v2729_v25  ;;  %v2730_v61 = vmul.f32 0.25, %v2682_v2  ;;  %v2700_v0 = vadd.f32 %v2699_v59, %v2698_v3 }
 0x389   :  { %v2690_v30 = vrot.slane %v2689_v36, 1  ;;  %v2715_v10 = vrot.slane %v2714_v22, 2  ;;  %v2704_v29 = vrot.slane %v2703_v35, 4  ;;  %v1027_v46 = vrot.slane %v1026_v37, 2 }
 0x38a   :  { %v1080_v15 = vsel %vm172_vm0, %v974_v38, 0.0  ;;  %v2801_v9 = vunpack.c.l.b16 %v2765_v34  ;;  %v2795_v47 = vunpack.c.l.b16 %v2759_v31  ;;  %v2766_v55 = vpack.c.bf16 %v2730_v61, %v2730_v61 }
 0x38b   :  { %v2691_v60 = vadd.f32 %v2690_v30, %v2689_v36  ;;  %v2716_v43 = vadd.f32 %v2715_v10, %v2714_v22  ;;  %v2705_v41 = vadd.f32 %v2704_v29, %v2703_v35  ;;  %v1028_v62 = vadd.f32 %v1027_v46, %v1026_v37 }
 0x38c   :  { %v1081_v51 = vrot.slane %v1080_v15, 4  ;;  %v2732_v24 = vmul.f32 0.25, %v2700_v0  ;;  %v2761_v63 = vpack.c.bf16 %v2725_v32, %v2725_v32  ;;  %v2812_v28 = vsel %vm2811_vm4, %v5519_v26, %v5528_v44 }
 0x38d   :  { %v2731_v48 = vmul.f32 0.25, %v2691_v60  ;;  %v2717_v8 = vrot.slane %v2716_v43, 1  ;;  %v1029_v53 = vrot.slane %v1028_v62, 1  ;;  %v2706_v21 = vrot.slane %v2705_v41, 2 }
 0x38e   :  { %v1082_v20 = vadd.f32 %v1081_v51, %v1080_v15  ;;  %v2726_v50 = vmul.f32 0.25, %v2646_v39  ;;  %v2821_v58 = vsel %vm2807_vm2, %v2800_v11, %v2799_v23  ;;  %v2814_v25 = vsel %vm2813_vm6, %v2795_v47, %v2812_v28  ;;  %v3178_v11 = vld [vmem:[%s5625_s16] ss:$0 sm:$0xff] }
 0x38f   :  { %v2718_v12 = vadd.f32 %v2717_v8, %v2716_v43  ;;  %v2767_v18 = vpack.c.bf16 %v2731_v48, %v2731_v48  ;;  %v1030_v45 = vadd.f32 %v1029_v53, %v1028_v62  ;;  %v2707_v16 = vadd.f32 %v2706_v21, %v2705_v41  ;;  %v3668_v48 = vld [vmem:[%s5624_s15] sm:$0xff]  }
 0x390   :  { %v1083_v4 = vrot.slane %v1082_v20, 2  ;;  %v2822_v6 = vsel %vm2809_vm3, %v2801_v9, %v2821_v58  ;;  %v2802_v36 = vunpack.c.l.b16 %v2766_v55  ;;  %v2768_v22 = vpack.c.bf16 %v2732_v24, %v2732_v24  ;;  %v3177_v53 = vld [vmem:[%s5623_s14] ss:$0 sm:$0xff]  ;;  %s4027_s14 = smov [#allocation8]  }
 0x391   :  { %v1094_v49 = vmul.f32 0.25, %v1030_v45  ;;  %v2708_v7 = vrot.slane %v2707_v16, 1  ;;  %v2734_v14 = vmul.f32 0.25, %v2718_v12  ;;  %v2803_v13 = vunpack.c.l.b16 %v2767_v18  ;;  %s3074_s6 = sshll.u32 %s4027_s14, 4  ;;  %s3075_s6 = int_to_ptr.vmem [resolvable:$true] %s3074_s6 }
 0x392   :  { %v1084_v3 = vadd.f32 %v1083_v4, %v1082_v20  ;;  %v2797_v35 = vunpack.c.l.b16 %v2761_v63  ;;  %v2796_v26 = vunpack.c.l.b16 %v2760_v17  ;;  %v2762_v44 = vpack.c.bf16 %v2726_v50, %v2726_v50  ;;  %s3993_s3 = scalar_lea.vmem %s3075_s6, 256  ;;  %p3998_p11 = scmp.lt.s32.totalorder %s3075_s6, %s3075_s6 }
 0x393   :  { %v2709_v5 = vadd.f32 %v2708_v7, %v2707_v16  ;;  %v2742_v19 = vpack.c.bf16 %v1094_v49, %v1094_v49  ;;  %v2823_v37 = vsel %vm2811_vm4, %v2802_v36, %v2822_v6  ;;  %v2770_v38 = vpack.c.bf16 %v2734_v14, %v2734_v14  ;;  %p3994_p10 = scmp.ne.s32.totalorder %s3075_s6, %s3993_s3  ;;  %p3999_p12 = scmp.lt.s32.totalorder %s3993_s3, %s3993_s3 }
 0x394   :  { %v1085_v42 = vrot.slane %v1084_v3, 1  ;;  %v2824_v59 = vsel %vm2813_vm6, %v2803_v13, %v2823_v37  ;;  %v2816_v29 = vsel %vm2815_vm7, %v2796_v26, %v2814_v25  ;;  %v2804_v1 = vunpack.c.l.b16 %v2768_v22 }
 0x395   :  { %v2733_v52 = vmul.f32 0.25, %v2709_v5  ;;  %v2818_v33 = vsel %vm2817_vm8, %v2797_v35, %v2816_v29  ;;  %v2908_v46 = vunpack.c.l.b16 %v2742_v19  ;;  %v2798_v60 = vunpack.c.l.b16 %v2762_v44  ;;  %p4000_p13 = por %p3999_p12, %p3998_p11 }
 0x396   :  { %v1086_v2 = vadd.f32 %v1085_v42, %v1084_v3  ;;  %v2806_v40 = vunpack.c.l.b16 %v2770_v38  ;;  %v2825_v17 = vsel %vm2815_vm7, %v2804_v1, %v2824_v59 }
 0x397   :  { %v2769_v30 = vpack.c.bf16 %v2733_v52, %v2733_v52  ;;  %v2820_v27 = vsel %vm2819_vm9, %v2798_v60, %v2818_v33  ;;  %v2923_v62 = vsel %vm2819_vm9, %v2908_v46, %v5397_v54  ;;  %v3669_v54 = vld [vmem:[%s5624_s15 + $0x8] sm:$0xff]   ;;  %p4001_p0 = pnand %p4000_p13, %p3994_p10 }
 0x398   :  { %v1102_v10 = vmul.f32 0.25, %v1086_v2 }
 0x399   :  { %v2805_v15 = vunpack.c.l.b16 %v2769_v30 }
 0x39a   :  { %v2750_v34 = vpack.c.bf16 %v1102_v10, %v1102_v10 }
 0x39b   :  { %v2826_v43 = vsel %vm2817_vm8, %v2805_v15, %v2825_v17 }
 0x39c   :  { %v2916_v41 = vunpack.c.l.b16 %v2750_v34  ;;  %v2827_v31 = vsel %vm2819_vm9, %v2806_v40, %v2826_v43 }
 0x39d   :  { %v2828_v61 = vpack.c.b16 %v2827_v31, %v2820_v27 }
 0x39e   :  { %v2930_v51 = vsel %vm2819_vm9, %v2916_v41, %v5430_v57 }
 0x39f   :  { %v2931_v0 = vpack.c.b16 %v2930_v51, %v2923_v62  ;;  %3482 = vmatmul.mubr.msk.bf16.vlgmr.msra.gmra.mrb[48].mxu0 %vm172_vm0, %v2828_v61 }
 0x3a0   :  { %3497 = vmatprep.mubr.msk.bf16.mxu0 %vm4026_vm5, %v4025_v56  ;;  %3494 = vmatpush3.bf16.msra.mxu0 %v3668_v48 }
 0x3a1   :  { %3490 = vmatmul.mubr.msk.bf16.vlgmr.msra.gmra.mrb[48].mxu1 %vm172_vm0, %v2931_v0  ;;  %3495 = vmatprep.subr.bf16.mxu0 %v4025_v56 }
 0x3a4   :  { %3496 = vmatpush3.bf16.msra.mxu0 %v3669_v54 }
 0x472   :  { %v2878_v57 = vpop.f32.mrb[48].mxu0 }
 0x473   :  { %v3483_v8 = vpop.f32.mrb[49].mxu0 }
 0x474   :  { %v2981_v32 = vpop.f32.mrb[48].mxu1  ;;  %v2881_v20 = vpop.f32.mrb[50].mxu0 }
 0x475   :  { %v2982_v21 = vadd.f32 %v2981_v32, %v2878_v57  ;;  %v3491_v39 = vpop.f32.mrb[49].mxu1  ;;  %v3484_v23 = vpop.f32.mrb[51].mxu0 }
 0x476   :  { %v2984_v9 = vpop.f32.mrb[50].mxu1 }
 0x477   :  { %v2995_v12 = vadd.f32 %v3177_v53, %v2982_v21  ;;  %v2985_v18 = vadd.f32 %v2984_v9, %v2881_v20  ;;  %v3492_v45 = vpop.f32.mrb[51].mxu1 }
 0x479   :  { %v2996_v16 = vadd.f32 %v3177_v53, %v2985_v18  ;;  %v2997_v4 = vmax.f32 %v2995_v12, 0.0 }
 0x47b   :  { %v2998_v47 = vmax.f32 %v2996_v16, 0.0 }
 0x47d   :  { %v2999_v56 = vpack.c.bf16 %v2998_v47, %v2997_v4 }
 0x47f   :  { %3498 = vmatmul.mubr.msk.bf16.vlgmr.msra.gmra.mrb[52].mxu0 %vm172_vm0, %v2999_v56 }
 0x552   :  { %v3060_v55 = vpop.f32.mrb[52].mxu0 }
 0x553   :  { %v3061_v24 = vadd.f32 %v3178_v11, %v3060_v55  ;;  %v3499_v63 = vpop.f32.mrb[53].mxu0 }
 0x554   :  { %v3063_v49 = vpop.f32.mrb[54].mxu0 }
 0x555   :  { %3067 = vst [vmem:[#allocation8] sm:$0xff] %v3061_v24  ;;  %v3064_v7 = vadd.f32 %v3178_v11, %v3063_v49  ;;  %v3500_v3 = vpop.f32.mrb[55].mxu0 }
 0x557   :  { %3068 = vst [vmem:[#allocation8 + $0x8] sm:$0xff] %v3064_v7 }
 0x558   :  { %4004 = shalt.err (!%p4001_p0)
}
 0x559   :  { %s4005_s24 = scalar_lea.hbm %s5626_s17, 256 }
 0x55a   :  { %p4006_p1 = scmp.ne.s32.totalorder %s5626_s17, %s4005_s24  ;;  %p4009_p2 = scmp.lt.u32.totalorder %s4005_s24, %s5626_s17 }
 0x55c   :  { %p4011_p3 = pnand %p4009_p2, %p4006_p1 }
 0x55e   :  { %4014 = shalt.err (!%p4011_p3)
}
 0x55f   :  { %s4028_s12 = smov 128   ;;  %s4029_s13 = smov 8  }
 0x560   :  { %3080 = dma.vmem_to_hbm [thread:$0]  %s3075_s6, 256, %s5626_s17, [#allocation4], %s4028_s12, %s4028_s12, %s4029_s13  }
 0x561   :  { %4019 = dma.done.wait [#allocation4], 256  }
 0x562   :  { %4020 = vsyncadd [#allocation4], 4294967040 }
 0x563   :  { %3084 = vsyncpa [#allocation3], 1 }
 0x564   :  { %3085 = vsyncpa [#allocation6], 1 }
 0x565   :  { %3086 = vsyncpa [#allocation4], 1 }

</bundles_post_ra>
